<compile_context>
chip_gen: v6e
topology: v6e:2x2x1
jax: 0.10.0
libtpu: 0.0.40
codegen_flags: <defaults>
</compile_context>

<pallas_src>
import functools

import jax
import jax.numpy as jnp
from jax.experimental import pallas as pl
from jax.experimental.pallas import tpu as pltpu


_BIG = 1e30  # sentinel "infinite" squared distance; only safe in f32 buffers


def _round_up(x, m):
    return ((x + m - 1) // m) * m


def _cdiv(a, b):
    return -(-a // b)


def _vmem_cap_bytes():
    """Per-generation VMEM budget (~75% of physical; v7x has only 64 MiB/core)."""
    try:
        return max(16 << 20, int(pltpu.get_tpu_info().vmem_capacity_bytes) * 3 // 4)
    except Exception:
        return 48 << 20  # conservative fallback, safe on v5e / v6e / v7x


# ---------------------------------------------------------------------------
# Kernel 1: min over memory bank of squared distances, tiled over (M, N).
# ---------------------------------------------------------------------------
def _min_sqdist_kernel(f_ref, mT_ref, m2_ref, f2_ref, o_ref, acc_ref):
    j = pl.program_id(1)

    @pl.when(j == 0)
    def _():
        acc_ref[...] = jnp.full_like(acc_ref, _BIG)

    # bf16 x bf16 MXU matmul, f32 accumulation.  The bank copy already carries
    # the -2 factor, so the per-step VPU work is one add + one min.
    fm = jax.lax.dot_general(
        f_ref[...], mT_ref[...], (((1,), (0,)), ((), ())),
        preferred_element_type=jnp.float32,
    )                                                 # (tm, tn) = -2 f.m
    acc_ref[...] = jnp.minimum(acc_ref[...], m2_ref[...] + fm)

    @pl.when(j == pl.num_programs(1) - 1)
    def _():
        # One cross-lane reduce per row tile; ||f||^2 arrives precomputed in
        # f32.  Output is written lane-dense as a (1, tm) row.
        min_d = jnp.min(acc_ref[...], axis=1)         # (tm,)
        o_ref[...] = jnp.maximum(min_d[None, :] + f2_ref[...], 0.0)


def min_sqdist_to_memory_bank(fv, mb, mb_sq, *, tm=2048, tn=512):
    """fv: (M, C), mb: (N, C), mb_sq: (N,) f32  ->  (M,) min squared distance."""
    M, C = fv.shape
    N, _ = mb.shape

    # --- tile sizes (lane-aligned: multiples of 128) --------------------------
    tn = _round_up(min(tn, _round_up(N, 128)), 128)
    Np = _round_up(N, tn)

    Mr = _round_up(M, 128)
    tm = min(_round_up(tm, 128), Mr)

    cap = _vmem_cap_bytes()
    # Shrink tm if the double-buffered bf16 input tiles + f32 accumulator would
    # blow the per-core VMEM budget (matters for very large C and v7x's 64 MiB).
    while tm > 256 and (2 * tm * C * 2 + 2 * C * tn * 2 + tm * tn * 4) > cap // 2:
        tm //= 2

    # Prefer an even number of row tiles so the "parallel" axis splits evenly
    # across the two TensorCores of a v7x-class chip.
    n_tiles = _cdiv(Mr, tm)
    if n_tiles > 1 and n_tiles % 2 == 1:
        tm = _round_up(_cdiv(Mr, n_tiles + 1), 128)
    Mp = _round_up(M, tm)

    # --- operand prep (one-time XLA work, amortized over the whole grid) -----
    fv32 = fv.astype(jnp.float32)
    f2 = jnp.sum(fv32 * fv32, axis=1)                       # (M,) f32 ||f||^2
    fv_bf = fv.astype(jnp.bfloat16)                         # halve feature DMA

    fv_p = fv_bf if Mp == M else jnp.pad(fv_bf, ((0, Mp - M), (0, 0)))
    f2_p = (f2 if Mp == M else jnp.pad(f2, (0, Mp - M))).reshape(1, Mp)

    # Pre-transposed, pre-scaled bf16 bank: (C, N) with -2 folded in (exact,
    # power-of-two scale).  Streams half the HBM bytes and avoids any per-step
    # RHS relayout in the kernel.
    mbT = (-2.0 * mb.astype(jnp.float32).T).astype(jnp.bfloat16)   # (C, N)
    mbT_p = mbT if Np == N else jnp.pad(mbT, ((0, 0), (0, Np - N)))
    m2 = mb_sq.reshape(1, N).astype(jnp.float32)
    m2_p = m2 if Np == N else jnp.pad(m2, ((0, 0), (0, Np - N)),
                                      constant_values=_BIG)

    # --- VMEM limit: what we need (double-buffered), capped per generation ---
    need = (2 * tm * C * 2          # feature tiles (bf16)
            + 2 * C * tn * 2        # bank tiles (bf16)
            + 2 * 8 * tn * 4        # ||m||^2 rows (sublane-padded)
            + 2 * 8 * tm * 4        # ||f||^2 rows
            + 2 * 8 * tm * 4        # output rows
            + tm * tn * 4           # f32 accumulator
            + (2 << 20))            # headroom for compiler-internal scratch
    vmem_limit = int(min(max(2 * need, 16 << 20), cap))

    out = pl.pallas_call(
        _min_sqdist_kernel,
        out_shape=jax.ShapeDtypeStruct((1, Mp), jnp.float32),
        grid_spec=pltpu.PrefetchScalarGridSpec(
            num_scalar_prefetch=0,
            grid=(Mp // tm, Np // tn),
            in_specs=[
                pl.BlockSpec((tm, C), lambda i, j: (i, 0)),   # features (bf16)
                pl.BlockSpec((C, tn), lambda i, j: (0, j)),   # -2 * bank^T (bf16)
                pl.BlockSpec((1, tn), lambda i, j: (0, j)),   # ||m||^2 (f32)
                pl.BlockSpec((1, tm), lambda i, j: (0, i)),   # ||f||^2 (f32)
            ],
            out_specs=pl.BlockSpec((1, tm), lambda i, j: (0, i)),
            scratch_shapes=[pltpu.VMEM((tm, tn), jnp.float32)],
        ),
        compiler_params=pltpu.CompilerParams(
            dimension_semantics=("parallel", "arbitrary"),
            vmem_limit_bytes=vmem_limit,
        ),
    )(fv_p, mbT_p, m2_p, f2_p)
    return out.reshape(Mp)[:M]


# ---------------------------------------------------------------------------
# Kernel 2: (B, N) squared-distance matrix for the B selected pixels (cold
# path, B ~ 2: launch/DMA latency, not throughput — kept simple in f32).
# ---------------------------------------------------------------------------
def _pairwise_sqdist_kernel(x_ref, m_ref, m2_ref, o_ref):
    x = x_ref[...]                                   # (B, C) f32
    xm = jax.lax.dot_general(
        x, m_ref[...], (((1,), (1,)), ((), ())),
        preferred_element_type=jnp.float32,
    )                                                # (B, tn)
    x2 = jnp.sum(x * x, axis=1, keepdims=True)       # (B, 1) — B is tiny
    o_ref[...] = jnp.maximum(x2 + m2_ref[...] - 2.0 * xm, 0.0)


def pairwise_sqdist(x, mb, mb_sq, *, tn=256):
    """x: (B, C), mb: (N, C), mb_sq: (N,)  ->  (B, N) squared distances."""
    B, C = x.shape
    N, _ = mb.shape
    tn = _round_up(min(tn, _round_up(N, 128)), 128)
    Np = _round_up(N, tn)

    mb_p = mb if Np == N else jnp.pad(mb, ((0, Np - N), (0, 0)))
    m2 = mb_sq.reshape(1, N).astype(jnp.float32)
    m2_p = m2 if Np == N else jnp.pad(m2, ((0, 0), (0, Np - N)),
                                      constant_values=_BIG)

    out = pl.pallas_call(
        _pairwise_sqdist_kernel,
        out_shape=jax.ShapeDtypeStruct((B, Np), jnp.float32),
        grid_spec=pltpu.PrefetchScalarGridSpec(
            num_scalar_prefetch=0,
            grid=(Np // tn,),
            in_specs=[
                pl.BlockSpec((B, C), lambda j: (0, 0)),
                pl.BlockSpec((tn, C), lambda j: (j, 0)),
                pl.BlockSpec((1, tn), lambda j: (0, j)),
            ],
            out_specs=pl.BlockSpec((B, tn), lambda j: (0, j)),
        ),
        compiler_params=pltpu.CompilerParams(
            dimension_semantics=("parallel",)),
    )(x.astype(jnp.float32), mb_p, m2_p)
    return out[:, :N]


# ---------------------------------------------------------------------------
# Scorer forward (glue in plain JAX, hot paths in Pallas).
# ---------------------------------------------------------------------------
@functools.partial(jax.jit, static_argnames=("b",))
def scorer_forward(feature_batch, memory_bank, b):
    """feature_batch: (B, H, W, C), memory_bank: (N, C).

    Returns (pixel_scores (B, 1, H, W), image_scores (B,)).
    """
    B, H, W, C = feature_batch.shape
    M = B * H * W

    feature_vectors = feature_batch.reshape(M, C).astype(jnp.float32)
    memory_bank = memory_bank.astype(jnp.float32)
    mb_sq = jnp.sum(memory_bank * memory_bank, axis=1)                # (N,)

    # Pixel scores: min squared distance to memory bank, then sqrt.
    min_sq = min_sqdist_to_memory_bank(feature_vectors, memory_bank, mb_sq)
    pixel_scores = jnp.sqrt(min_sq).reshape(B, H * W)

    # Image score: the max-scoring pixel per image, re-scored against its
    # b nearest memory-bank neighbors.
    idx = jnp.argmax(pixel_scores, axis=1)                            # (B,)
    flattened_idx = idx + jnp.arange(B) * H * W                       # (B,)
    selected_vectors = feature_vectors[flattened_idx, :]              # (B, C)

    dists_to_mb = pairwise_sqdist(selected_vectors, memory_bank, mb_sq)  # (B, N)

    # b smallest squared distances, sorted ascending (== torch.topk largest=False).
    neg_topk_vals, _ = jax.lax.top_k(-dists_to_mb, b)                 # (B, b)
    selected_dists = jnp.sqrt(jnp.maximum(-neg_topk_vals, 0.0))       # (B, b)

    soft = jax.nn.softmax(selected_dists, axis=1)
    image_scores = selected_dists[:, 0] * (1.0 - soft[:, 0])          # (B,)

    return pixel_scores.reshape(B, 1, H, W), image_scores


# ---------------------------------------------------------------------------
# Pure-JAX f32 reference (mirrors the PyTorch forward) for a sanity check.
# ---------------------------------------------------------------------------
def scorer_reference(feature_batch, memory_bank, b):
    B, H, W, C = feature_batch.shape
    fv = feature_batch.reshape(B * H * W, C).astype(jnp.float32)
    mb = memory_bank.astype(jnp.float32)
    sq = (jnp.sum(fv**2, 1)[:, None] + jnp.sum(mb**2, 1)[None, :]
          - 2.0 * jnp.matmul(fv, mb.T, precision=jax.lax.Precision.HIGHEST))
    pix = jnp.sqrt(jnp.maximum(jnp.min(sq, axis=1), 0.0).reshape(B, H * W))
    idx = jnp.argmax(pix, axis=1) + jnp.arange(B) * H * W
    sel = fv[idx]
    d = jnp.sum((sel[:, None, :] - mb[None, :, :]) ** 2, axis=2)
    vals = jnp.sort(d, axis=1)[:, :b]
    sd = jnp.sqrt(vals)
    img = sd[:, 0] * (1.0 - jax.nn.softmax(sd, axis=1)[:, 0])
    return pix.reshape(B, 1, H, W), img


if __name__ == "__main__":
    # Small, deterministic setup consistent with the module's forward.
    B, H, W, C = 2, 16, 16, 32     # feature batch (B, H, W, C)
    N = 256                        # memory bank rows
    b = 3                          # nearest neighbors used for image score

    key = jax.random.PRNGKey(0)
    k_feat, k_mb = jax.random.split(key)
    feature_batch = jax.random.normal(k_feat, (B, H, W, C), dtype=jnp.float32)
    # Plant one clearly anomalous pixel per image (representative of anomaly
    # data) so the image-level argmax is well separated and the bf16 kernel and
    # f32 reference select the same pixel.
    feature_batch = feature_batch.at[:, 3, 5, :].add(3.0)
    memory_bank = jax.random.normal(k_mb, (N, C), dtype=jnp.float32)

    pixel_scores, image_scores = scorer_forward(feature_batch, memory_bank, b)
    jax.block_until_ready((pixel_scores, image_scores))

    # Sanity check against a pure-JAX f32 reference of the PyTorch semantics
    # (bf16 MXU operands in the hot path -> bf16-appropriate tolerances).
    ref_pix, ref_img = scorer_reference(feature_batch, memory_bank, b)
    assert pixel_scores.shape == (B, 1, H, W)
    assert image_scores.shape == (B,)
    assert jnp.allclose(pixel_scores, ref_pix, rtol=2e-2, atol=5e-2), (
        float(jnp.max(jnp.abs(pixel_scores - ref_pix))))
    assert jnp.allclose(image_scores, ref_img, rtol=2e-2, atol=5e-2), (
        float(jnp.max(jnp.abs(image_scores - ref_img))))

    print("KERNEL_OK")
</pallas_src>

<mosaic_0001>
module attributes {stable_mosaic.version = 11 : i64} {
  func.func @_pairwise_sqdist_kernel(%arg0: i32, %arg1: memref<2x32xf32, #tpu.memory_space<vmem>>, %arg2: memref<256x32xf32, #tpu.memory_space<vmem>>, %arg3: memref<1x256xf32, #tpu.memory_space<vmem>>, %arg4: memref<2x256xf32, #tpu.memory_space<vmem>>) attributes {dimension_semantics = [#tpu.dimension_semantics<parallel>], iteration_bounds = array<i64: 1>, scalar_prefetch = 0 : i64, scratch_operands = 0 : i64, tpu.core_type = #tpu.core_type<tc>, window_params = [{pipeline_mode = #tpu.pipeline_mode<synchronous>, transform_indices = @transform_0, window_bounds = array<i64: 2, 32>}, {transform_indices = @transform_1, window_bounds = array<i64: 256, 32>}, {transform_indices = @transform_2, window_bounds = array<i64: 1, 256>}, {transform_indices = @transform_3, window_bounds = array<i64: 2, 256>}]} {
    %c0 = arith.constant 0 : index
    %c0_0 = arith.constant 0 : index
    %0 = vector.load %arg1[%c0, %c0_0] : memref<2x32xf32, #tpu.memory_space<vmem>>, vector<2x32xf32>
    %c0_1 = arith.constant 0 : index
    %c0_2 = arith.constant 0 : index
    %1 = vector.load %arg2[%c0_1, %c0_2] : memref<256x32xf32, #tpu.memory_space<vmem>>, vector<256x32xf32>
    %cst = arith.constant dense<0.000000e+00> : vector<2x256xf32>
    %2 = tpu.matmul %0, %1, %cst {dimension_numbers = #tpu.dot_dimension_numbers<[1], [1], [0], [0], [0, 0, 1, 0], [], []>} : vector<2x32xf32>, vector<256x32xf32>, vector<2x256xf32> -> vector<2x256xf32>
    %3 = arith.mulf %0, %0 : vector<2x32xf32>
    %cst_3 = arith.constant dense<0.000000e+00> : vector<2xf32>
    %4 = vector.multi_reduction <add>, %3, %cst_3 [1] : vector<2x32xf32> to vector<2xf32>
    %5 = vector.shape_cast %4 : vector<2xf32> to vector<2x1xf32>
    %c0_4 = arith.constant 0 : index
    %c0_5 = arith.constant 0 : index
    %6 = vector.load %arg3[%c0_4, %c0_5] : memref<1x256xf32, #tpu.memory_space<vmem>>, vector<1x256xf32>
    %7 = vector.broadcast %5 : vector<2x1xf32> to vector<2x256xf32>
    %8 = vector.broadcast %6 : vector<1x256xf32> to vector<2x256xf32>
    %9 = arith.addf %7, %8 : vector<2x256xf32>
    %cst_6 = arith.constant 2.000000e+00 : f32
    %10 = vector.broadcast %cst_6 : f32 to vector<2x256xf32>
    %11 = arith.mulf %10, %2 : vector<2x256xf32>
    %12 = arith.subf %9, %11 : vector<2x256xf32>
    %cst_7 = arith.constant 0.000000e+00 : f32
    %13 = vector.broadcast %cst_7 : f32 to vector<2x256xf32>
    %14 = arith.maximumf %12, %13 : vector<2x256xf32>
    %c0_8 = arith.constant 0 : index
    %c0_9 = arith.constant 0 : index
    %15 = vector.load %arg4[%c0_8, %c0_9] : memref<2x256xf32, #tpu.memory_space<vmem>>, vector<2x256xf32>
    tpu.vector_store %arg4[%c0_8, %c0_9], %14 {strides = array<i32>} : memref<2x256xf32, #tpu.memory_space<vmem>>, vector<2x256xf32>,
    return
  }
  func.func @transform_0(%arg0: i32) -> (i32, i32) {
    %c0_i32 = arith.constant 0 : i32
    %c0_i32_0 = arith.constant 0 : i32
    %c0_i32_1 = arith.constant 0 : i32
    return %c0_i32, %c0_i32_0 : i32, i32
  }
  func.func @transform_1(%arg0: i32) -> (i32, i32) {
    %c0_i32 = arith.constant 0 : i32
    %c0_i32_0 = arith.constant 0 : i32
    return %arg0, %c0_i32 : i32, i32
  }
  func.func @transform_2(%arg0: i32) -> (i32, i32) {
    %c0_i32 = arith.constant 0 : i32
    %c0_i32_0 = arith.constant 0 : i32
    return %c0_i32, %arg0 : i32, i32
  }
  func.func @transform_3(%arg0: i32) -> (i32, i32) {
    %c0_i32 = arith.constant 0 : i32
    %c0_i32_0 = arith.constant 0 : i32
    return %c0_i32, %arg0 : i32, i32
  }
}

module attributes {stable_mosaic.version = 11 : i64} {
  func.func @_min_sqdist_kernel(%arg0: i32, %arg1: i32, %arg2: memref<512x32xbf16, #tpu.memory_space<vmem>>, %arg3: memref<32x256xbf16, #tpu.memory_space<vmem>>, %arg4: memref<1x256xf32, #tpu.memory_space<vmem>>, %arg5: memref<1x512xf32, #tpu.memory_space<vmem>>, %arg6: memref<1x512xf32, #tpu.memory_space<vmem>>, %arg7: memref<512x256xf32, #tpu.memory_space<vmem>>) attributes {dimension_semantics = [#tpu.dimension_semantics<parallel>, #tpu.dimension_semantics<arbitrary>], iteration_bounds = array<i64: 1, 1>, scalar_prefetch = 0 : i64, scratch_operands = 1 : i64, tpu.core_type = #tpu.core_type<tc>, window_params = [{transform_indices = @transform_0, window_bounds = array<i64: 512, 32>}, {transform_indices = @transform_1, window_bounds = array<i64: 32, 256>}, {transform_indices = @transform_2, window_bounds = array<i64: 1, 256>}, {transform_indices = @transform_3, window_bounds = array<i64: 1, 512>}, {transform_indices = @transform_4, window_bounds = array<i64: 1, 512>}]} {
    %c0_i32 = arith.constant 0 : i32
    %0 = arith.cmpi eq, %arg1, %c0_i32 : i32
    %1 = arith.extui %0 : i1 to i32
    %c0_i32_0 = arith.constant 0 : i32
    %2 = arith.cmpi ne, %1, %c0_i32_0 : i32
    scf.if %2 {
      %cst_12 = arith.constant 1.000000e+30 : f32
      %15 = vector.broadcast %cst_12 : f32 to vector<512x256xf32>
      %c0_13 = arith.constant 0 : index
      %c0_14 = arith.constant 0 : index
      %16 = vector.load %arg7[%c0_13, %c0_14] : memref<512x256xf32, #tpu.memory_space<vmem>>, vector<512x256xf32>
      tpu.vector_store %arg7[%c0_13, %c0_14], %15 {strides = array<i32>} : memref<512x256xf32, #tpu.memory_space<vmem>>, vector<512x256xf32>,
    } else {
    }
    %c0 = arith.constant 0 : index
    %c0_1 = arith.constant 0 : index
    %3 = vector.load %arg2[%c0, %c0_1] : memref<512x32xbf16, #tpu.memory_space<vmem>>, vector<512x32xbf16>
    %c0_2 = arith.constant 0 : index
    %c0_3 = arith.constant 0 : index
    %4 = vector.load %arg3[%c0_2, %c0_3] : memref<32x256xbf16, #tpu.memory_space<vmem>>, vector<32x256xbf16>
    %cst = arith.constant dense<0.000000e+00> : vector<512x256xf32>
    %5 = tpu.matmul %3, %4, %cst {dimension_numbers = #tpu.dot_dimension_numbers<[1], [0], [0], [1], [0, 0, 1, 1], [], []>} : vector<512x32xbf16>, vector<32x256xbf16>, vector<512x256xf32> -> vector<512x256xf32>
    %c0_4 = arith.constant 0 : index
    %c0_5 = arith.constant 0 : index
    %6 = vector.load %arg7[%c0_4, %c0_5] : memref<512x256xf32, #tpu.memory_space<vmem>>, vector<512x256xf32>
    %c0_6 = arith.constant 0 : index
    %c0_7 = arith.constant 0 : index
    %7 = vector.load %arg4[%c0_6, %c0_7] : memref<1x256xf32, #tpu.memory_space<vmem>>, vector<1x256xf32>
    %8 = vector.broadcast %7 : vector<1x256xf32> to vector<512x256xf32>
    %9 = arith.addf %8, %5 : vector<512x256xf32>
    %10 = arith.minimumf %6, %9 : vector<512x256xf32>
    %c0_8 = arith.constant 0 : index
    %c0_9 = arith.constant 0 : index
    %11 = vector.load %arg7[%c0_8, %c0_9] : memref<512x256xf32, #tpu.memory_space<vmem>>, vector<512x256xf32>
    tpu.vector_store %arg7[%c0_8, %c0_9], %10 {strides = array<i32>} : memref<512x256xf32, #tpu.memory_space<vmem>>, vector<512x256xf32>,
    %c0_i32_10 = arith.constant 0 : i32
    %12 = arith.cmpi eq, %arg1, %c0_i32_10 : i32
    %13 = arith.extui %12 : i1 to i32
    %c0_i32_11 = arith.constant 0 : i32
    %14 = arith.cmpi ne, %13, %c0_i32_11 : i32
    scf.if %14 {
      %c0_12 = arith.constant 0 : index
      %c0_13 = arith.constant 0 : index
      %15 = vector.load %arg7[%c0_12, %c0_13] : memref<512x256xf32, #tpu.memory_space<vmem>>, vector<512x256xf32>
      %cst_14 = arith.constant dense<0x7F800000> : vector<512xf32>
      %16 = vector.multi_reduction <minimumf>, %15, %cst_14 [1] : vector<512x256xf32> to vector<512xf32>
      %17 = vector.shape_cast %16 : vector<512xf32> to vector<1x512xf32>
      %c0_15 = arith.constant 0 : index
      %c0_16 = arith.constant 0 : index
      %18 = vector.load %arg5[%c0_15, %c0_16] : memref<1x512xf32, #tpu.memory_space<vmem>>, vector<1x512xf32>
      %19 = arith.addf %17, %18 : vector<1x512xf32>
      %cst_17 = arith.constant 0.000000e+00 : f32
      %20 = vector.broadcast %cst_17 : f32 to vector<1x512xf32>
      %21 = arith.maximumf %19, %20 : vector<1x512xf32>
      %c0_18 = arith.constant 0 : index
      %c0_19 = arith.constant 0 : index
      %22 = vector.load %arg6[%c0_18, %c0_19] : memref<1x512xf32, #tpu.memory_space<vmem>>, vector<1x512xf32>
      tpu.vector_store %arg6[%c0_18, %c0_19], %21 {strides = array<i32>} : memref<1x512xf32, #tpu.memory_space<vmem>>, vector<1x512xf32>,
    } else {
    }
    return
  }
  func.func @transform_0(%arg0: i32, %arg1: i32) -> (i32, i32) {
    %c0_i32 = arith.constant 0 : i32
    %c0_i32_0 = arith.constant 0 : i32
    return %arg0, %c0_i32 : i32, i32
  }
  func.func @transform_1(%arg0: i32, %arg1: i32) -> (i32, i32) {
    %c0_i32 = arith.constant 0 : i32
    %c0_i32_0 = arith.constant 0 : i32
    return %c0_i32, %arg1 : i32, i32
  }
  func.func @transform_2(%arg0: i32, %arg1: i32) -> (i32, i32) {
    %c0_i32 = arith.constant 0 : i32
    %c0_i32_0 = arith.constant 0 : i32
    return %c0_i32, %arg1 : i32, i32
  }
  func.func @transform_3(%arg0: i32, %arg1: i32) -> (i32, i32) {
    %c0_i32 = arith.constant 0 : i32
    %c0_i32_0 = arith.constant 0 : i32
    return %c0_i32, %arg0 : i32, i32
  }
  func.func @transform_4(%arg0: i32, %arg1: i32) -> (i32, i32) {
    %c0_i32 = arith.constant 0 : i32
    %c0_i32_0 = arith.constant 0 : i32
    return %c0_i32, %arg0 : i32, i32
  }
}

</mosaic_0001>

<bundles_post_ra>
// kernel: scorer_forward.3
= control target key start
LH: loop header
LB: loop body
LE: loop exit
PB: predicated region body
PF: predicated region fallthrough
CT: control target
= control target key end

     0   :  { %vm47_vm0 = vcmask 261120   ;;  %vm219_vm1 = vcmask 254976   ;;  %v225_v35 = vlaneseq  ;;  %s486_s1 = inlined_call_operand.vmem [shape: f32[256,32], index: 1, kind: input, shape index: {}]   ;;  %s487_s0 = inlined_call_operand.vmem [shape: f32[2,32], index: 0, kind: input, shape index: {}]   ;;  %s488_s2 = inlined_call_operand.vmem [shape: f32[1,256], index: 2, kind: input, shape index: {}]   ;;  %s489_s3 = inlined_call_operand.vmem [shape: f32[2,256], index: 3, kind: output, shape index: {}]  }
   0x1   :  { %v46_v0 = vld [vmem:[%s486_s1 + $0xf8] sm:$0xff]  ;;  %v45_v2 = vld [vmem:[%s486_s1 + $0xf0] sm:$0xff]  ;;  %v44_v4 = vld [vmem:[%s486_s1 + $0xe8] sm:$0xff] }
   0x2   :  { %v30_v1 = vld [vmem:[%s486_s1 + $0x78] sm:$0xff]  ;;  %293 = vmatprep.subr.msk.mxu0 %vm47_vm0, %v46_v0  ;;  %v29_v3 = vld [vmem:[%s486_s1 + $0x70] sm:$0xff]  ;;  %v28_v5 = vld [vmem:[%s486_s1 + $0x68] sm:$0xff]  ;;  %v226_v36 = vshrl.u32 %v225_v35, 7 }
   0x3   :  { %294 = vmatpush3.xpose.msk.msra.mxu0 %vm47_vm0, %v30_v1  ;;  %v43_v6 = vld [vmem:[%s486_s1 + $0xe0] sm:$0xff]  ;;  %v42_v10 = vld [vmem:[%s486_s1 + $0xd8] sm:$0xff]  ;;  %v41_v13 = vld [vmem:[%s486_s1 + $0xd0] sm:$0xff] }
   0x4   :  { %295 = vmatprep.subr.msk.mxu0 %vm47_vm0, %v45_v2  ;;  %v14_v7 = vld [vmem:[%s487_s0] sm:$0x3]  ;;  %v26_v12 = vld [vmem:[%s486_s1 + $0x58] sm:$0xff]  ;;  %v25_v14 = vld [vmem:[%s486_s1 + $0x50] sm:$0xff]  ;;  %v227_v37 = vsub.s32 0, %v226_v36  ;;  %v231_v39 = vsub.s32 1, %v226_v36 }
   0x5   :  { %v27_v8 = vld [vmem:[%s486_s1 + $0x60] sm:$0xff]  ;;  %325 = vmatprep.mubr.msk.f32.mxu0 %vm47_vm0, %v14_v7  ;;  %v218_v9 = vmul.f32 %v14_v7, %v14_v7  ;;  %v40_v15 = vld [vmem:[%s486_s1 + $0xc8] sm:$0xff]  ;;  %v38_v19 = vld [vmem:[%s486_s1 + $0xb8] sm:$0xff] }
   0x6   :  { %v24_v16 = vld [vmem:[%s486_s1 + $0x48] sm:$0xff]  ;;  %v39_v17 = vld [vmem:[%s486_s1 + $0xc0] sm:$0xff]  ;;  %v22_v20 = vld [vmem:[%s486_s1 + $0x38] sm:$0xff] }
   0x7   :  { %296 = vmatpush3.xpose.msk.msra.mxu0 %vm47_vm0, %v29_v3  ;;  %v220_v11 = vsel %vm219_vm1, %v218_v9, 0.0  ;;  %v23_v18 = vld [vmem:[%s486_s1 + $0x40] sm:$0xff]  ;;  %v37_v21 = vld [vmem:[%s486_s1 + $0xb0] sm:$0xff]  ;;  %v36_v23 = vld [vmem:[%s486_s1 + $0xa8] sm:$0xff] }
   0x8   :  { %297 = vmatprep.subr.msk.mxu0 %vm47_vm0, %v44_v4  ;;  %221 = vadd.xlane.f32.xlu0 %v220_v11  ;;  %v21_v22 = vld [vmem:[%s486_s1 + $0x30] sm:$0xff]  ;;  %v20_v24 = vld [vmem:[%s486_s1 + $0x28] sm:$0xff]  ;;  %v35_v25 = vld [vmem:[%s486_s1 + $0xa0] sm:$0xff] }
   0x9   :  { %v19_v26 = vld [vmem:[%s486_s1 + $0x20] sm:$0xff]  ;;  %v34_v27 = vld [vmem:[%s486_s1 + $0x98] sm:$0xff]  ;;  %v33_v29 = vld [vmem:[%s486_s1 + $0x90] sm:$0xff] }
   0xa   :  { %v18_v28 = vld [vmem:[%s486_s1 + $0x18] sm:$0xff]  ;;  %v17_v30 = vld [vmem:[%s486_s1 + $0x10] sm:$0xff]  ;;  %v32_v31 = vld [vmem:[%s486_s1 + $0x88] sm:$0xff] }
   0xb   :  { %298 = vmatpush3.xpose.msk.msra.mxu0 %vm47_vm0, %v28_v5  ;;  %v16_v32 = vld [vmem:[%s486_s1 + $0x8] sm:$0xff]  ;;  %v31_v33 = vld [vmem:[%s486_s1 + $0x80] sm:$0xff] }
   0xc   :  { %299 = vmatprep.subr.msk.mxu0 %vm47_vm0, %v43_v6  ;;  %v15_v34 = vld [vmem:[%s486_s1] sm:$0xff] }
   0xd   :  { %v223_v38 = vld [vmem:[%s488_s2] sm:$0x3] }
   0xe   :  { %v228_v40 = vrot.slane %v223_v38, %v227_v37  ;;  %v232_v42 = vrot.slane %v223_v38, %v231_v39 }
   0xf   :  { %300 = vmatpush3.xpose.msk.msra.mxu0 %vm47_vm0, %v27_v8 }
  0x10   :  { %301 = vmatprep.subr.msk.mxu0 %vm47_vm0, %v42_v10 }
  0x13   :  { %302 = vmatpush3.xpose.msk.msra.mxu0 %vm47_vm0, %v26_v12 }
  0x14   :  { %303 = vmatprep.subr.msk.mxu0 %vm47_vm0, %v41_v13 }
  0x17   :  { %304 = vmatpush3.xpose.msk.msra.mxu0 %vm47_vm0, %v25_v14 }
  0x18   :  { %305 = vmatprep.subr.msk.mxu0 %vm47_vm0, %v40_v15 }
  0x1b   :  { %306 = vmatpush3.xpose.msk.msra.mxu0 %vm47_vm0, %v24_v16 }
  0x1c   :  { %307 = vmatprep.subr.msk.mxu0 %vm47_vm0, %v39_v17 }
  0x1f   :  { %308 = vmatpush3.xpose.msk.msra.mxu0 %vm47_vm0, %v23_v18 }
  0x20   :  { %309 = vmatprep.subr.msk.mxu0 %vm47_vm0, %v38_v19 }
  0x23   :  { %310 = vmatpush3.xpose.msk.msra.mxu0 %vm47_vm0, %v22_v20 }
  0x24   :  { %311 = vmatprep.subr.msk.mxu0 %vm47_vm0, %v37_v21 }
  0x27   :  { %312 = vmatpush3.xpose.msk.msra.mxu0 %vm47_vm0, %v21_v22 }
  0x28   :  { %313 = vmatprep.subr.msk.mxu0 %vm47_vm0, %v36_v23 }
  0x2b   :  { %314 = vmatpush3.xpose.msk.msra.mxu0 %vm47_vm0, %v20_v24 }
  0x2c   :  { %315 = vmatprep.subr.msk.mxu0 %vm47_vm0, %v35_v25 }
  0x2f   :  { %316 = vmatpush3.xpose.msk.msra.mxu0 %vm47_vm0, %v19_v26 }
  0x30   :  { %317 = vmatprep.subr.msk.mxu0 %vm47_vm0, %v34_v27 }
  0x33   :  { %318 = vmatpush3.xpose.msk.msra.mxu0 %vm47_vm0, %v18_v28 }
  0x34   :  { %319 = vmatprep.subr.msk.mxu0 %vm47_vm0, %v33_v29 }
  0x37   :  { %320 = vmatpush3.xpose.msk.msra.mxu0 %vm47_vm0, %v17_v30 }
  0x38   :  { %321 = vmatprep.subr.msk.mxu0 %vm47_vm0, %v32_v31 }
  0x3b   :  { %322 = vmatpush3.xpose.msk.msra.mxu0 %vm47_vm0, %v16_v32 }
  0x3c   :  { %323 = vmatprep.subr.msk.mxu0 %vm47_vm0, %v31_v33 }
  0x3f   :  { %324 = vmatpush3.xpose.msk.msra.mxu0 %vm47_vm0, %v15_v34 }
  0x42   :  { %326 = vmatmul.mubr.msk.f32.vlgmr.msra.gmra.mxu0 %vm47_vm0, %v14_v7 }
  0x91   :  { %v222_v41 = vpop.xlane.xlu0 %221 }
  0x92   :  { %v235_v43 = vadd.f32 %v228_v40, %v222_v41  ;;  %v236_v46 = vadd.f32 %v232_v42, %v222_v41 }
 0x102   :  { %v213_v44 = vpop.f32.mrf.mxu0 }
 0x103   :  { %v237_v45 = vmul.f32 2.0, %v213_v44 }
 0x104   :  { %v215_v47 = vpop.f32.mrf.mxu0 }
 0x105   :  { %v239_v48 = vsub.f32 %v235_v43, %v237_v45  ;;  %v238_v49 = vmul.f32 2.0, %v215_v47 }
 0x107   :  { %v240_v50 = vsub.f32 %v236_v46, %v238_v49  ;;  %v241_v51 = vmax.f32 %v239_v48, 0.0 }
 0x109   :  { %v242_v52 = vmax.f32 %v240_v50, 0.0 }
 0x10b   :  { %v245_v53 = vcombine.low %v241_v51, %v242_v52 }
 0x10d   :  { %292 = vst.sshfl [vmem:[%s489_s3] sm:$0x33 pattern:$0x76325410] %v245_v53 }

// kernel: scorer_forward.2
= control target key start
LH: loop header
LB: loop body
LE: loop exit
PB: predicated region body
PF: predicated region fallthrough
CT: control target
= control target key end

     0   :  { %v9309_v1 = vmov 0   ;;  %v11895_v5 = vlaneseq  ;;  %vm398_vm0 = vcmask 261120   ;;  %vm8696_vm1 = vcmask 130112   ;;  %s11890_s1 = inlined_call_operand.vmem [shape: bf16[32,256], index: 1, kind: input, shape index: {}]   ;;  %s11891_s0 = inlined_call_operand.vmem [shape: bf16[512,32], index: 0, kind: input, shape index: {}]   ;;  %s11892_s3 = inlined_call_operand.vmem [shape: f32[1,512], index: 3, kind: input, shape index: {}]   ;;  %s11893_s2 = inlined_call_operand.vmem [shape: f32[1,256], index: 2, kind: input, shape index: {}]   ;;  %s11894_s4 = inlined_call_operand.vmem [shape: f32[1,512], index: 4, kind: output, shape index: {}]  }
   0x1   :  { %v9271_v0 = vld [vmem:[%s11890_s1 + $0x14] ss:$8 sps:$4 sm:$0xff]   ;;  %527 = vmatprep.mubr.bf16.mxu0 %v9309_v1  ;;  %687 = vmatprep.mubr.bf16.mxu1 %v9309_v1  ;;  %v9273_v2 = vld [vmem:[%s11890_s1 + $0x10] ss:$8 sps:$4 sm:$0xff]   ;;  %v9274_v3 = vld [vmem:[%s11890_s1 + $0x4] ss:$8 sps:$4 sm:$0xff]  }
   0x2   :  { %9269 = vset.pattern.permute.xlu0 %v9309_v1  ;;  %9270 = vset.pattern.permute.xlu1 %v9309_v1  ;;  %v9276_v4 = vld [vmem:[%s11890_s1] ss:$8 sps:$4 sm:$0xff]   ;;  %v9359_v8 = vshrl.u32 %v11895_v5, 7  ;;  %v9281_v14 = vld [vmem:[%s11891_s0 + $0x10] sm:$0xff]   ;;  %v9283_v16 = vld [vmem:[%s11891_s0 + $0x18] sm:$0xff]   ;;  %vm8703_vm2 = vcmask 195712  }
   0x3   :  { %507 = vmatprep.subr.bf16.mxu0 %v9271_v0  ;;  %9263 = vmatprep.subr.bf16.mxu1 %v9271_v0  ;;  %v9277_v6 = vld [vmem:[%s11891_s0] sm:$0xff]   ;;  %v9279_v10 = vld [vmem:[%s11891_s0 + $0x8] sm:$0xff]   ;;  %v9282_v15 = vld [vmem:[%s11891_s0 + $0x90] sm:$0xff]   ;;  %vm8710_vm3 = vcmask 261312   ;;  %vm8717_vm4 = vcmask 326912   ;;  %vm8724_vm5 = vcmask 392512  }
   0x4   :  { %508 = vmatpush1.bf16.msra.mxu0 %v9273_v2  ;;  %9265 = vmatpush1.bf16.msra.mxu1 %v9273_v2  ;;  %v9278_v7 = vld [vmem:[%s11891_s0 + $0x80] sm:$0xff]   ;;  %11914 = vst [vmem:[#allocation3_spill] sm:$0xff] %v9359_v8  ;;  %v980_v9 = vsub.s32 0, %v9359_v8  ;;  %v9280_v11 = vld [vmem:[%s11891_s0 + $0x88] sm:$0xff]   ;;  %v9284_v17 = vld [vmem:[%s11891_s0 + $0x98] sm:$0xff]   ;;  %v984_v18 = vsub.s32 1, %v9359_v8 }
   0x5   :  { %509 = vmatprep.subr.bf16.mxu0 %v9274_v3  ;;  %9264 = vmatprep.subr.bf16.mxu1 %v9274_v3  ;;  %v9375_v12 = vld [vmem:[%s11892_s3] sm:$0xf]  ;;  %v9287_v22 = vld [vmem:[%s11891_s0 + $0x28] sm:$0xff]   ;;  %v9289_v24 = vld [vmem:[%s11891_s0 + $0x30] sm:$0xff]   ;;  %v1707_v28 = vsub.s32 2, %v9359_v8  ;;  %v1711_v38 = vsub.s32 3, %v9359_v8 }
   0x6   :  { %v1700_v13 = vrot.slane %v9375_v12, %v980_v9  ;;  %v9285_v19 = vld [vmem:[%s11891_s0 + $0x20] sm:$0xff]   ;;  %v1704_v21 = vrot.slane %v9375_v12, %v984_v18  ;;  %v9288_v23 = vld [vmem:[%s11891_s0 + $0xa8] sm:$0xff]   ;;  %v9290_v25 = vld [vmem:[%s11891_s0 + $0xb0] sm:$0xff]   ;;  %vm8731_vm6 = vcmask 458112   ;;  %vm8738_vm7 = vcmask 523712  }
   0x7   :  { %v9286_v20 = vld [vmem:[%s11891_s0 + $0xa0] sm:$0xff]   ;;  %v9291_v26 = vld [vmem:[%s11891_s0 + $0x38] sm:$0xff]   ;;  %v1708_v31 = vrot.slane %v9375_v12, %v1707_v28  ;;  %v9295_v32 = vld [vmem:[%s11891_s0 + $0x48] sm:$0xff]   ;;  %v1712_v41 = vrot.slane %v9375_v12, %v1711_v38  ;;  %vm8745_vm8 = vcmask 589312   ;;  %vm8752_vm9 = vcmask 654912  }
   0x8   :  { %510 = vmatpush1.bf16.msra.mxu0 %v9276_v4  ;;  %9266 = vmatpush1.bf16.msra.mxu1 %v9276_v4  ;;  %v9292_v27 = vld [vmem:[%s11891_s0 + $0xb8] sm:$0xff]   ;;  %v9293_v29 = vld [vmem:[%s11891_s0 + $0x40] sm:$0xff]   ;;  %v9296_v33 = vld [vmem:[%s11891_s0 + $0xc8] sm:$0xff]   ;;  %vm8759_vm10 = vcmask 720512   ;;  %vm8766_vm11 = vcmask 786112   ;;  %vm8773_vm12 = vcmask 851712  }
   0x9   :  { %1718 = vbcast.lane.b32.xlu1 %v1700_v13, 264  ;;  %1714 = vbcast.lane.b32.xlu0 %v1700_v13, 256  ;;  %v9294_v30 = vld [vmem:[%s11891_s0 + $0xc0] sm:$0xff]   ;;  %v9297_v34 = vld [vmem:[%s11891_s0 + $0x50] sm:$0xff]   ;;  %v9299_v36 = vld [vmem:[%s11891_s0 + $0x58] sm:$0xff]   ;;  %vm8780_vm13 = vcmask 917312  }
   0xa   :  { %v9298_v35 = vld [vmem:[%s11891_s0 + $0xd0] sm:$0xff]   ;;  %v9300_v37 = vld [vmem:[%s11891_s0 + $0xd8] sm:$0xff]   ;;  %v9301_v39 = vld [vmem:[%s11891_s0 + $0x60] sm:$0xff]   ;;  %vm8787_vm14 = vcmask 982912   ;;  %vm8794_vm15 = vcmask 1048512  }
   0xb   :  { %9103 = vmatmul.mubr.msk.bf16.vlgmr.msra.gmra.mxu0 %vm398_vm0, %v9277_v6  ;;  %9119 = vmatmul.mubr.msk.bf16.vlgmr.msra.gmra.mxu1 %vm398_vm0, %v9278_v7  ;;  %v9302_v40 = vld [vmem:[%s11891_s0 + $0xe0] sm:$0xff]   ;;  %v9303_v42 = vld [vmem:[%s11891_s0 + $0x68] sm:$0xff]   ;;  %v9305_v44 = vld [vmem:[%s11891_s0 + $0x70] sm:$0xff]  }
   0xc   :  { %537 = vmatprep.mubr.bf16.mxu0 %v9309_v1  ;;  %697 = vmatprep.mubr.bf16.mxu1 %v9309_v1  ;;  %v9304_v43 = vld [vmem:[%s11891_s0 + $0xe8] sm:$0xff]   ;;  %v9306_v45 = vld [vmem:[%s11891_s0 + $0xf0] sm:$0xff]   ;;  %v9307_v46 = vld [vmem:[%s11891_s0 + $0x78] sm:$0xff]  }
   0xd   :  { %1722 = vbcast.lane.b32.xlu1 %v1700_v13, 272  ;;  %1730 = vbcast.lane.b32.xlu0 %v1700_v13, 288  ;;  %v9308_v47 = vld [vmem:[%s11891_s0 + $0xf8] sm:$0xff]   ;;  %v976_v61 = vld [vmem:[%s11893_s2] sm:$0x3] }
   0xe   :  { %v9563_v63 = vrot.slane %v976_v61, %v980_v9  ;;  %v9567_v0 = vrot.slane %v976_v61, %v984_v18 }
  0x11   :  { %1726 = vbcast.lane.b32.xlu1 %v1700_v13, 280  ;;  %1738 = vbcast.lane.b32.xlu0 %v1700_v13, 304 }
  0x13   :  { %9104 = vmatmul.mubr.msk.bf16.gmra.mxu0 %vm398_vm0, %v9279_v10  ;;  %9120 = vmatmul.mubr.msk.bf16.gmra.mxu1 %vm398_vm0, %v9280_v11 }
  0x14   :  { %547 = vmatprep.mubr.bf16.mxu0 %v9309_v1  ;;  %707 = vmatprep.mubr.bf16.mxu1 %v9309_v1 }
  0x15   :  { %1734 = vbcast.lane.b32.xlu1 %v1700_v13, 296  ;;  %1746 = vbcast.lane.b32.xlu0 %v1700_v13, 320 }
  0x19   :  { %1742 = vbcast.lane.b32.xlu1 %v1700_v13, 312  ;;  %1754 = vbcast.lane.b32.xlu0 %v1700_v13, 336 }
  0x1b   :  { %9105 = vmatmul.mubr.msk.bf16.gmra.mxu0 %vm398_vm0, %v9281_v14  ;;  %9121 = vmatmul.mubr.msk.bf16.gmra.mxu1 %vm398_vm0, %v9282_v15 }
  0x1c   :  { %557 = vmatprep.mubr.bf16.mxu0 %v9309_v1  ;;  %717 = vmatprep.mubr.bf16.mxu1 %v9309_v1 }
  0x1d   :  { %1750 = vbcast.lane.b32.xlu1 %v1700_v13, 328  ;;  %1762 = vbcast.lane.b32.xlu0 %v1700_v13, 352 }
  0x21   :  { %1758 = vbcast.lane.b32.xlu1 %v1700_v13, 344  ;;  %1770 = vbcast.lane.b32.xlu0 %v1700_v13, 368 }
  0x23   :  { %9106 = vmatmul.mubr.msk.bf16.gmra.mxu0 %vm398_vm0, %v9283_v16  ;;  %9122 = vmatmul.mubr.msk.bf16.gmra.mxu1 %vm398_vm0, %v9284_v17 }
  0x24   :  { %567 = vmatprep.mubr.bf16.mxu0 %v9309_v1  ;;  %727 = vmatprep.mubr.bf16.mxu1 %v9309_v1 }
  0x25   :  { %1766 = vbcast.lane.b32.xlu1 %v1700_v13, 360  ;;  %1777 = vbcast.lane.b32.xlu0 %v1704_v21, 256 }
  0x29   :  { %1774 = vbcast.lane.b32.xlu1 %v1700_v13, 376  ;;  %1785 = vbcast.lane.b32.xlu0 %v1704_v21, 272 }
  0x2b   :  { %9107 = vmatmul.mubr.msk.bf16.gmra.mxu0 %vm398_vm0, %v9285_v19  ;;  %9123 = vmatmul.mubr.msk.bf16.gmra.mxu1 %vm398_vm0, %v9286_v20 }
  0x2c   :  { %577 = vmatprep.mubr.bf16.mxu0 %v9309_v1  ;;  %737 = vmatprep.mubr.bf16.mxu1 %v9309_v1 }
  0x2d   :  { %1781 = vbcast.lane.b32.xlu1 %v1704_v21, 264  ;;  %1793 = vbcast.lane.b32.xlu0 %v1704_v21, 288 }
  0x31   :  { %1789 = vbcast.lane.b32.xlu1 %v1704_v21, 280  ;;  %1801 = vbcast.lane.b32.xlu0 %v1704_v21, 304 }
  0x33   :  { %9108 = vmatmul.mubr.msk.bf16.gmra.mxu0 %vm398_vm0, %v9287_v22  ;;  %9124 = vmatmul.mubr.msk.bf16.gmra.mxu1 %vm398_vm0, %v9288_v23 }
  0x34   :  { %587 = vmatprep.mubr.bf16.mxu0 %v9309_v1  ;;  %747 = vmatprep.mubr.bf16.mxu1 %v9309_v1 }
  0x35   :  { %1797 = vbcast.lane.b32.xlu1 %v1704_v21, 296  ;;  %1809 = vbcast.lane.b32.xlu0 %v1704_v21, 320 }
  0x39   :  { %1805 = vbcast.lane.b32.xlu1 %v1704_v21, 312  ;;  %1817 = vbcast.lane.b32.xlu0 %v1704_v21, 336 }
  0x3b   :  { %9109 = vmatmul.mubr.msk.bf16.gmra.mxu0 %vm398_vm0, %v9289_v24  ;;  %9125 = vmatmul.mubr.msk.bf16.gmra.mxu1 %vm398_vm0, %v9290_v25 }
  0x3c   :  { %597 = vmatprep.mubr.bf16.mxu0 %v9309_v1  ;;  %757 = vmatprep.mubr.bf16.mxu1 %v9309_v1 }
  0x3d   :  { %1813 = vbcast.lane.b32.xlu1 %v1704_v21, 328  ;;  %1825 = vbcast.lane.b32.xlu0 %v1704_v21, 352 }
  0x41   :  { %1821 = vbcast.lane.b32.xlu1 %v1704_v21, 344  ;;  %1833 = vbcast.lane.b32.xlu0 %v1704_v21, 368 }
  0x43   :  { %9110 = vmatmul.mubr.msk.bf16.gmra.mxu0 %vm398_vm0, %v9291_v26  ;;  %9126 = vmatmul.mubr.msk.bf16.gmra.mxu1 %vm398_vm0, %v9292_v27 }
  0x44   :  { %607 = vmatprep.mubr.bf16.mxu0 %v9309_v1  ;;  %767 = vmatprep.mubr.bf16.mxu1 %v9309_v1 }
  0x45   :  { %1829 = vbcast.lane.b32.xlu1 %v1704_v21, 360  ;;  %1840 = vbcast.lane.b32.xlu0 %v1708_v31, 256 }
  0x49   :  { %1837 = vbcast.lane.b32.xlu1 %v1704_v21, 376  ;;  %1848 = vbcast.lane.b32.xlu0 %v1708_v31, 272 }
  0x4b   :  { %9111 = vmatmul.mubr.msk.bf16.gmra.mxu0 %vm398_vm0, %v9293_v29  ;;  %9127 = vmatmul.mubr.msk.bf16.gmra.mxu1 %vm398_vm0, %v9294_v30 }
  0x4c   :  { %617 = vmatprep.mubr.bf16.mxu0 %v9309_v1  ;;  %777 = vmatprep.mubr.bf16.mxu1 %v9309_v1 }
  0x4d   :  { %1844 = vbcast.lane.b32.xlu1 %v1708_v31, 264  ;;  %1856 = vbcast.lane.b32.xlu0 %v1708_v31, 288 }
  0x51   :  { %1852 = vbcast.lane.b32.xlu1 %v1708_v31, 280  ;;  %1864 = vbcast.lane.b32.xlu0 %v1708_v31, 304 }
  0x53   :  { %9112 = vmatmul.mubr.msk.bf16.gmra.mxu0 %vm398_vm0, %v9295_v32  ;;  %9128 = vmatmul.mubr.msk.bf16.gmra.mxu1 %vm398_vm0, %v9296_v33 }
  0x54   :  { %627 = vmatprep.mubr.bf16.mxu0 %v9309_v1  ;;  %787 = vmatprep.mubr.bf16.mxu1 %v9309_v1 }
  0x55   :  { %1860 = vbcast.lane.b32.xlu1 %v1708_v31, 296  ;;  %1872 = vbcast.lane.b32.xlu0 %v1708_v31, 320 }
  0x59   :  { %1868 = vbcast.lane.b32.xlu1 %v1708_v31, 312  ;;  %1880 = vbcast.lane.b32.xlu0 %v1708_v31, 336 }
  0x5b   :  { %9113 = vmatmul.mubr.msk.bf16.gmra.mxu0 %vm398_vm0, %v9297_v34  ;;  %9129 = vmatmul.mubr.msk.bf16.gmra.mxu1 %vm398_vm0, %v9298_v35 }
  0x5c   :  { %637 = vmatprep.mubr.bf16.mxu0 %v9309_v1  ;;  %797 = vmatprep.mubr.bf16.mxu1 %v9309_v1 }
  0x5d   :  { %1876 = vbcast.lane.b32.xlu1 %v1708_v31, 328  ;;  %1888 = vbcast.lane.b32.xlu0 %v1708_v31, 352 }
  0x61   :  { %1884 = vbcast.lane.b32.xlu1 %v1708_v31, 344  ;;  %1896 = vbcast.lane.b32.xlu0 %v1708_v31, 368 }
  0x63   :  { %9114 = vmatmul.mubr.msk.bf16.gmra.mxu0 %vm398_vm0, %v9299_v36  ;;  %9130 = vmatmul.mubr.msk.bf16.gmra.mxu1 %vm398_vm0, %v9300_v37 }
  0x64   :  { %647 = vmatprep.mubr.bf16.mxu0 %v9309_v1  ;;  %807 = vmatprep.mubr.bf16.mxu1 %v9309_v1 }
  0x65   :  { %1892 = vbcast.lane.b32.xlu1 %v1708_v31, 360  ;;  %1903 = vbcast.lane.b32.xlu0 %v1712_v41, 256 }
  0x69   :  { %1900 = vbcast.lane.b32.xlu1 %v1708_v31, 376  ;;  %1911 = vbcast.lane.b32.xlu0 %v1712_v41, 272 }
  0x6b   :  { %9115 = vmatmul.mubr.msk.bf16.gmra.mxu0 %vm398_vm0, %v9301_v39  ;;  %9131 = vmatmul.mubr.msk.bf16.gmra.mxu1 %vm398_vm0, %v9302_v40 }
  0x6c   :  { %657 = vmatprep.mubr.bf16.mxu0 %v9309_v1  ;;  %817 = vmatprep.mubr.bf16.mxu1 %v9309_v1 }
  0x6d   :  { %1907 = vbcast.lane.b32.xlu1 %v1712_v41, 264  ;;  %1919 = vbcast.lane.b32.xlu0 %v1712_v41, 288 }
  0x71   :  { %1915 = vbcast.lane.b32.xlu1 %v1712_v41, 280  ;;  %1927 = vbcast.lane.b32.xlu0 %v1712_v41, 304 }
  0x73   :  { %9116 = vmatmul.mubr.msk.bf16.gmra.mxu0 %vm398_vm0, %v9303_v42  ;;  %9132 = vmatmul.mubr.msk.bf16.gmra.mxu1 %vm398_vm0, %v9304_v43 }
  0x74   :  { %667 = vmatprep.mubr.bf16.mxu0 %v9309_v1  ;;  %827 = vmatprep.mubr.bf16.mxu1 %v9309_v1 }
  0x75   :  { %1923 = vbcast.lane.b32.xlu1 %v1712_v41, 296  ;;  %1935 = vbcast.lane.b32.xlu0 %v1712_v41, 320 }
  0x79   :  { %1931 = vbcast.lane.b32.xlu1 %v1712_v41, 312  ;;  %1943 = vbcast.lane.b32.xlu0 %v1712_v41, 336 }
  0x7b   :  { %9117 = vmatmul.mubr.msk.bf16.gmra.mxu0 %vm398_vm0, %v9305_v44  ;;  %9133 = vmatmul.mubr.msk.bf16.gmra.mxu1 %vm398_vm0, %v9306_v45  ;;  %v9530_v48 = vpop.permute.xlu1 %1718  ;;  %v9534_v50 = vpop.permute.xlu0 %1714 }
  0x7c   :  { %677 = vmatprep.mubr.bf16.mxu0 %v9309_v1  ;;  %837 = vmatprep.mubr.bf16.mxu1 %v9309_v1 }
  0x7d   :  { %1939 = vbcast.lane.b32.xlu1 %v1712_v41, 328  ;;  %1951 = vbcast.lane.b32.xlu0 %v1712_v41, 352 }
  0x7f   :  { %v9532_v49 = vpop.permute.xlu1 %1722  ;;  %v9538_v52 = vpop.permute.xlu0 %1730 }
  0x81   :  { %1947 = vbcast.lane.b32.xlu1 %v1712_v41, 344  ;;  %1959 = vbcast.lane.b32.xlu0 %v1712_v41, 368 }
  0x83   :  { %9118 = vmatmul.mubr.msk.bf16.gmra.mxu0 %vm398_vm0, %v9307_v46  ;;  %9134 = vmatmul.mubr.msk.bf16.gmra.mxu1 %vm398_vm0, %v9308_v47  ;;  %v9536_v51 = vpop.permute.xlu1 %1726  ;;  %v9542_v54 = vpop.permute.xlu0 %1738 }
  0x85   :  { %1955 = vbcast.lane.b32.xlu1 %v1712_v41, 360 }
  0x87   :  { %v9540_v53 = vpop.permute.xlu1 %1734  ;;  %v9546_v56 = vpop.permute.xlu0 %1746 }
  0x89   :  { %1963 = vbcast.lane.b32.xlu1 %v1712_v41, 376 }
  0x8b   :  { %v9544_v55 = vpop.permute.xlu1 %1742  ;;  %v9550_v58 = vpop.permute.xlu0 %1754 }
  0x8c   :  { %11915 = vst [vmem:[#allocation4_spill] sm:$0xff] %v9550_v58 }
  0x8f   :  { %v9548_v57 = vpop.permute.xlu1 %1750  ;;  %v9554_v60 = vpop.permute.xlu0 %1762 }
  0x90   :  { %11917 = vst [vmem:[#allocation6_spill] sm:$0xff] %v9554_v60 }
  0x93   :  { %v9552_v59 = vpop.permute.xlu1 %1758  ;;  %v9569_v1 = vpop.permute.xlu0 %1770 }
  0x94   :  { %11916 = vst [vmem:[#allocation5_spill] sm:$0xff] %v9552_v59  ;;  %11919 = vst [vmem:[#allocation8_spill] sm:$0xff] %v9569_v1 }
  0x97   :  { %v9559_v62 = vpop.permute.xlu1 %1766  ;;  %v9576_v14 = vpop.permute.xlu0 %1777 }
  0x98   :  { %11918 = vst [vmem:[#allocation7_spill] sm:$0xff] %v9559_v62  ;;  %11921 = vst [vmem:[#allocation10_spill] sm:$0xff] %v9576_v14 }
  0x9b   :  { %v9572_v10 = vpop.permute.xlu1 %1774  ;;  %v9586_v35 = vpop.permute.xlu0 %1785 }
  0x9c   :  { %11920 = vst [vmem:[#allocation9_spill] sm:$0xff] %v9572_v10  ;;  %11923 = vst [vmem:[#allocation12_spill] sm:$0xff] %v9586_v35 }
  0x9f   :  { %v9582_v27 = vpop.permute.xlu1 %1781 }
  0xa0   :  { %11922 = vst [vmem:[#allocation11_spill] sm:$0xff] %v9582_v27 }
  0xcb   :  { %v529_v2 = vpop.f32.mrf.mxu0  ;;  %v689_v3 = vpop.f32.mrf.mxu1 }
  0xcc   :  { %v988_v4 = vadd.f32 %v9563_v63, %v529_v2  ;;  %v1052_v17 = vadd.f32 %v9563_v63, %v689_v3  ;;  %v9592_v3 = vpop.permute.xlu1 %1789 }
  0xcd   :  { %v531_v6 = vpop.f32.mrf.mxu0  ;;  %v691_v7 = vpop.f32.mrf.mxu1  ;;  %11924 = vst [vmem:[#allocation13_spill] sm:$0xff] %v9592_v3 }
  0xce   :  { %v989_v11 = vadd.f32 %v9567_v0, %v531_v6  ;;  %v1053_v12 = vadd.f32 %v9567_v0, %v691_v7  ;;  %v1116_v16 = vmin.f32 %v988_v4, 1e+30  ;;  %v1180_v29 = vmin.f32 %v1052_v17, 1e+30 }
  0xcf   :  { %v533_v9 = vpop.f32.mrf.mxu0  ;;  %v693_v13 = vpop.f32.mrf.mxu1 }
  0xd0   :  { %v1117_v15 = vmin.f32 %v989_v11, 1e+30  ;;  %v1054_v18 = vadd.f32 %v9563_v63, %v693_v13  ;;  %v1181_v22 = vmin.f32 %v1053_v12, 1e+30  ;;  %v990_v30 = vadd.f32 %v9563_v63, %v533_v9 }
  0xd1   :  { %v535_v19 = vpop.f32.mrf.mxu0  ;;  %v695_v20 = vpop.f32.mrf.mxu1 }
  0xd2   :  { %v1055_v21 = vadd.f32 %v9567_v0, %v695_v20  ;;  %v991_v23 = vadd.f32 %v9567_v0, %v535_v19  ;;  %v1503_v26 = vmin.f32 %v1116_v16, %v1117_v15  ;;  %v1182_v31 = vmin.f32 %v1054_v18, 1e+30  ;;  %v9596_v16 = vpop.permute.xlu0 %1793 }
  0xd3   :  { %v539_v24 = vpop.f32.mrf.mxu0  ;;  %v699_v25 = vpop.f32.mrf.mxu1  ;;  %v1599_v43 = vmin.f32 %v1180_v29, %v1181_v22  ;;  %v1118_v45 = vmin.f32 %v990_v30, 1e+30  ;;  %11925 = vst [vmem:[#allocation14_spill] sm:$0xff] %v9596_v16 }
  0xd4   :  { %v1183_v28 = vmin.f32 %v1055_v21, 1e+30  ;;  %v992_v32 = vadd.f32 %v9563_v63, %v539_v24  ;;  %1504 = vmin.xlane.f32.xlu0 %v1503_v26  ;;  %v1056_v36 = vadd.f32 %v9563_v63, %v699_v25  ;;  %v1119_v38 = vmin.f32 %v991_v23, 1e+30 }
  0xd5   :  { %v541_v33 = vpop.f32.mrf.mxu0  ;;  %v701_v34 = vpop.f32.mrf.mxu1 }
  0xd6   :  { %v993_v37 = vadd.f32 %v9567_v0, %v541_v33  ;;  %v1057_v39 = vadd.f32 %v9567_v0, %v701_v34  ;;  %v1602_v42 = vmin.f32 %v1182_v31, %v1183_v28  ;;  %v1120_v46 = vmin.f32 %v992_v32, 1e+30  ;;  %v9603_v32 = vpop.permute.xlu1 %1797 }
  0xd7   :  { %v543_v40 = vpop.f32.mrf.mxu0  ;;  %v703_v41 = vpop.f32.mrf.mxu1  ;;  %v1184_v4 = vmin.f32 %v1056_v36, 1e+30  ;;  %v1506_v13 = vmin.f32 %v1118_v45, %v1119_v38  ;;  %11926 = vst [vmem:[#allocation15_spill] sm:$0xff] %v9603_v32 }
  0xd8   :  { %v1121_v44 = vmin.f32 %v993_v37, 1e+30  ;;  %v994_v47 = vadd.f32 %v9563_v63, %v543_v40  ;;  %1603 = vmin.xlane.f32.xlu1 %v1602_v42  ;;  %1600 = vmin.xlane.f32.xlu0 %v1599_v43  ;;  %v1185_v7 = vmin.f32 %v1057_v39, 1e+30  ;;  %v1058_v19 = vadd.f32 %v9563_v63, %v703_v41  ;;  %v9606_v40 = vpop.permute.xlu0 %1801 }
  0xd9   :  { %v545_v61 = vpop.f32.mrf.mxu0  ;;  %v705_v2 = vpop.f32.mrf.mxu1  ;;  %11927 = vst [vmem:[#allocation16_spill] sm:$0xff] %v9606_v40 }
  0xda   :  { %v995_v6 = vadd.f32 %v9567_v0, %v545_v61  ;;  %v1059_v11 = vadd.f32 %v9567_v0, %v705_v2  ;;  %v1509_v15 = vmin.f32 %v1120_v46, %v1121_v44  ;;  %v1122_v18 = vmin.f32 %v994_v47, 1e+30 }
  0xdb   :  { %v549_v12 = vpop.f32.mrf.mxu0  ;;  %v709_v9 = vpop.f32.mrf.mxu1  ;;  %v1605_v30 = vmin.f32 %v1184_v4, %v1185_v7  ;;  %v1186_v34 = vmin.f32 %v1058_v19, 1e+30 }
  0xdc   :  { %v1123_v17 = vmin.f32 %v995_v6, 1e+30  ;;  %v996_v20 = vadd.f32 %v9563_v63, %v549_v12  ;;  %1507 = vmin.xlane.f32.xlu0 %v1506_v13  ;;  %1510 = vmin.xlane.f32.xlu1 %v1509_v15  ;;  %v1060_v23 = vadd.f32 %v9563_v63, %v709_v9  ;;  %v1187_v25 = vmin.f32 %v1059_v11, 1e+30  ;;  %v9612_v9 = vpop.permute.xlu1 %1805 }
  0xdd   :  { %v551_v21 = vpop.f32.mrf.mxu0  ;;  %v711_v22 = vpop.f32.mrf.mxu1  ;;  %11928 = vst [vmem:[#allocation17_spill] sm:$0xff] %v9612_v9 }
  0xde   :  { %v997_v24 = vadd.f32 %v9567_v0, %v551_v21  ;;  %v1061_v26 = vadd.f32 %v9567_v0, %v711_v22  ;;  %v1512_v31 = vmin.f32 %v1122_v18, %v1123_v17  ;;  %v1124_v36 = vmin.f32 %v996_v20, 1e+30 }
  0xdf   :  { %v553_v28 = vpop.f32.mrf.mxu0  ;;  %v713_v29 = vpop.f32.mrf.mxu1  ;;  %v1188_v41 = vmin.f32 %v1060_v23, 1e+30  ;;  %v1608_v47 = vmin.f32 %v1186_v34, %v1187_v25 }
  0xe0   :  { %v1125_v33 = vmin.f32 %v997_v24, 1e+30  ;;  %v998_v37 = vadd.f32 %v9563_v63, %v553_v28  ;;  %1606 = vmin.xlane.f32.xlu0 %v1605_v30  ;;  %1513 = vmin.xlane.f32.xlu1 %v1512_v31  ;;  %v1189_v43 = vmin.f32 %v1061_v26, 1e+30  ;;  %v1062_v6 = vadd.f32 %v9563_v63, %v713_v29  ;;  %v9617_v23 = vpop.permute.xlu0 %1809 }
  0xe1   :  { %v555_v38 = vpop.f32.mrf.mxu0  ;;  %v715_v39 = vpop.f32.mrf.mxu1  ;;  %11929 = vst [vmem:[#allocation18_spill] sm:$0xff] %v9617_v23 }
  0xe2   :  { %v999_v42 = vadd.f32 %v9567_v0, %v555_v38  ;;  %v1063_v44 = vadd.f32 %v9567_v0, %v715_v39  ;;  %v1515_v61 = vmin.f32 %v1124_v36, %v1125_v33  ;;  %v1126_v4 = vmin.f32 %v998_v37, 1e+30 }
  0xe3   :  { %v559_v45 = vpop.f32.mrf.mxu0  ;;  %v719_v46 = vpop.f32.mrf.mxu1  ;;  %v1611_v21 = vmin.f32 %v1188_v41, %v1189_v43  ;;  %v1190_v25 = vmin.f32 %v1062_v6, 1e+30 }
  0xe4   :  { %v1127_v2 = vmin.f32 %v999_v42, 1e+30  ;;  %v1000_v7 = vadd.f32 %v9563_v63, %v559_v45  ;;  %1609 = vmin.xlane.f32.xlu1 %v1608_v47  ;;  %1516 = vmin.xlane.f32.xlu0 %v1515_v61  ;;  %v1064_v13 = vadd.f32 %v9563_v63, %v719_v46  ;;  %v1191_v17 = vmin.f32 %v1063_v44, 1e+30  ;;  %v9622_v42 = vpop.permute.xlu1 %1813 }
  0xe5   :  { %v561_v11 = vpop.f32.mrf.mxu0  ;;  %v721_v12 = vpop.f32.mrf.mxu1  ;;  %11930 = vst [vmem:[#allocation19_spill] sm:$0xff] %v9622_v42 }
  0xe6   :  { %v1001_v15 = vadd.f32 %v9567_v0, %v561_v11  ;;  %v1065_v18 = vadd.f32 %v9567_v0, %v721_v12  ;;  %v1518_v22 = vmin.f32 %v1126_v4, %v1127_v2  ;;  %v1128_v26 = vmin.f32 %v1000_v7, 1e+30  ;;  %v9626_v2 = vpop.permute.xlu0 %1817 }
  0xe7   :  { %v563_v19 = vpop.f32.mrf.mxu0  ;;  %v723_v20 = vpop.f32.mrf.mxu1  ;;  %v1192_v31 = vmin.f32 %v1064_v13, 1e+30  ;;  %v1614_v39 = vmin.f32 %v1190_v25, %v1191_v17  ;;  %11931 = vst [vmem:[#allocation20_spill] sm:$0xff] %v9626_v2 }
  0xe8   :  { %v1129_v24 = vmin.f32 %v1001_v15, 1e+30  ;;  %v1002_v28 = vadd.f32 %v9563_v63, %v563_v19  ;;  %1612 = vmin.xlane.f32.xlu0 %v1611_v21  ;;  %1519 = vmin.xlane.f32.xlu1 %v1518_v22  ;;  %v1193_v34 = vmin.f32 %v1065_v18, 1e+30  ;;  %v1066_v45 = vadd.f32 %v9563_v63, %v723_v20  ;;  %v9632_v25 = vpop.permute.xlu1 %1821 }
  0xe9   :  { %v565_v29 = vpop.f32.mrf.mxu0  ;;  %v725_v30 = vpop.f32.mrf.mxu1  ;;  %11932 = vst [vmem:[#allocation21_spill] sm:$0xff] %v9632_v25 }
  0xea   :  { %v1003_v33 = vadd.f32 %v9567_v0, %v565_v29  ;;  %v1067_v36 = vadd.f32 %v9567_v0, %v725_v30  ;;  %v1521_v41 = vmin.f32 %v1128_v26, %v1129_v24  ;;  %v1130_v44 = vmin.f32 %v1002_v28, 1e+30 }
  0xeb   :  { %v569_v37 = vpop.f32.mrf.mxu0  ;;  %v729_v38 = vpop.f32.mrf.mxu1  ;;  %v1617_v15 = vmin.f32 %v1192_v31, %v1193_v34  ;;  %v1194_v19 = vmin.f32 %v1066_v45, 1e+30 }
  0xec   :  { %v1131_v43 = vmin.f32 %v1003_v33, 1e+30  ;;  %v1004_v46 = vadd.f32 %v9563_v63, %v569_v37  ;;  %1615 = vmin.xlane.f32.xlu1 %v1614_v39  ;;  %1522 = vmin.xlane.f32.xlu0 %v1521_v41  ;;  %v1068_v4 = vadd.f32 %v9563_v63, %v729_v38  ;;  %v1195_v7 = vmin.f32 %v1067_v36, 1e+30  ;;  %v9636_v37 = vpop.permute.xlu0 %1825 }
  0xed   :  { %v571_v47 = vpop.f32.mrf.mxu0  ;;  %v731_v61 = vpop.f32.mrf.mxu1  ;;  %11933 = vst [vmem:[#allocation22_spill] sm:$0xff] %v9636_v37 }
  0xee   :  { %v1005_v6 = vadd.f32 %v9567_v0, %v571_v47  ;;  %v1069_v11 = vadd.f32 %v9567_v0, %v731_v61  ;;  %v1524_v17 = vmin.f32 %v1130_v44, %v1131_v43  ;;  %v1132_v20 = vmin.f32 %v1004_v46, 1e+30 }
  0xef   :  { %v573_v12 = vpop.f32.mrf.mxu0  ;;  %v733_v13 = vpop.f32.mrf.mxu1  ;;  %v1196_v26 = vmin.f32 %v1068_v4, 1e+30  ;;  %v1620_v34 = vmin.f32 %v1194_v19, %v1195_v7 }
  0xf0   :  { %v1133_v18 = vmin.f32 %v1005_v6, 1e+30  ;;  %v1006_v21 = vadd.f32 %v9563_v63, %v573_v12  ;;  %1618 = vmin.xlane.f32.xlu0 %v1617_v15  ;;  %1525 = vmin.xlane.f32.xlu1 %v1524_v17  ;;  %v1197_v29 = vmin.f32 %v1069_v11, 1e+30  ;;  %v1070_v41 = vadd.f32 %v9563_v63, %v733_v13  ;;  %v9643_v15 = vpop.permute.xlu1 %1829 }
  0xf1   :  { %v575_v22 = vpop.f32.mrf.mxu0  ;;  %v735_v24 = vpop.f32.mrf.mxu1  ;;  %11934 = vst [vmem:[#allocation23_spill] sm:$0xff] %v9643_v15 }
  0xf2   :  { %v1007_v28 = vadd.f32 %v9567_v0, %v575_v22  ;;  %v1071_v30 = vadd.f32 %v9567_v0, %v735_v24  ;;  %v1527_v36 = vmin.f32 %v1132_v20, %v1133_v18  ;;  %v1134_v39 = vmin.f32 %v1006_v21, 1e+30  ;;  %v9646_v22 = vpop.permute.xlu0 %1833 }
  0xf3   :  { %v579_v33 = vpop.f32.mrf.mxu0  ;;  %v739_v31 = vpop.f32.mrf.mxu1  ;;  %v1623_v11 = vmin.f32 %v1196_v26, %v1197_v29  ;;  %v1198_v17 = vmin.f32 %v1070_v41, 1e+30  ;;  %11935 = vst [vmem:[#allocation24_spill] sm:$0xff] %v9646_v22 }
  0xf4   :  { %v1135_v38 = vmin.f32 %v1007_v28, 1e+30  ;;  %v1008_v43 = vadd.f32 %v9563_v63, %v579_v33  ;;  %1621 = vmin.xlane.f32.xlu1 %v1620_v34  ;;  %1528 = vmin.xlane.f32.xlu0 %v1527_v36  ;;  %v1072_v46 = vadd.f32 %v9563_v63, %v739_v31  ;;  %v1199_v61 = vmin.f32 %v1071_v30, 1e+30 }
  0xf5   :  { %v581_v44 = vpop.f32.mrf.mxu0  ;;  %v741_v45 = vpop.f32.mrf.mxu1 }
  0xf6   :  { %v1009_v47 = vadd.f32 %v9567_v0, %v581_v44  ;;  %v1073_v4 = vadd.f32 %v9567_v0, %v741_v45  ;;  %v1530_v12 = vmin.f32 %v1134_v39, %v1135_v38  ;;  %v1136_v18 = vmin.f32 %v1008_v43, 1e+30  ;;  %v9652_v45 = vpop.permute.xlu1 %1837 }
  0xf7   :  { %v583_v6 = vpop.f32.mrf.mxu0  ;;  %v743_v7 = vpop.f32.mrf.mxu1  ;;  %v1200_v24 = vmin.f32 %v1072_v46, 1e+30  ;;  %v1626_v31 = vmin.f32 %v1198_v17, %v1199_v61  ;;  %11936 = vst [vmem:[#allocation25_spill] sm:$0xff] %v9652_v45 }
  0xf8   :  { %v1137_v13 = vmin.f32 %v1009_v47, 1e+30  ;;  %v1010_v19 = vadd.f32 %v9563_v63, %v583_v6  ;;  %1624 = vmin.xlane.f32.xlu0 %v1623_v11  ;;  %1531 = vmin.xlane.f32.xlu1 %v1530_v12  ;;  %v1201_v30 = vmin.f32 %v1073_v4, 1e+30  ;;  %v1074_v39 = vadd.f32 %v9563_v63, %v743_v7  ;;  %v9657_v7 = vpop.permute.xlu0 %1840 }
  0xf9   :  { %v585_v20 = vpop.f32.mrf.mxu0  ;;  %v745_v21 = vpop.f32.mrf.mxu1 }
  0xfa   :  { %v1011_v28 = vadd.f32 %v9567_v0, %v585_v20  ;;  %v1075_v26 = vadd.f32 %v9567_v0, %v745_v21  ;;  %v1533_v34 = vmin.f32 %v1136_v18, %v1137_v13  ;;  %v1138_v38 = vmin.f32 %v1010_v19, 1e+30 }
  0xfb   :  { %v589_v29 = vpop.f32.mrf.mxu0  ;;  %v749_v33 = vpop.f32.mrf.mxu1  ;;  %v1629_v12 = vmin.f32 %v1200_v24, %v1201_v30  ;;  %v1202_v18 = vmin.f32 %v1074_v39, 1e+30 }
  0xfc   :  { %v1139_v36 = vmin.f32 %v1011_v28, 1e+30  ;;  %v1012_v41 = vadd.f32 %v9563_v63, %v589_v29  ;;  %1627 = vmin.xlane.f32.xlu1 %v1626_v31  ;;  %1534 = vmin.xlane.f32.xlu0 %v1533_v34  ;;  %v1076_v46 = vadd.f32 %v9563_v63, %v749_v33  ;;  %v1203_v4 = vmin.f32 %v1075_v26, 1e+30 }
  0xfd   :  { %v591_v43 = vpop.f32.mrf.mxu0  ;;  %v751_v44 = vpop.f32.mrf.mxu1 }
  0xfe   :  { %v1013_v47 = vadd.f32 %v9567_v0, %v591_v43  ;;  %v1077_v61 = vadd.f32 %v9567_v0, %v751_v44  ;;  %v1536_v13 = vmin.f32 %v1138_v38, %v1139_v36  ;;  %v1140_v19 = vmin.f32 %v1012_v41, 1e+30  ;;  %v9662_v38 = vpop.permute.xlu1 %1844 }
  0xff   :  { %v593_v6 = vpop.f32.mrf.mxu0  ;;  %v753_v11 = vpop.f32.mrf.mxu1  ;;  %v1204_v29 = vmin.f32 %v1076_v46, 1e+30  ;;  %v1632_v30 = vmin.f32 %v1202_v18, %v1203_v4 }
 0x100   :  { %v1141_v17 = vmin.f32 %v1013_v47, 1e+30  ;;  %v1014_v20 = vadd.f32 %v9563_v63, %v593_v6  ;;  %1630 = vmin.xlane.f32.xlu0 %v1629_v12  ;;  %1537 = vmin.xlane.f32.xlu1 %v1536_v13  ;;  %v1205_v33 = vmin.f32 %v1077_v61, 1e+30  ;;  %v1078_v43 = vadd.f32 %v9563_v63, %v753_v11  ;;  %v9666_v6 = vpop.permute.xlu0 %1848 }
 0x101   :  { %v595_v21 = vpop.f32.mrf.mxu0  ;;  %v755_v28 = vpop.f32.mrf.mxu1 }
 0x102   :  { %v1015_v26 = vadd.f32 %v9567_v0, %v595_v21  ;;  %v1079_v31 = vadd.f32 %v9567_v0, %v755_v28  ;;  %v1539_v36 = vmin.f32 %v1140_v19, %v1141_v17  ;;  %v1142_v41 = vmin.f32 %v1014_v20, 1e+30 }
 0x103   :  { %v599_v34 = vpop.f32.mrf.mxu0  ;;  %v759_v24 = vpop.f32.mrf.mxu1  ;;  %v1635_v19 = vmin.f32 %v1204_v29, %v1205_v33  ;;  %v1206_v21 = vmin.f32 %v1078_v43, 1e+30 }
 0x104   :  { %v1143_v39 = vmin.f32 %v1015_v26, 1e+30  ;;  %v1016_v44 = vadd.f32 %v9563_v63, %v599_v34  ;;  %1633 = vmin.xlane.f32.xlu1 %v1632_v30  ;;  %1540 = vmin.xlane.f32.xlu0 %v1539_v36  ;;  %v1080_v61 = vadd.f32 %v9563_v63, %v759_v24  ;;  %v1207_v4 = vmin.f32 %v1079_v31, 1e+30  ;;  %v9672_v36 = vpop.permute.xlu1 %1852 }
 0x105   :  { %v601_v46 = vpop.f32.mrf.mxu0  ;;  %v761_v47 = vpop.f32.mrf.mxu1 }
 0x106   :  { %v1017_v12 = vadd.f32 %v9567_v0, %v601_v46  ;;  %v1081_v13 = vadd.f32 %v9567_v0, %v761_v47  ;;  %v1542_v20 = vmin.f32 %v1142_v41, %v1143_v39  ;;  %v1144_v28 = vmin.f32 %v1016_v44, 1e+30  ;;  %v9676_v41 = vpop.permute.xlu0 %1856 }
 0x107   :  { %v603_v17 = vpop.f32.mrf.mxu0  ;;  %v763_v18 = vpop.f32.mrf.mxu1  ;;  %v1208_v24 = vmin.f32 %v1080_v61, 1e+30  ;;  %v1638_v33 = vmin.f32 %v1206_v21, %v1207_v4 }
 0x108   :  { %v1145_v11 = vmin.f32 %v1017_v12, 1e+30  ;;  %v1018_v26 = vadd.f32 %v9563_v63, %v603_v17  ;;  %1636 = vmin.xlane.f32.xlu0 %v1635_v19  ;;  %1543 = vmin.xlane.f32.xlu1 %v1542_v20  ;;  %v1209_v46 = vmin.f32 %v1081_v13, 1e+30  ;;  %v1082_v12 = vadd.f32 %v9563_v63, %v763_v18 }
 0x109   :  { %v605_v34 = vpop.f32.mrf.mxu0  ;;  %v765_v30 = vpop.f32.mrf.mxu1 }
 0x10a   :  { %v1019_v31 = vadd.f32 %v9567_v0, %v605_v34  ;;  %v1083_v47 = vadd.f32 %v9567_v0, %v765_v30  ;;  %v1545_v39 = vmin.f32 %v1144_v28, %v1145_v11  ;;  %v1146_v44 = vmin.f32 %v1018_v26, 1e+30  ;;  %v9683_v26 = vpop.permute.xlu1 %1860  ;;  %v9686_v45 = vpop.permute.xlu0 %1864 }
 0x10b   :  { %v609_v5 = vpop.f32.mrf.mxu0  ;;  %v769_v29 = vpop.f32.mrf.mxu1  ;;  %v1641_v28 = vmin.f32 %v1208_v24, %v1209_v46 }
 0x10c   :  { %v1147_v43 = vmin.f32 %v1019_v31, 1e+30  ;;  %v1020_v17 = vadd.f32 %v9563_v63, %v609_v5  ;;  %1639 = vmin.xlane.f32.xlu1 %v1638_v33  ;;  %1546 = vmin.xlane.f32.xlu0 %v1545_v39  ;;  %v1084_v13 = vadd.f32 %v9563_v63, %v769_v29  ;;  %v1211_v4 = vmin.f32 %v1083_v47, 1e+30 }
 0x10d   :  { %v611_v61 = vpop.f32.mrf.mxu0  ;;  %v771_v19 = vpop.f32.mrf.mxu1  ;;  %v1210_v31 = vmin.f32 %v1082_v12, 1e+30 }
 0x10e   :  { %v1021_v20 = vadd.f32 %v9567_v0, %v611_v61  ;;  %v1085_v34 = vadd.f32 %v9567_v0, %v771_v19  ;;  %v1548_v30 = vmin.f32 %v1146_v44, %v1147_v43  ;;  %v1148_v33 = vmin.f32 %v1020_v17, 1e+30 }
 0x10f   :  { %v613_v11 = vpop.f32.mrf.mxu0  ;;  %v773_v21 = vpop.f32.mrf.mxu1  ;;  %v1212_v61 = vmin.f32 %v1084_v13, 1e+30  ;;  %v1644_v44 = vmin.f32 %v1210_v31, %v1211_v4 }
 0x110   :  { %v1149_v18 = vmin.f32 %v1021_v20, 1e+30  ;;  %v1022_v5 = vadd.f32 %v9563_v63, %v613_v11  ;;  %1642 = vmin.xlane.f32.xlu0 %v1641_v28  ;;  %1549 = vmin.xlane.f32.xlu1 %v1548_v30  ;;  %v1213_v19 = vmin.f32 %v1085_v34, 1e+30  ;;  %v1086_v12 = vadd.f32 %v9563_v63, %v773_v21  ;;  %v9692_v13 = vpop.permute.xlu1 %1868  ;;  %v9697_v21 = vpop.permute.xlu0 %1872 }
 0x111   :  { %v615_v39 = vpop.f32.mrf.mxu0  ;;  %v775_v29 = vpop.f32.mrf.mxu1 }
 0x112   :  { %v1023_v47 = vadd.f32 %v9567_v0, %v615_v39  ;;  %v1087_v24 = vadd.f32 %v9567_v0, %v775_v29  ;;  %v1551_v20 = vmin.f32 %v1148_v33, %v1149_v18  ;;  %v1150_v22 = vmin.f32 %v1022_v5, 1e+30 }
 0x113   :  { %v619_v46 = vpop.f32.mrf.mxu0  ;;  %v779_v43 = vpop.f32.mrf.mxu1  ;;  %v1647_v39 = vmin.f32 %v1212_v61, %v1213_v19 }
 0x114   :  { %v1151_v11 = vmin.f32 %v1023_v47, 1e+30  ;;  %v1024_v17 = vadd.f32 %v9563_v63, %v619_v46  ;;  %1645 = vmin.xlane.f32.xlu1 %v1644_v44  ;;  %1552 = vmin.xlane.f32.xlu0 %v1551_v20  ;;  %v1215_v15 = vmin.f32 %v1087_v24, 1e+30  ;;  %v1088_v29 = vadd.f32 %v9563_v63, %v779_v43  ;;  %v9702_v25 = vpop.permute.xlu1 %1876 }
 0x115   :  { %v621_v28 = vpop.f32.mrf.mxu0  ;;  %v781_v30 = vpop.f32.mrf.mxu1  ;;  %v1214_v47 = vmin.f32 %v1086_v12, 1e+30  ;;  %11937 = vst [vmem:[#allocation26_spill] sm:$0xff] %v9702_v25 }
 0x116   :  { %v1554_v34 = vmin.f32 %v1150_v22, %v1151_v11  ;;  %v1025_v4 = vadd.f32 %v9567_v0, %v621_v28  ;;  %v1089_v18 = vadd.f32 %v9567_v0, %v781_v30  ;;  %v1152_v46 = vmin.f32 %v1024_v17, 1e+30 }
 0x117   :  { %v623_v5 = vpop.f32.mrf.mxu0  ;;  %v783_v31 = vpop.f32.mrf.mxu1  ;;  %v1650_v43 = vmin.f32 %v1214_v47, %v1215_v15  ;;  %v1216_v20 = vmin.f32 %v1088_v29, 1e+30 }
 0x118   :  { %v1026_v33 = vadd.f32 %v9563_v63, %v623_v5  ;;  %v1153_v44 = vmin.f32 %v1025_v4, 1e+30  ;;  %1648 = vmin.xlane.f32.xlu0 %v1647_v39  ;;  %1555 = vmin.xlane.f32.xlu1 %v1554_v34  ;;  %v1217_v28 = vmin.f32 %v1089_v18, 1e+30  ;;  %v1090_v12 = vadd.f32 %v9563_v63, %v783_v31 }
 0x119   :  { %v625_v22 = vpop.f32.mrf.mxu0  ;;  %v785_v61 = vpop.f32.mrf.mxu1 }
 0x11a   :  { %v1027_v19 = vadd.f32 %v9567_v0, %v625_v22  ;;  %v1091_v24 = vadd.f32 %v9567_v0, %v785_v61  ;;  %v1557_v11 = vmin.f32 %v1152_v46, %v1153_v44  ;;  %v1154_v5 = vmin.f32 %v1026_v33, 1e+30  ;;  %v9706_v22 = vpop.permute.xlu0 %1880 }
 0x11b   :  { %v629_v30 = vpop.f32.mrf.mxu0  ;;  %v789_v37 = vpop.f32.mrf.mxu1  ;;  %11938 = vst [vmem:[#allocation27_spill] sm:$0xff] %v9706_v22  ;;  %v1653_v47 = vmin.f32 %v1216_v20, %v1217_v28  ;;  %v1218_v61 = vmin.f32 %v1090_v12, 1e+30 }
 0x11c   :  { %v1155_v17 = vmin.f32 %v1027_v19, 1e+30  ;;  %v1028_v34 = vadd.f32 %v9563_v63, %v629_v30  ;;  %1651 = vmin.xlane.f32.xlu1 %v1650_v43  ;;  %1558 = vmin.xlane.f32.xlu0 %v1557_v11  ;;  %v1219_v29 = vmin.f32 %v1091_v24, 1e+30  ;;  %v1092_v18 = vadd.f32 %v9563_v63, %v789_v37 }
 0x11d   :  { %v631_v39 = vpop.f32.mrf.mxu0  ;;  %v791_v4 = vpop.f32.mrf.mxu1 }
 0x11e   :  { %v1560_v15 = vmin.f32 %v1154_v5, %v1155_v17  ;;  %v1029_v46 = vadd.f32 %v9567_v0, %v631_v39  ;;  %v1093_v33 = vadd.f32 %v9567_v0, %v791_v4  ;;  %v1156_v43 = vmin.f32 %v1028_v34, 1e+30  ;;  %v9712_v5 = vpop.permute.xlu1 %1884  ;;  %v9716_v42 = vpop.permute.xlu0 %1888 }
 0x11f   :  { %v633_v44 = vpop.f32.mrf.mxu0  ;;  %v793_v31 = vpop.f32.mrf.mxu1  ;;  %11939 = vst [vmem:[#allocation28_spill] sm:$0xff] %v9712_v5  ;;  %v1656_v24 = vmin.f32 %v1218_v61, %v1219_v29  ;;  %v1220_v20 = vmin.f32 %v1092_v18, 1e+30  ;;  %11940 = vst [vmem:[#allocation29_spill] sm:$0xff] %v9716_v42 }
 0x120   :  { %v1030_v19 = vadd.f32 %v9563_v63, %v633_v44  ;;  %v1157_v11 = vmin.f32 %v1029_v46, 1e+30  ;;  %1654 = vmin.xlane.f32.xlu0 %v1653_v47  ;;  %1561 = vmin.xlane.f32.xlu1 %v1560_v15  ;;  %v1221_v17 = vmin.f32 %v1093_v33, 1e+30  ;;  %v1094_v15 = vadd.f32 %v9563_v63, %v793_v31 }
 0x121   :  { %v635_v30 = vpop.f32.mrf.mxu0  ;;  %v795_v2 = vpop.f32.mrf.mxu1 }
 0x122   :  { %v1031_v37 = vadd.f32 %v9567_v0, %v635_v30  ;;  %v1563_v28 = vmin.f32 %v1156_v43, %v1157_v11  ;;  %v1095_v39 = vadd.f32 %v9567_v0, %v795_v2  ;;  %v1158_v34 = vmin.f32 %v1030_v19, 1e+30 }
 0x123   :  { %v639_v4 = vpop.f32.mrf.mxu0  ;;  %v799_v12 = vpop.f32.mrf.mxu1  ;;  %v1659_v33 = vmin.f32 %v1220_v20, %v1221_v17 }
 0x124   :  { %v1159_v46 = vmin.f32 %v1031_v37, 1e+30  ;;  %v1032_v47 = vadd.f32 %v9563_v63, %v639_v4  ;;  %1657 = vmin.xlane.f32.xlu1 %v1656_v24  ;;  %1564 = vmin.xlane.f32.xlu0 %v1563_v28  ;;  %v1096_v18 = vadd.f32 %v9563_v63, %v799_v12  ;;  %v1223_v43 = vmin.f32 %v1095_v39, 1e+30  ;;  %v9723_v37 = vpop.permute.xlu1 %1892  ;;  %v9726_v12 = vpop.permute.xlu0 %1896 }
 0x125   :  { %v641_v29 = vpop.f32.mrf.mxu0  ;;  %v801_v44 = vpop.f32.mrf.mxu1  ;;  %11941 = vst [vmem:[#allocation30_spill] sm:$0xff] %v9723_v37  ;;  %v1222_v4 = vmin.f32 %v1094_v15, 1e+30  ;;  %11942 = vst [vmem:[#allocation31_spill] sm:$0xff] %v9726_v12 }
 0x126   :  { %v1566_v61 = vmin.f32 %v1158_v34, %v1159_v46  ;;  %v1033_v2 = vadd.f32 %v9567_v0, %v641_v29  ;;  %v1097_v11 = vadd.f32 %v9567_v0, %v801_v44  ;;  %v1160_v24 = vmin.f32 %v1032_v47, 1e+30 }
 0x127   :  { %v643_v30 = vpop.f32.mrf.mxu0  ;;  %v803_v19 = vpop.f32.mrf.mxu1  ;;  %v1224_v20 = vmin.f32 %v1096_v18, 1e+30  ;;  %v1662_v29 = vmin.f32 %v1222_v4, %v1223_v43 }
 0x128   :  { %v1034_v31 = vadd.f32 %v9563_v63, %v643_v30  ;;  %v1161_v28 = vmin.f32 %v1033_v2, 1e+30  ;;  %1660 = vmin.xlane.f32.xlu0 %v1659_v33  ;;  %1567 = vmin.xlane.f32.xlu1 %v1566_v61  ;;  %v1225_v17 = vmin.f32 %v1097_v11, 1e+30  ;;  %v1098_v47 = vadd.f32 %v9563_v63, %v803_v19  ;;  %v9732_v18 = vpop.permute.xlu1 %1900  ;;  %v9737_v19 = vpop.permute.xlu0 %1903 }
 0x129   :  { %v645_v34 = vpop.f32.mrf.mxu0  ;;  %v805_v46 = vpop.f32.mrf.mxu1  ;;  %11943 = vst [vmem:[#allocation32_spill] sm:$0xff] %v9732_v18  ;;  %11944 = vst [vmem:[#allocation33_spill] sm:$0xff] %v9737_v19 }
 0x12a   :  { %v1035_v39 = vadd.f32 %v9567_v0, %v645_v34  ;;  %v1569_v44 = vmin.f32 %v1160_v24, %v1161_v28  ;;  %v1099_v23 = vadd.f32 %v9567_v0, %v805_v46  ;;  %v1162_v30 = vmin.f32 %v1034_v31, 1e+30 }
 0x12b   :  { %v649_v9 = vpop.f32.mrf.mxu0  ;;  %v809_v40 = vpop.f32.mrf.mxu1  ;;  %v1665_v11 = vmin.f32 %v1224_v20, %v1225_v17 }
 0x12c   :  { %v1163_v15 = vmin.f32 %v1035_v39, 1e+30  ;;  %v1036_v61 = vadd.f32 %v9563_v63, %v649_v9  ;;  %1663 = vmin.xlane.f32.xlu1 %v1662_v29  ;;  %1570 = vmin.xlane.f32.xlu0 %v1569_v44  ;;  %v1227_v43 = vmin.f32 %v1099_v23, 1e+30  ;;  %v1100_v4 = vadd.f32 %v9563_v63, %v809_v40  ;;  %v9742_v3 = vpop.permute.xlu1 %1907 }
 0x12d   :  { %v651_v33 = vpop.f32.mrf.mxu0  ;;  %v811_v2 = vpop.f32.mrf.mxu1  ;;  %v1226_v39 = vmin.f32 %v1098_v47, 1e+30  ;;  %11945 = vst [vmem:[#allocation34_spill] sm:$0xff] %v9742_v3 }
 0x12e   :  { %v1572_v34 = vmin.f32 %v1162_v30, %v1163_v15  ;;  %v1037_v24 = vadd.f32 %v9567_v0, %v651_v33  ;;  %v1101_v31 = vadd.f32 %v9567_v0, %v811_v2  ;;  %v1164_v29 = vmin.f32 %v1036_v61, 1e+30 }
 0x12f   :  { %v653_v28 = vpop.f32.mrf.mxu0  ;;  %v813_v46 = vpop.f32.mrf.mxu1  ;;  %v1668_v30 = vmin.f32 %v1226_v39, %v1227_v43  ;;  %v1228_v15 = vmin.f32 %v1100_v4, 1e+30 }
 0x130   :  { %v1038_v9 = vadd.f32 %v9563_v63, %v653_v28  ;;  %v1165_v44 = vmin.f32 %v1037_v24, 1e+30  ;;  %1666 = vmin.xlane.f32.xlu0 %v1665_v11  ;;  %1573 = vmin.xlane.f32.xlu1 %v1572_v34  ;;  %v1229_v2 = vmin.f32 %v1101_v31, 1e+30  ;;  %v1102_v47 = vadd.f32 %v9563_v63, %v813_v46 }
 0x131   :  { %v655_v20 = vpop.f32.mrf.mxu0  ;;  %v815_v17 = vpop.f32.mrf.mxu1 }
 0x132   :  { %v1039_v23 = vadd.f32 %v9567_v0, %v655_v20  ;;  %v1103_v40 = vadd.f32 %v9567_v0, %v815_v17  ;;  %v1575_v33 = vmin.f32 %v1164_v29, %v1165_v44  ;;  %v1166_v28 = vmin.f32 %v1038_v9, 1e+30  ;;  %v9746_v20 = vpop.permute.xlu0 %1911 }
 0x133   :  { %v659_v32 = vpop.f32.mrf.mxu0  ;;  %v819_v16 = vpop.f32.mrf.mxu1  ;;  %11946 = vst [vmem:[#allocation35_spill] sm:$0xff] %v9746_v20  ;;  %v1671_v39 = vmin.f32 %v1228_v15, %v1229_v2  ;;  %v1230_v17 = vmin.f32 %v1102_v47, 1e+30 }
 0x134   :  { %v1167_v61 = vmin.f32 %v1039_v23, 1e+30  ;;  %v1040_v11 = vadd.f32 %v9563_v63, %v659_v32  ;;  %1669 = vmin.xlane.f32.xlu1 %v1668_v30  ;;  %1576 = vmin.xlane.f32.xlu0 %v1575_v33  ;;  %v1231_v4 = vmin.f32 %v1103_v40, 1e+30  ;;  %v1104_v31 = vadd.f32 %v9563_v63, %v819_v16 }
 0x135   :  { %v661_v34 = vpop.f32.mrf.mxu0  ;;  %v821_v24 = vpop.f32.mrf.mxu1 }
 0x136   :  { %v1578_v43 = vmin.f32 %v1166_v28, %v1167_v61  ;;  %v1041_v29 = vadd.f32 %v9567_v0, %v661_v34  ;;  %v1105_v9 = vadd.f32 %v9567_v0, %v821_v24  ;;  %v1168_v23 = vmin.f32 %v1040_v11, 1e+30  ;;  %v9752_v28 = vpop.permute.xlu1 %1915  ;;  %v9756_v35 = vpop.permute.xlu0 %1919 }
 0x137   :  { %v663_v44 = vpop.f32.mrf.mxu0  ;;  %v823_v46 = vpop.f32.mrf.mxu1  ;;  %11947 = vst [vmem:[#allocation36_spill] sm:$0xff] %v9752_v28  ;;  %v1674_v40 = vmin.f32 %v1230_v17, %v1231_v4  ;;  %v1232_v15 = vmin.f32 %v1104_v31, 1e+30  ;;  %11948 = vst [vmem:[#allocation37_spill] sm:$0xff] %v9756_v35 }
 0x138   :  { %v1042_v32 = vadd.f32 %v9563_v63, %v663_v44  ;;  %v1169_v30 = vmin.f32 %v1041_v29, 1e+30  ;;  %1672 = vmin.xlane.f32.xlu0 %v1671_v39  ;;  %1579 = vmin.xlane.f32.xlu1 %v1578_v43  ;;  %v1233_v61 = vmin.f32 %v1105_v9, 1e+30  ;;  %v1106_v39 = vadd.f32 %v9563_v63, %v823_v46 }
 0x139   :  { %v665_v33 = vpop.f32.mrf.mxu0  ;;  %v825_v20 = vpop.f32.mrf.mxu1 }
 0x13a   :  { %v1043_v16 = vadd.f32 %v9567_v0, %v665_v33  ;;  %v1581_v2 = vmin.f32 %v1168_v23, %v1169_v30  ;;  %v1107_v34 = vadd.f32 %v9567_v0, %v825_v20  ;;  %v1170_v11 = vmin.f32 %v1042_v32, 1e+30  ;;  %v9763_v35 = vpop.permute.xlu1 %1923 }
 0x13b   :  { %v669_v24 = vpop.f32.mrf.mxu0  ;;  %v829_v47 = vpop.f32.mrf.mxu1  ;;  %v1677_v23 = vmin.f32 %v1232_v15, %v1233_v61  ;;  %11949 = vst [vmem:[#allocation38_spill] sm:$0xff] %v9763_v35 }
 0x13c   :  { %v1171_v29 = vmin.f32 %v1043_v16, 1e+30  ;;  %v1044_v43 = vadd.f32 %v9563_v63, %v669_v24  ;;  %1675 = vmin.xlane.f32.xlu1 %v1674_v40  ;;  %1582 = vmin.xlane.f32.xlu0 %v1581_v2  ;;  %v1108_v44 = vadd.f32 %v9563_v63, %v829_v47  ;;  %v1235_v30 = vmin.f32 %v1107_v34, 1e+30 }
 0x13d   :  { %v671_v4 = vpop.f32.mrf.mxu0  ;;  %v831_v31 = vpop.f32.mrf.mxu1  ;;  %v1234_v40 = vmin.f32 %v1106_v39, 1e+30 }
 0x13e   :  { %v1584_v17 = vmin.f32 %v1170_v11, %v1171_v29  ;;  %v1172_v9 = vmin.f32 %v1044_v43, 1e+30  ;;  %v1045_v20 = vadd.f32 %v9567_v0, %v671_v4  ;;  %v1109_v32 = vadd.f32 %v9567_v0, %v831_v31  ;;  %v9766_v29 = vpop.permute.xlu0 %1927 }
 0x13f   :  { %v673_v33 = vpop.f32.mrf.mxu0  ;;  %v833_v16 = vpop.f32.mrf.mxu1  ;;  %v1236_v2 = vmin.f32 %v1108_v44, 1e+30  ;;  %11950 = vst [vmem:[#allocation39_spill] sm:$0xff] %v9766_v29  ;;  %v1680_v34 = vmin.f32 %v1234_v40, %v1235_v30 }
 0x140   :  { %v1173_v24 = vmin.f32 %v1045_v20, 1e+30  ;;  %v1046_v46 = vadd.f32 %v9563_v63, %v673_v33  ;;  %v1237_v28 = vmin.f32 %v1109_v32, 1e+30  ;;  %1678 = vmin.xlane.f32.xlu0 %v1677_v23  ;;  %1585 = vmin.xlane.f32.xlu1 %v1584_v17  ;;  %v1110_v43 = vadd.f32 %v9563_v63, %v833_v16 }
 0x141   :  { %v675_v47 = vpop.f32.mrf.mxu0  ;;  %v835_v11 = vpop.f32.mrf.mxu1 }
 0x142   :  { %v1587_v15 = vmin.f32 %v1172_v9, %v1173_v24  ;;  %v1047_v61 = vadd.f32 %v9567_v0, %v675_v47  ;;  %v1111_v31 = vadd.f32 %v9567_v0, %v835_v11  ;;  %v1174_v33 = vmin.f32 %v1046_v46, 1e+30  ;;  %v9773_v24 = vpop.permute.xlu1 %1931 }
 0x143   :  { %v679_v4 = vpop.f32.mrf.mxu0  ;;  %v839_v20 = vpop.f32.mrf.mxu1  ;;  %v1683_v23 = vmin.f32 %v1236_v2, %v1237_v28  ;;  %11951 = vst [vmem:[#allocation40_spill] sm:$0xff] %v9773_v24  ;;  %v1238_v47 = vmin.f32 %v1110_v43, 1e+30 }
 0x144   :  { %v1175_v39 = vmin.f32 %v1047_v61, 1e+30  ;;  %v1048_v44 = vadd.f32 %v9563_v63, %v679_v4  ;;  %1681 = vmin.xlane.f32.xlu1 %v1680_v34  ;;  %1588 = vmin.xlane.f32.xlu0 %v1587_v15  ;;  %v1112_v32 = vadd.f32 %v9563_v63, %v839_v20  ;;  %v1239_v11 = vmin.f32 %v1111_v31, 1e+30  ;;  %v9777_v4 = vpop.permute.xlu0 %1935 }
 0x145   :  { %v681_v17 = vpop.f32.mrf.mxu0  ;;  %v841_v9 = vpop.f32.mrf.mxu1  ;;  %11952 = vst [vmem:[#allocation41_spill] sm:$0xff] %v9777_v4 }
 0x146   :  { %v1590_v30 = vmin.f32 %v1174_v33, %v1175_v39  ;;  %v1176_v40 = vmin.f32 %v1048_v44, 1e+30  ;;  %v1049_v16 = vadd.f32 %v9567_v0, %v681_v17  ;;  %v1113_v46 = vadd.f32 %v9567_v0, %v841_v9  ;;  %v9783_v24 = vpop.permute.xlu1 %1939 }
 0x147   :  { %v683_v29 = vpop.f32.mrf.mxu0  ;;  %v843_v61 = vpop.f32.mrf.mxu1  ;;  %v1240_v15 = vmin.f32 %v1112_v32, 1e+30  ;;  %v1686_v17 = vmin.f32 %v1238_v47, %v1239_v11  ;;  %11953 = vst [vmem:[#allocation42_spill] sm:$0xff] %v9783_v24 }
 0x148   :  { %v1177_v28 = vmin.f32 %v1049_v16, 1e+30  ;;  %v1050_v2 = vadd.f32 %v9563_v63, %v683_v29  ;;  %1684 = vmin.xlane.f32.xlu0 %v1683_v23  ;;  %1591 = vmin.xlane.f32.xlu1 %v1590_v30  ;;  %v1241_v20 = vmin.f32 %v1113_v46, 1e+30  ;;  %v1114_v33 = vadd.f32 %v9563_v63, %v843_v61  ;;  %v9785_v32 = vpop.permute.xlu0 %1943 }
 0x149   :  { %v685_v34 = vpop.f32.mrf.mxu0  ;;  %v845_v39 = vpop.f32.mrf.mxu1  ;;  %11954 = vst [vmem:[#allocation43_spill] sm:$0xff] %v9785_v32 }
 0x14a   :  { %v1593_v44 = vmin.f32 %v1176_v40, %v1177_v28  ;;  %v1178_v43 = vmin.f32 %v1050_v2, 1e+30  ;;  %v1051_v31 = vadd.f32 %v9567_v0, %v685_v34  ;;  %v1115_v9 = vadd.f32 %v9567_v0, %v845_v39  ;;  %v9787_v40 = vpop.permute.xlu1 %1947 }
 0x14b   :  { %v1689_v4 = vmin.f32 %v1240_v15, %v1241_v20  ;;  %v1242_v29 = vmin.f32 %v1114_v33, 1e+30  ;;  %11955 = vst [vmem:[#allocation44_spill] sm:$0xff] %v9787_v40  ;;  %v9310_v0 = vmov 1966171168  }
 0x14c   :  { %v1179_v16 = vmin.f32 %v1051_v31, 1e+30  ;;  %1687 = vmin.xlane.f32.xlu1 %v1686_v17  ;;  %1594 = vmin.xlane.f32.xlu0 %v1593_v44  ;;  %v1243_v23 = vmin.f32 %v1115_v9, 1e+30  ;;  %v9789_v46 = vpop.permute.xlu0 %1951  ;;  %v2223_v47 = vunpack.c.l.s4 %v9310_v0 }
 0x14d   :  { %11956 = vst [vmem:[#allocation45_spill] sm:$0xff] %v9789_v46 }
 0x14e   :  { %v1596_v30 = vmin.f32 %v1178_v43, %v1179_v16  ;;  %v1692_v63 = vmin.f32 %v1242_v29, %v1243_v23  ;;  %v9791_v11 = vpop.permute.xlu1 %1955  ;;  %v2224_v28 = vunpack.c.0.s8 %v2223_v47 }
 0x14f   :  { %11957 = vst [vmem:[#allocation46_spill] sm:$0xff] %v9791_v11 }
 0x150   :  { %1690 = vmin.xlane.f32.xlu0 %v1689_v4  ;;  %1597 = vmin.xlane.f32.xlu1 %v1596_v30  ;;  %v9793_v61 = vpop.permute.xlu0 %1959  ;;  %v9798_v34 = vsub.s32 %v2224_v28, %v9359_v8 }
 0x151   :  { %11958 = vst [vmem:[#allocation47_spill] sm:$0xff] %v9793_v61 }
 0x152   :  { %v9795_v2 = vpop.permute.xlu1 %1963 }
 0x153   :  { %11959 = vst [vmem:[#allocation48_spill] sm:$0xff] %v9795_v2 }
 0x154   :  { %1693 = vmin.xlane.f32.xlu1 %v1692_v63 }
 0x15d   :  { %v1505_v15 = vpop.xlane.xlu0 %1504 }
 0x15e   :  { %v2029_v4 = vadd.f32 %v9534_v50, %v1505_v15 }
 0x160   :  { %v2093_v20 = vmax.f32 %v2029_v4, 0.0 }
 0x161   :  { %v1604_v33 = vpop.xlane.xlu1 %1603  ;;  %v1601_v39 = vpop.xlane.xlu0 %1600 }
 0x162   :  { %v2221_v44 = vcombine.high %v2093_v20, %v2093_v20  ;;  %v2228_v43 = vrot.slane %v2093_v20, %v9798_v34  ;;  %v2062_v31 = vadd.f32 %v9662_v38, %v1604_v33  ;;  %v2061_v17 = vadd.f32 %v9657_v7, %v1601_v39 }
 0x164   :  { %v2235_v9 = vrot.slane %v2221_v44, %v9798_v34  ;;  %v2236_v16 = vcombine.high %v2228_v43, %v2228_v43  ;;  %v2126_v29 = vmax.f32 %v2062_v31, 0.0  ;;  %v2125_v23 = vmax.f32 %v2061_v17, 0.0 }
 0x165   :  { %v2244_v63 = vrot.slane %v2228_v43, %v9798_v34  ;;  %v1508_v4 = vpop.xlane.xlu0 %1507 }
 0x166   :  { %v2237_v30 = vcombine.high %v2235_v9, %v2235_v9  ;;  %v2258_v50 = vrot.slane %v2236_v16, %v9798_v34  ;;  %v3838_v0 = vcombine.high %v2126_v29, %v2126_v29  ;;  %v3845_v47 = vrot.slane %v2126_v29, %v9798_v34  ;;  %v1511_v29 = vpop.xlane.xlu1 %1510 }
 0x167   :  { %v3789_v28 = vcombine.high %v2125_v23, %v2125_v23  ;;  %v3796_v15 = vrot.slane %v2125_v23, %v9798_v34  ;;  %v2251_v39 = vrot.slane %v2235_v9, %v9798_v34  ;;  %v2030_v16 = vadd.f32 %v9530_v48, %v1508_v4 }
 0x168   :  { %v2265_v38 = vrot.slane %v2237_v30, %v9798_v34  ;;  %v5357_v7 = vcombine.low %v2244_v63, %v2258_v50  ;;  %v9135_v20 = vcombine.high %v2244_v63, %v2258_v50  ;;  %v3852_v33 = vrot.slane %v3838_v0, %v9798_v34 }
 0x169   :  { %v3853_v44 = vcombine.high %v3845_v47, %v3845_v47  ;;  %v3803_v43 = vrot.slane %v3789_v28, %v9798_v34  ;;  %v3804_v31 = vcombine.high %v3796_v15, %v3796_v15  ;;  %v3861_v17 = vrot.slane %v3845_v47, %v9798_v34  ;;  %v1607_v4 = vpop.xlane.xlu0 %1606 }
 0x16a   :  { %v5359_v8 = vcombine.low %v2251_v39, %v2265_v38  ;;  %v3854_v23 = vcombine.high %v3852_v33, %v3852_v33  ;;  %v9136_v61 = vcombine.high %v2251_v39, %v2265_v38  ;;  %v9817_v63 = vrot.slane %v5357_v7, %v9798_v34 }
 0x16b   :  { %v3875_v2 = vrot.slane %v3853_v44, %v9798_v34  ;;  %v3805_v30 = vcombine.high %v3803_v43, %v3803_v43  ;;  %v9820_v9 = vrot.slane %v9135_v20, %v9798_v34  ;;  %v3868_v50 = vrot.slane %v3852_v33, %v9798_v34 }
 0x16c   :  { %v3882_v0 = vrot.slane %v3854_v23, %v9798_v34  ;;  %v3812_v48 = vrot.slane %v3796_v15, %v9798_v34  ;;  %v3826_v28 = vrot.slane %v3804_v31, %v9798_v34  ;;  %v3819_v44 = vrot.slane %v3803_v43, %v9798_v34  ;;  %v1514_v31 = vpop.xlane.xlu1 %1513 }
 0x16d   :  { %v6974_v47 = vcombine.low %v3861_v17, %v3875_v2  ;;  %v9201_v11 = vcombine.high %v3861_v17, %v3875_v2  ;;  %v3833_v38 = vrot.slane %v3805_v30, %v9798_v34  ;;  %v2094_v7 = vmax.f32 %v2030_v16, 0.0 }
 0x16e   :  { %v9829_v39 = vrot.slane %v5359_v8, %v9798_v34  ;;  %v6976_v20 = vcombine.low %v3868_v50, %v3882_v0  ;;  %v9202_v46 = vcombine.high %v3868_v50, %v3882_v0  ;;  %v2031_v33 = vadd.f32 %v9532_v49, %v1511_v29 }
 0x16f   :  { %v6925_v23 = vcombine.low %v3812_v48, %v3826_v28  ;;  %v9199_v40 = vcombine.high %v3812_v48, %v3826_v28  ;;  %v6927_v32 = vcombine.low %v3819_v44, %v3833_v38  ;;  %v2063_v15 = vadd.f32 %v9666_v6, %v1607_v4 }
 0x170   :  { %v9834_v2 = vrot.slane %v9136_v61, %v9798_v34  ;;  %v9837_v43 = vrot.slane %v6974_v47, %v9798_v34  ;;  %v2270_v17 = vcombine.high %v2094_v7, %v2094_v7  ;;  %v2277_v8 = vrot.slane %v2094_v7, %v9798_v34 }
 0x171   :  { %v9841_v16 = vrot.slane %v9201_v11, %v9798_v34  ;;  %v9844_v49 = vrot.slane %v6976_v20, %v9798_v34  ;;  %v9847_v29 = vrot.slane %v9202_v46, %v9798_v34  ;;  %v9200_v6 = vcombine.high %v3819_v44, %v3833_v38 }
 0x172   :  { %v9850_v30 = vrot.slane %v6925_v23, %v9798_v34  ;;  %v2284_v61 = vrot.slane %v2270_v17, %v9798_v34  ;;  %v2285_v50 = vcombine.high %v2277_v8, %v2277_v8  ;;  %v2095_v0 = vmax.f32 %v2031_v33, 0.0  ;;  %v1610_v23 = vpop.xlane.xlu1 %1609 }
 0x173   :  { %v9854_v47 = vrot.slane %v9199_v40, %v9798_v34  ;;  %v9857_v11 = vrot.slane %v6927_v32, %v9798_v34  ;;  %v2293_v48 = vrot.slane %v2277_v8, %v9798_v34  ;;  %v2127_v28 = vmax.f32 %v2063_v15, 0.0  ;;  %v1517_v32 = vpop.xlane.xlu0 %1516 }
 0x174   :  { %v2286_v4 = vcombine.high %v2284_v61, %v2284_v61  ;;  %v2307_v46 = vrot.slane %v2285_v50, %v9798_v34  ;;  %v2319_v44 = vcombine.high %v2095_v0, %v2095_v0  ;;  %v2032_v38 = vadd.f32 %v9536_v51, %v1514_v31 }
 0x175   :  { %v9863_v7 = vrot.slane %v9200_v6, %v9798_v34  ;;  %v2326_v20 = vrot.slane %v2095_v0, %v9798_v34  ;;  %v3887_v33 = vcombine.high %v2127_v28, %v2127_v28  ;;  %v3894_v40 = vrot.slane %v2127_v28, %v9798_v34 }
 0x176   :  { %v2314_v17 = vrot.slane %v2286_v4, %v9798_v34  ;;  %v5406_v8 = vcombine.low %v2293_v48, %v2307_v46  ;;  %v9137_v15 = vcombine.high %v2293_v48, %v2307_v46  ;;  %v2333_v24 = vrot.slane %v2319_v44, %v9798_v34  ;;  %v1520_v10 = vpop.xlane.xlu1 %1519 }
 0x177   :  { %v2300_v50 = vrot.slane %v2284_v61, %v9798_v34  ;;  %v2334_v35 = vcombine.high %v2326_v20, %v2326_v20  ;;  %v3901_v51 = vrot.slane %v3887_v33, %v9798_v34  ;;  %v3902_v31 = vcombine.high %v3894_v40, %v3894_v40 }
 0x178   :  { %v2342_v6 = vrot.slane %v2326_v20, %v9798_v34  ;;  %v2096_v0 = vmax.f32 %v2032_v38, 0.0  ;;  %v2064_v3 = vadd.f32 %v9672_v36, %v1610_v23  ;;  %v2033_v28 = vadd.f32 %v9538_v52, %v1517_v32 }
 0x179   :  { %v5408_v27 = vcombine.low %v2300_v50, %v2314_v17  ;;  %v2335_v19 = vcombine.high %v2333_v24, %v2333_v24  ;;  %v2356_v4 = vrot.slane %v2334_v35, %v9798_v34  ;;  %v3903_v48 = vcombine.high %v3901_v51, %v3901_v51 }
 0x17a   :  { %v9138_v46 = vcombine.high %v2300_v50, %v2314_v17  ;;  %v9876_v44 = vrot.slane %v5406_v8, %v9798_v34  ;;  %v9879_v61 = vrot.slane %v9137_v15, %v9798_v34  ;;  %v2349_v33 = vrot.slane %v2333_v24, %v9798_v34 }
 0x17b   :  { %v2363_v38 = vrot.slane %v2335_v19, %v9798_v34  ;;  %v5455_v20 = vcombine.low %v2342_v6, %v2356_v4  ;;  %v3910_v36 = vrot.slane %v3894_v40, %v9798_v34  ;;  %v3924_v52 = vrot.slane %v3902_v31, %v9798_v34 }
 0x17c   :  { %v9139_v23 = vcombine.high %v2342_v6, %v2356_v4  ;;  %v3931_v35 = vrot.slane %v3903_v48, %v9798_v34  ;;  %v2368_v32 = vcombine.high %v2096_v0, %v2096_v0  ;;  %v2375_v17 = vrot.slane %v2096_v0, %v9798_v34 }
 0x17d   :  { %v9888_v8 = vrot.slane %v5408_v27, %v9798_v34  ;;  %v5457_v15 = vcombine.low %v2349_v33, %v2363_v38  ;;  %v9140_v50 = vcombine.high %v2349_v33, %v2363_v38  ;;  %v3917_v24 = vrot.slane %v3901_v51, %v9798_v34  ;;  %v1613_v33 = vpop.xlane.xlu0 %1612 }
 0x17e   :  { %v9892_v19 = vrot.slane %v9138_v46, %v9798_v34  ;;  %v7023_v14 = vcombine.low %v3910_v36, %v3924_v52  ;;  %v9203_v40 = vcombine.high %v3910_v36, %v3924_v52  ;;  %v2128_v18 = vmax.f32 %v2064_v3, 0.0 }
 0x17f   :  { %v9895_v31 = vrot.slane %v5455_v20, %v9798_v34  ;;  %v7025_v6 = vcombine.low %v3917_v24, %v3931_v35  ;;  %v2382_v4 = vrot.slane %v2368_v32, %v9798_v34  ;;  %v2383_v0 = vcombine.high %v2375_v17, %v2375_v17 }
 0x180   :  { %v9899_v27 = vrot.slane %v9139_v23, %v9798_v34  ;;  %v9902_v48 = vrot.slane %v5457_v15, %v9798_v34  ;;  %v9905_v51 = vrot.slane %v9140_v50, %v9798_v34  ;;  %v9204_v46 = vcombine.high %v3917_v24, %v3931_v35 }
 0x181   :  { %v9908_v3 = vrot.slane %v7023_v14, %v9798_v34  ;;  %v2384_v38 = vcombine.high %v2382_v4, %v2382_v4  ;;  %v2391_v20 = vrot.slane %v2375_v17, %v9798_v34  ;;  %v2405_v36 = vrot.slane %v2383_v0, %v9798_v34  ;;  %v1523_v59 = vpop.xlane.xlu0 %1522 }
 0x182   :  { %v9913_v52 = vrot.slane %v9203_v40, %v9798_v34  ;;  %v3936_v23 = vcombine.high %v2128_v18, %v2128_v18  ;;  %v3943_v32 = vrot.slane %v2128_v18, %v9798_v34  ;;  %v2097_v15 = vmax.f32 %v2033_v28, 0.0 }
 0x183   :  { %v9917_v50 = vrot.slane %v7025_v6, %v9798_v34  ;;  %v2412_v35 = vrot.slane %v2384_v38, %v9798_v34  ;;  %v5504_v14 = vcombine.low %v2391_v20, %v2405_v36  ;;  %v2065_v24 = vadd.f32 %v9676_v41, %v1613_v33 }
 0x184   :  { %v2398_v17 = vrot.slane %v2382_v4, %v9798_v34  ;;  %v3950_v0 = vrot.slane %v3936_v23, %v9798_v34  ;;  %v3951_v12 = vcombine.high %v3943_v32, %v3943_v32  ;;  %v2417_v40 = vcombine.high %v2097_v15, %v2097_v15 }
 0x185   :  { %v9924_v1 = vrot.slane %v9204_v46, %v9798_v34  ;;  %v9141_v18 = vcombine.high %v2391_v20, %v2405_v36  ;;  %v3959_v28 = vrot.slane %v3943_v32, %v9798_v34  ;;  %v2034_v6 = vadd.f32 %v9540_v53, %v1520_v10 }
 0x186   :  { %v5506_v37 = vcombine.low %v2398_v17, %v2412_v35  ;;  %v3952_v62 = vcombine.high %v3950_v0, %v3950_v0  ;;  %v3973_v38 = vrot.slane %v3951_v12, %v9798_v34  ;;  %v2424_v41 = vrot.slane %v2097_v15, %v9798_v34 }
 0x187   :  { %v9142_v33 = vcombine.high %v2398_v17, %v2412_v35  ;;  %v9931_v4 = vrot.slane %v5504_v14, %v9798_v34  ;;  %v2431_v23 = vrot.slane %v2417_v40, %v9798_v34  ;;  %v2129_v42 = vmax.f32 %v2065_v24, 0.0 }
 0x188   :  { %v3966_v46 = vrot.slane %v3950_v0, %v9798_v34  ;;  %v3980_v20 = vrot.slane %v3952_v62, %v9798_v34  ;;  %v7072_v36 = vcombine.low %v3959_v28, %v3973_v38  ;;  %v2432_v32 = vcombine.high %v2424_v41, %v2424_v41 }
 0x189   :  { %v9937_v53 = vrot.slane %v9141_v18, %v9798_v34  ;;  %v9205_v10 = vcombine.high %v3959_v28, %v3973_v38  ;;  %v2433_v12 = vcombine.high %v2431_v23, %v2431_v23  ;;  %v3985_v60 = vcombine.high %v2129_v42, %v2129_v42 }
 0x18a   :  { %v9940_v15 = vrot.slane %v5506_v37, %v9798_v34  ;;  %v7074_v35 = vcombine.low %v3966_v46, %v3980_v20  ;;  %v9206_v14 = vcombine.high %v3966_v46, %v3980_v20  ;;  %v2440_v17 = vrot.slane %v2424_v41, %v9798_v34 }
 0x18b   :  { %v2454_v24 = vrot.slane %v2432_v32, %v9798_v34  ;;  %v2461_v0 = vrot.slane %v2433_v12, %v9798_v34  ;;  %v3992_v62 = vrot.slane %v2129_v42, %v9798_v34  ;;  %v3999_v40 = vrot.slane %v3985_v60, %v9798_v34  ;;  %v1616_v12 = vpop.xlane.xlu1 %1615 }
 0x18c   :  { %v9948_v18 = vrot.slane %v9142_v33, %v9798_v34  ;;  %v9951_v28 = vrot.slane %v7072_v36, %v9798_v34  ;;  %v2447_v37 = vrot.slane %v2431_v23, %v9798_v34  ;;  %v2098_v38 = vmax.f32 %v2034_v6, 0.0 }
 0x18d   :  { %v9955_v46 = vrot.slane %v9205_v10, %v9798_v34  ;;  %v9958_v41 = vrot.slane %v7074_v35, %v9798_v34  ;;  %v5553_v20 = vcombine.low %v2440_v17, %v2454_v24  ;;  %v5389_v42 = vcombine.low %v9817_v63, %v9820_v9 }
 0x18e   :  { %v9963_v60 = vrot.slane %v9206_v14, %v9798_v34  ;;  %v9143_v33 = vcombine.high %v2440_v17, %v2454_v24  ;;  %v4000_v32 = vcombine.high %v3992_v62, %v3992_v62  ;;  %v4001_v36 = vcombine.high %v3999_v40, %v3999_v40 }
 0x18f   :  { %v5555_v5 = vcombine.low %v2447_v37, %v2461_v0  ;;  %v9144_v23 = vcombine.high %v2447_v37, %v2461_v0  ;;  %v4008_v6 = vrot.slane %v3992_v62, %v9798_v34  ;;  %v4015_v10 = vrot.slane %v3999_v40, %v9798_v34 }
 0x190   :  { %v4022_v35 = vrot.slane %v4000_v32, %v9798_v34  ;;  %v4029_v22 = vrot.slane %v4001_v36, %v9798_v34  ;;  %v2466_v58 = vcombine.high %v2098_v38, %v2098_v38  ;;  %v2473_v63 = vrot.slane %v2098_v38, %v9798_v34 }
 0x191   :  { %v9971_v9 = vrot.slane %v5553_v20, %v9798_v34  ;;  %v5390_v14 = vcombine.low %v9829_v39, %v9834_v2  ;;  %v5397_v17 = vrot.slane %v5389_v42, %v9798_v34  ;;  %v2066_v24 = vadd.f32 %v9683_v26, %v1616_v12 }
 0x192   :  { %v7121_v0 = vcombine.low %v4008_v6, %v4022_v35  ;;  %v9207_v62 = vcombine.high %v4008_v6, %v4022_v35  ;;  %v7123_v40 = vcombine.low %v4015_v10, %v4029_v22  ;;  %v2035_v37 = vadd.f32 %v9542_v54, %v1523_v59 }
 0x193   :  { %v9208_v32 = vcombine.high %v4015_v10, %v4029_v22  ;;  %v2480_v36 = vrot.slane %v2466_v58, %v9798_v34  ;;  %v2481_v25 = vcombine.high %v2473_v63, %v2473_v63  ;;  %v5404_v38 = vrot.slane %v5390_v14, %v9798_v34 }
 0x194   :  { %v9981_v20 = vrot.slane %v9143_v33, %v9798_v34  ;;  %v9984_v39 = vrot.slane %v5555_v5, %v9798_v34  ;;  %v9987_v2 = vrot.slane %v9144_v23, %v9798_v34  ;;  %v2489_v26 = vrot.slane %v2473_v63, %v9798_v34 }
 0x195   :  { %v9991_v42 = vrot.slane %v7121_v0, %v9798_v34  ;;  %v2482_v54 = vcombine.high %v2480_v36, %v2480_v36  ;;  %v2503_v58 = vrot.slane %v2481_v25, %v9798_v34  ;;  %v5405_v59 = vcombine.low %v5397_v17, %v5404_v38 }
 0x196   :  { %v9995_v22 = vrot.slane %v9207_v62, %v9798_v34  ;;  %v9998_v33 = vrot.slane %v7123_v40, %v9798_v34  ;;  %v2130_v5 = vmax.f32 %v2066_v24, 0.0  ;;  %v2099_v12 = vmax.f32 %v2035_v37, 0.0 }
 0x197   :  { %v10001_v23 = vrot.slane %v9208_v32, %v9798_v34  ;;  %v2496_v6 = vrot.slane %v2480_v36, %v9798_v34  ;;  %v2510_v10 = vrot.slane %v2482_v54, %v9798_v34  ;;  %v5602_v35 = vcombine.low %v2489_v26, %v2503_v58  ;;  %8494 = vperm.xlu0 %9269, %v5405_v59  }
 0x198   :  { %11960 = vst [vmem:[#allocation49_spill] sm:$0xff] %v9998_v33  ;;  %v4034_v63 = vcombine.high %v2130_v5, %v2130_v5  ;;  %v4041_v25 = vrot.slane %v2130_v5, %v9798_v34  ;;  %v2515_v14 = vcombine.high %v2099_v12, %v2099_v12  ;;  %v2522_v17 = vrot.slane %v2099_v12, %v9798_v34 }
 0x199   :  { %11961 = vst [vmem:[#allocation50_spill] sm:$0xff] %v10001_v23  ;;  %v9145_v0 = vcombine.high %v2489_v26, %v2503_v58  ;;  %v7006_v24 = vcombine.low %v9837_v43, %v9841_v16  ;;  %v7007_v62 = vcombine.low %v9844_v49, %v9847_v29  ;;  %v6957_v40 = vcombine.low %v9850_v30, %v9854_v47  ;;  %v1526_v43 = vpop.xlane.xlu1 %1525 }
 0x19a   :  { %v5604_v37 = vcombine.low %v2496_v6, %v2510_v10  ;;  %v4048_v32 = vrot.slane %v4034_v63, %v9798_v34  ;;  %v4049_v36 = vcombine.high %v4041_v25, %v4041_v25  ;;  %v2529_v38 = vrot.slane %v2515_v14, %v9798_v34 }
 0x19b   :  { %v9146_v54 = vcombine.high %v2496_v6, %v2510_v10  ;;  %v10016_v59 = vrot.slane %v5602_v35, %v9798_v34  ;;  %v4057_v26 = vrot.slane %v4041_v25, %v9798_v34  ;;  %v2530_v58 = vcombine.high %v2522_v17, %v2522_v17  ;;  %v1619_v10 = vpop.xlane.xlu0 %1618 }
 0x19c   :  { %v4050_v16 = vcombine.high %v4048_v32, %v4048_v32  ;;  %v4071_v49 = vrot.slane %v4049_v36, %v9798_v34  ;;  %v2531_v29 = vcombine.high %v2529_v38, %v2529_v38  ;;  %v2538_v30 = vrot.slane %v2522_v17, %v9798_v34 }
 0x19d   :  { %v4064_v47 = vrot.slane %v4048_v32, %v9798_v34  ;;  %v2552_v5 = vrot.slane %v2530_v58, %v9798_v34  ;;  %v7014_v12 = vrot.slane %v7006_v24, %v9798_v34  ;;  %v7021_v6 = vrot.slane %v7007_v62, %v9798_v34 }
 0x19e   :  { %v4078_v35 = vrot.slane %v4050_v16, %v9798_v34  ;;  %v7170_v63 = vcombine.low %v4057_v26, %v4071_v49  ;;  %v9209_v25 = vcombine.high %v4057_v26, %v4071_v49  ;;  %v2559_v14 = vrot.slane %v2531_v29, %v9798_v34 }
 0x19f   :  { %v5651_v33 = vcombine.low %v2538_v30, %v2552_v5  ;;  %v9147_v36 = vcombine.high %v2538_v30, %v2552_v5  ;;  %v7022_v23 = vcombine.low %v7014_v12, %v7021_v6  ;;  %v6958_v17 = vcombine.low %v9857_v11, %v9863_v7  ;;  %v1622_v11 = vpop.xlane.xlu1 %1621  ;;  %v1529_v12 = vpop.xlane.xlu0 %1528 }
 0x1a0   :  { %v10030_v32 = vrot.slane %v9145_v0, %v9798_v34  ;;  %v10033_v24 = vrot.slane %v5604_v37, %v9798_v34  ;;  %v10036_v62 = vrot.slane %v9146_v54, %v9798_v34  ;;  %v2545_v58 = vrot.slane %v2529_v38, %v9798_v34 }
 0x1a1   :  { %v7172_v26 = vcombine.low %v4064_v47, %v4078_v35  ;;  %v9210_v16 = vcombine.high %v4064_v47, %v4078_v35  ;;  %v10040_v49 = vrot.slane %v7170_v63, %v9798_v34  ;;  %v10043_v29 = vrot.slane %v9209_v25, %v9798_v34  ;;  %8593 = vperm.xlu0 %9269, %v7022_v23  }
 0x1a2   :  { %v5653_v7 = vcombine.low %v2545_v58, %v2559_v14  ;;  %v9148_v0 = vcombine.high %v2545_v58, %v2559_v14  ;;  %v6965_v37 = vrot.slane %v6957_v40, %v9798_v34  ;;  %v6972_v30 = vrot.slane %v6958_v17, %v9798_v34 }
 0x1a3   :  { %v10048_v54 = vrot.slane %v5651_v33, %v9798_v34  ;;  %v10051_v38 = vrot.slane %v9147_v36, %v9798_v34  ;;  %v2067_v47 = vadd.f32 %v9686_v45, %v1619_v10  ;;  %v2036_v5 = vadd.f32 %v9544_v55, %v1526_v43 }
 0x1a4   :  { %v6973_v6 = vcombine.low %v6965_v37, %v6972_v30  ;;  %v5438_v23 = vcombine.low %v9876_v44, %v9879_v61  ;;  %v5439_v40 = vcombine.low %v9888_v8, %v9892_v19  ;;  %v2068_v35 = vadd.f32 %v9692_v13, %v1622_v11 }
 0x1a5   :  { %v10061_v33 = vrot.slane %v7172_v26, %v9798_v34  ;;  %v10064_v63 = vrot.slane %v9210_v16, %v9798_v34  ;;  %v2131_v25 = vmax.f32 %v2067_v47, 0.0  ;;  %v2100_v45 = vmax.f32 %v2036_v5, 0.0 }
 0x1a6   :  { %8590 = vperm.xlu1 %9270, %v6973_v6   ;;  %v5446_v55 = vrot.slane %v5438_v23, %v9798_v34  ;;  %v5453_v43 = vrot.slane %v5439_v40, %v9798_v34  ;;  %v2132_v10 = vmax.f32 %v2068_v35, 0.0  ;;  %v2037_v44 = vadd.f32 %v9546_v56, %v1529_v12 }
 0x1a7   :  { %v4083_v61 = vcombine.high %v2131_v25, %v2131_v25  ;;  %v4090_v8 = vrot.slane %v2131_v25, %v9798_v34  ;;  %v2564_v13 = vcombine.high %v2100_v45, %v2100_v45  ;;  %v2571_v19 = vrot.slane %v2100_v45, %v9798_v34 }
 0x1a8   :  { %v10072_v14 = vrot.slane %v5653_v7, %v9798_v34  ;;  %v5454_v36 = vcombine.low %v5446_v55, %v5453_v43  ;;  %v4132_v17 = vcombine.high %v2132_v10, %v2132_v10  ;;  %v4139_v58 = vrot.slane %v2132_v10, %v9798_v34 }
 0x1a9   :  { %v10076_v26 = vrot.slane %v9148_v0, %v9798_v34  ;;  %v4097_v16 = vrot.slane %v4083_v61, %v9798_v34  ;;  %v4098_v11 = vcombine.high %v4090_v8, %v4090_v8  ;;  %v2578_v56 = vrot.slane %v2564_v13, %v9798_v34 }
 0x1aa   :  { %v2579_v37 = vcombine.high %v2571_v19, %v2571_v19  ;;  %8497 = vperm.xlu1 %9270, %v5454_v36   ;;  %v4146_v30 = vrot.slane %v4132_v17, %v9798_v34  ;;  %v4147_v47 = vcombine.high %v4139_v58, %v4139_v58  ;;  %v2101_v5 = vmax.f32 %v2037_v44, 0.0 }
 0x1ab   :  { %v4099_v7 = vcombine.high %v4097_v16, %v4097_v16  ;;  %v4106_v12 = vrot.slane %v4090_v8, %v9798_v34  ;;  %v4120_v6 = vrot.slane %v4098_v11, %v9798_v34  ;;  %v2580_v23 = vcombine.high %v2578_v56, %v2578_v56 }
 0x1ac   :  { %v4113_v0 = vrot.slane %v4097_v16, %v9798_v34  ;;  %v2587_v40 = vrot.slane %v2571_v19, %v9798_v34  ;;  %v2601_v35 = vrot.slane %v2579_v37, %v9798_v34  ;;  %v4148_v25 = vcombine.high %v4146_v30, %v4146_v30 }
 0x1ad   :  { %v4127_v45 = vrot.slane %v4099_v7, %v9798_v34  ;;  %v7219_v55 = vcombine.low %v4106_v12, %v4120_v6  ;;  %v9211_v43 = vcombine.high %v4106_v12, %v4120_v6  ;;  %v2608_v10 = vrot.slane %v2580_v23, %v9798_v34 }
 0x1ae   :  { %v2594_v44 = vrot.slane %v2578_v56, %v9798_v34  ;;  %v5700_v61 = vcombine.low %v2587_v40, %v2601_v35  ;;  %v9149_v8 = vcombine.high %v2587_v40, %v2601_v35  ;;  %v4169_v13 = vrot.slane %v4147_v47, %v9798_v34 }
 0x1af   :  { %v7221_v36 = vcombine.low %v4113_v0, %v4127_v45  ;;  %v9212_v17 = vcombine.high %v4113_v0, %v4127_v45  ;;  %v4155_v16 = vrot.slane %v4139_v58, %v9798_v34  ;;  %v5536_v19 = vcombine.low %v9931_v4, %v9937_v53 }
 0x1b0   :  { %v5702_v11 = vcombine.low %v2594_v44, %v2608_v10  ;;  %v9150_v37 = vcombine.high %v2594_v44, %v2608_v10  ;;  %v4162_v7 = vrot.slane %v4146_v30, %v9798_v34  ;;  %v5537_v12 = vcombine.low %v9940_v15, %v9948_v18  ;;  %v1532_v10 = vpop.xlane.xlu1 %1531 }
 0x1b1   :  { %v10097_v56 = vrot.slane %v7219_v55, %v9798_v34  ;;  %v10100_v6 = vrot.slane %v9211_v43, %v9798_v34  ;;  %v4176_v47 = vrot.slane %v4148_v25, %v9798_v34  ;;  %v7268_v23 = vcombine.low %v4155_v16, %v4169_v13  ;;  %v1625_v43 = vpop.xlane.xlu0 %1624 }
 0x1b2   :  { %v10104_v58 = vrot.slane %v7221_v36, %v9798_v34  ;;  %v10107_v4 = vrot.slane %v5700_v61, %v9798_v34  ;;  %v10110_v53 = vrot.slane %v9149_v8, %v9798_v34  ;;  %v2613_v30 = vcombine.high %v2101_v5, %v2101_v5 }
 0x1b3   :  { %v10113_v15 = vrot.slane %v9212_v17, %v9798_v34  ;;  %v10116_v18 = vrot.slane %v5702_v11, %v9798_v34  ;;  %v10119_v0 = vrot.slane %v9150_v37, %v9798_v34  ;;  %v2620_v40 = vrot.slane %v2101_v5, %v9798_v34 }
 0x1b4   :  { %v9213_v35 = vcombine.high %v4155_v16, %v4169_v13  ;;  %v2627_v25 = vrot.slane %v2613_v30, %v9798_v34  ;;  %v5544_v45 = vrot.slane %v5536_v19, %v9798_v34  ;;  %v5551_v55 = vrot.slane %v5537_v12, %v9798_v34 }
 0x1b5   :  { %v7270_v44 = vcombine.low %v4162_v7, %v4176_v47  ;;  %v9214_v61 = vcombine.high %v4162_v7, %v4176_v47  ;;  %v10126_v8 = vrot.slane %v7268_v23, %v9798_v34  ;;  %v2628_v36 = vcombine.high %v2620_v40, %v2620_v40 }
 0x1b6   :  { %v2629_v17 = vcombine.high %v2627_v25, %v2627_v25  ;;  %v2636_v11 = vrot.slane %v2620_v40, %v9798_v34  ;;  %v5552_v37 = vcombine.low %v5544_v45, %v5551_v55  ;;  %v5487_v5 = vcombine.low %v9895_v31, %v9899_v27 }
 0x1b7   :  { %v2650_v13 = vrot.slane %v2628_v36, %v9798_v34  ;;  %v5488_v16 = vcombine.low %v9902_v48, %v9905_v51  ;;  %v2069_v19 = vadd.f32 %v9697_v21, %v1625_v43  ;;  %v2038_v7 = vadd.f32 %v9548_v57, %v1532_v10 }
 0x1b8   :  { %v2643_v12 = vrot.slane %v2627_v25, %v9798_v34  ;;  %v2657_v47 = vrot.slane %v2629_v17, %v9798_v34  ;;  %8503 = vperm.xlu0 %9269, %v5552_v37   ;;  %v5495_v23 = vrot.slane %v5487_v5, %v9798_v34  ;;  %v7104_v30 = vcombine.low %v9951_v28, %v9955_v46 }
 0x1b9   :  { %v5749_v31 = vcombine.low %v2636_v11, %v2650_v13  ;;  %v5502_v27 = vrot.slane %v5488_v16, %v9798_v34  ;;  %v2133_v40 = vmax.f32 %v2069_v19, 0.0  ;;  %v7105_v48 = vcombine.low %v9958_v41, %v9963_v60 }
 0x1ba   :  { %v10145_v21 = vrot.slane %v9213_v35, %v9798_v34  ;;  %v10148_v57 = vrot.slane %v7270_v44, %v9798_v34  ;;  %v9151_v51 = vcombine.high %v2636_v11, %v2650_v13  ;;  %v2102_v25 = vmax.f32 %v2038_v7, 0.0 }
 0x1bb   :  { %v10151_v45 = vrot.slane %v9214_v61, %v9798_v34  ;;  %v5751_v55 = vcombine.low %v2643_v12, %v2657_v47  ;;  %v5503_v28 = vcombine.low %v5495_v23, %v5502_v27  ;;  %v4181_v46 = vcombine.high %v2133_v40, %v2133_v40 }
 0x1bc   :  { %v9152_v43 = vcombine.high %v2643_v12, %v2657_v47  ;;  %v4188_v10 = vrot.slane %v2133_v40, %v9798_v34  ;;  %v2662_v36 = vcombine.high %v2102_v25, %v2102_v25  ;;  %v7112_v41 = vrot.slane %v7104_v30, %v9798_v34  ;;  %v1628_v12 = vpop.xlane.xlu1 %1627  ;;  %v1535_v47 = vpop.xlane.xlu0 %1534 }
 0x1bd   :  { %v10156_v60 = vrot.slane %v5749_v31, %v9798_v34  ;;  %8500 = vperm.xlu1 %9270, %v5503_v28   ;;  %v4195_v35 = vrot.slane %v4181_v46, %v9798_v34  ;;  %v2669_v44 = vrot.slane %v2102_v25, %v9798_v34  ;;  %v7119_v61 = vrot.slane %v7105_v48, %v9798_v34  ;;  %v11962_v25 = vld [vmem:[#allocation26_spill] sm:$0xff] }
 0x1be   :  { %v10162_v17 = vrot.slane %v9151_v51, %v9798_v34  ;;  %v4196_v11 = vcombine.high %v4188_v10, %v4188_v10  ;;  %v2676_v37 = vrot.slane %v2662_v36, %v9798_v34  ;;  %v7056_v5 = vcombine.low %v9917_v50, %v9924_v1 }
 0x1bf   :  { %v4197_v13 = vcombine.high %v4195_v35, %v4195_v35  ;;  %v4204_v16 = vrot.slane %v4188_v10, %v9798_v34  ;;  %v2677_v19 = vcombine.high %v2669_v44, %v2669_v44  ;;  %v7055_v7 = vcombine.low %v9908_v3, %v9913_v52 }
 0x1c0   :  { %v4211_v23 = vrot.slane %v4195_v35, %v9798_v34  ;;  %v4218_v30 = vrot.slane %v4196_v11, %v9798_v34  ;;  %v2678_v31 = vcombine.high %v2676_v37, %v2676_v37  ;;  %v7120_v27 = vcombine.low %v7112_v41, %v7119_v61 }
 0x1c1   :  { %v4225_v40 = vrot.slane %v4197_v13, %v9798_v34  ;;  %v10174_v48 = vrot.slane %v2669_v44, %v9798_v34  ;;  %v10177_v1 = vrot.slane %v2677_v19, %v9798_v34  ;;  %v7070_v50 = vrot.slane %v7056_v5, %v9798_v34  ;;  %v1631_v13 = vpop.xlane.xlu0 %1630 }
 0x1c2   :  { %v7317_v51 = vcombine.low %v4204_v16, %v4218_v30  ;;  %v9215_v3 = vcombine.high %v4204_v16, %v4218_v30  ;;  %v10181_v52 = vrot.slane %v2678_v31, %v9798_v34  ;;  %8599 = vperm.xlu0 %9269, %v7120_v27   ;;  %v2070_v28 = vadd.f32 %v11962_v25, %v1628_v12 }
 0x1c3   :  { %v10185_v46 = vrot.slane %v5751_v55, %v9798_v34  ;;  %v7319_v10 = vcombine.low %v4211_v23, %v4225_v40  ;;  %v9216_v36 = vcombine.high %v4211_v23, %v4225_v40  ;;  %v10188_v41 = vrot.slane %v2676_v37, %v9798_v34  ;;  %v11963_v23 = vld [vmem:[#allocation4_spill] sm:$0xff] }
 0x1c4   :  { %v10191_v35 = vrot.slane %v9152_v43, %v9798_v34  ;;  %v5798_v44 = vcombine.low %v10174_v48, %v10177_v1  ;;  %v9153_v61 = vcombine.high %v10174_v48, %v10177_v1  ;;  %v7063_v11 = vrot.slane %v7055_v7, %v9798_v34 }
 0x1c5   :  { %v10199_v5 = vrot.slane %v7317_v51, %v9798_v34  ;;  %v10202_v55 = vrot.slane %v9215_v3, %v9798_v34  ;;  %v5800_v37 = vcombine.low %v10188_v41, %v10181_v52  ;;  %v9154_v43 = vcombine.high %v10188_v41, %v10181_v52 }
 0x1c6   :  { %v10209_v16 = vrot.slane %v7319_v10, %v9798_v34  ;;  %v10212_v19 = vrot.slane %v9216_v36, %v9798_v34  ;;  %v7071_v7 = vcombine.low %v7063_v11, %v7070_v50  ;;  %v2134_v12 = vmax.f32 %v2070_v28, 0.0  ;;  %v11964_v50 = vld [vmem:[#allocation27_spill] sm:$0xff] }
 0x1c7   :  { %v2039_v30 = vadd.f32 %v11963_v23, %v1535_v47  ;;  %v5634_v31 = vcombine.low %v10016_v59, %v10030_v32  ;;  %v5635_v27 = vcombine.low %v10033_v24, %v10036_v62  ;;  %v5585_v40 = vcombine.low %v9971_v9, %v9981_v20 }
 0x1c8   :  { %8596 = vperm.xlu1 %9270, %v7071_v7   ;;  %v4230_v48 = vcombine.high %v2134_v12, %v2134_v12  ;;  %v4237_v1 = vrot.slane %v2134_v12, %v9798_v34  ;;  %v5586_v51 = vcombine.low %v9984_v39, %v9987_v2  ;;  %v2071_v3 = vadd.f32 %v11964_v50, %v1631_v13 }
 0x1c9   :  { %v10226_v47 = vrot.slane %v5798_v44, %v9798_v34  ;;  %v2103_v52 = vmax.f32 %v2039_v30, 0.0  ;;  %v5642_v59 = vrot.slane %v5634_v31, %v9798_v34  ;;  %v5649_v32 = vrot.slane %v5635_v27, %v9798_v34 }
 0x1ca   :  { %v4244_v24 = vrot.slane %v4230_v48, %v9798_v34  ;;  %v4245_v9 = vcombine.high %v4237_v1, %v4237_v1  ;;  %v5593_v20 = vrot.slane %v5585_v40, %v9798_v34  ;;  %v5600_v62 = vrot.slane %v5586_v51, %v9798_v34 }
 0x1cb   :  { %v2711_v25 = vcombine.high %v2103_v52, %v2103_v52  ;;  %v2718_v39 = vrot.slane %v2103_v52, %v9798_v34  ;;  %v5650_v2 = vcombine.low %v5642_v59, %v5649_v32  ;;  %v2135_v28 = vmax.f32 %v2071_v3, 0.0 }
 0x1cc   :  { %v4246_v10 = vcombine.high %v4244_v24, %v4244_v24  ;;  %v4253_v36 = vrot.slane %v4237_v1, %v9798_v34  ;;  %v4267_v41 = vrot.slane %v4245_v9, %v9798_v34  ;;  %v5601_v44 = vcombine.low %v5593_v20, %v5600_v62  ;;  %v1538_v62 = vpop.xlane.xlu1 %1537 }
 0x1cd   :  { %v4260_v11 = vrot.slane %v4244_v24, %v9798_v34  ;;  %v2725_v13 = vrot.slane %v2711_v25, %v9798_v34  ;;  %v2726_v7 = vcombine.high %v2718_v39, %v2718_v39  ;;  %8509 = vperm.xlu0 %9269, %v5650_v2   ;;  %v4279_v12 = vcombine.high %v2135_v28, %v2135_v28 }
 0x1ce   :  { %v4274_v23 = vrot.slane %v4246_v10, %v9798_v34  ;;  %v7366_v30 = vcombine.low %v4253_v36, %v4267_v41  ;;  %v2734_v31 = vrot.slane %v2718_v39, %v9798_v34  ;;  %8506 = vperm.xlu1 %9270, %v5601_v44   ;;  %v4286_v27 = vrot.slane %v2135_v28, %v9798_v34 }
 0x1cf   :  { %v9217_v40 = vcombine.high %v4253_v36, %v4267_v41  ;;  %v2727_v48 = vcombine.high %v2725_v13, %v2725_v13  ;;  %v2748_v1 = vrot.slane %v2726_v7, %v9798_v34  ;;  %v4293_v51 = vrot.slane %v4279_v12, %v9798_v34 }
 0x1d0   :  { %v10244_v50 = vrot.slane %v9153_v61, %v9798_v34  ;;  %v10247_v3 = vrot.slane %v5800_v37, %v9798_v34  ;;  %v7368_v52 = vcombine.low %v4260_v11, %v4274_v23  ;;  %v2741_v59 = vrot.slane %v2725_v13, %v9798_v34 }
 0x1d1   :  { %v9218_v32 = vcombine.high %v4260_v11, %v4274_v23  ;;  %v2755_v24 = vrot.slane %v2727_v48, %v9798_v34  ;;  %v5847_v9 = vcombine.low %v2734_v31, %v2748_v1  ;;  %v4294_v20 = vcombine.high %v4286_v27, %v4286_v27  ;;  %v11965_v11 = vld [vmem:[#allocation5_spill] sm:$0xff] }
 0x1d2   :  { %v10252_v25 = vrot.slane %v9154_v43, %v9798_v34  ;;  %v10255_v39 = vrot.slane %v7366_v30, %v9798_v34  ;;  %v9155_v61 = vcombine.high %v2734_v31, %v2748_v1  ;;  %v4295_v2 = vcombine.high %v4293_v51, %v4293_v51 }
 0x1d3   :  { %v10258_v37 = vrot.slane %v9217_v40, %v9798_v34  ;;  %v10261_v28 = vrot.slane %v7368_v52, %v9798_v34  ;;  %v5849_v10 = vcombine.low %v2741_v59, %v2755_v24  ;;  %v4302_v36 = vrot.slane %v4286_v27, %v9798_v34 }
 0x1d4   :  { %v9156_v41 = vcombine.high %v2741_v59, %v2755_v24  ;;  %v4316_v44 = vrot.slane %v4294_v20, %v9798_v34  ;;  %v4323_v43 = vrot.slane %v4295_v2, %v9798_v34  ;;  %v2040_v13 = vadd.f32 %v11965_v11, %v1538_v62  ;;  %v1634_v24 = vpop.xlane.xlu1 %1633  ;;  %v11967_v2 = vld [vmem:[#allocation49_spill] sm:$0xff]  ;;  %v11969_v11 = vld [vmem:[#allocation6_spill] sm:$0xff] }
 0x1d5   :  { %v10268_v7 = vrot.slane %v9218_v32, %v9798_v34  ;;  %v10271_v12 = vrot.slane %v5847_v9, %v9798_v34  ;;  %v7202_v23 = vcombine.low %v10040_v49, %v10043_v29  ;;  %v7203_v30 = vcombine.low %v10061_v33, %v10064_v63  ;;  %v1541_v49 = vpop.xlane.xlu0 %1540 }
 0x1d6   :  { %v10278_v31 = vrot.slane %v9155_v61, %v9798_v34  ;;  %v4309_v27 = vrot.slane %v4293_v51, %v9798_v34  ;;  %v7415_v40 = vcombine.low %v4302_v36, %v4316_v44  ;;  %v9219_v48 = vcombine.high %v4302_v36, %v4316_v44  ;;  %v11966_v61 = vld [vmem:[#allocation50_spill] sm:$0xff] }
 0x1d7   :  { %v2104_v1 = vmax.f32 %v2040_v13, 0.0  ;;  %v7210_v52 = vrot.slane %v7202_v23, %v9798_v34  ;;  %v7217_v59 = vrot.slane %v7203_v30, %v9798_v34  ;;  %v7153_v32 = vcombine.low %v9991_v42, %v9995_v22  ;;  %v11968_v22 = vld [vmem:[#allocation28_spill] sm:$0xff] }
 0x1d8   :  { %v10286_v29 = vrot.slane %v5849_v10, %v9798_v34  ;;  %v10289_v33 = vrot.slane %v9156_v41, %v9798_v34  ;;  %v7417_v63 = vcombine.low %v4309_v27, %v4323_v43  ;;  %v9220_v51 = vcombine.high %v4309_v27, %v4323_v43 }
 0x1d9   :  { %v2760_v9 = vcombine.high %v2104_v1, %v2104_v1  ;;  %v2767_v20 = vrot.slane %v2104_v1, %v9798_v34  ;;  %v7218_v62 = vcombine.low %v7210_v52, %v7217_v59  ;;  %v7154_v36 = vcombine.low %v11967_v2, %v11966_v61 }
 0x1da   :  { %v10295_v44 = vrot.slane %v7415_v40, %v9798_v34  ;;  %v10298_v42 = vrot.slane %v9219_v48, %v9798_v34  ;;  %v2072_v10 = vadd.f32 %v11968_v22, %v1634_v24  ;;  %v2041_v41 = vadd.f32 %v11969_v11, %v1541_v49 }
 0x1db   :  { %v2774_v13 = vrot.slane %v2760_v9, %v9798_v34  ;;  %v2775_v43 = vcombine.high %v2767_v20, %v2767_v20  ;;  %8605 = vperm.xlu0 %9269, %v7218_v62   ;;  %v7161_v23 = vrot.slane %v7153_v32, %v9798_v34  ;;  %v7168_v30 = vrot.slane %v7154_v36, %v9798_v34 }
 0x1dc   :  { %v2783_v27 = vrot.slane %v2767_v20, %v9798_v34  ;;  %v2136_v1 = vmax.f32 %v2072_v10, 0.0  ;;  %v2105_v40 = vmax.f32 %v2041_v41, 0.0  ;;  %v5732_v48 = vcombine.low %v10107_v4, %v10110_v53 }
 0x1dd   :  { %v2776_v52 = vcombine.high %v2774_v13, %v2774_v13  ;;  %v2797_v59 = vrot.slane %v2775_v43, %v9798_v34  ;;  %v7169_v24 = vcombine.low %v7161_v23, %v7168_v30  ;;  %v5733_v49 = vcombine.low %v10116_v18, %v10119_v0 }
 0x1de   :  { %v4328_v9 = vcombine.high %v2136_v1, %v2136_v1  ;;  %v4335_v62 = vrot.slane %v2136_v1, %v9798_v34  ;;  %v2809_v32 = vcombine.high %v2105_v40, %v2105_v40  ;;  %v2816_v61 = vrot.slane %v2105_v40, %v9798_v34 }
 0x1df   :  { %v10314_v20 = vrot.slane %v7417_v63, %v9798_v34  ;;  %v2804_v2 = vrot.slane %v2776_v52, %v9798_v34  ;;  %v5896_v36 = vcombine.low %v2783_v27, %v2797_v59  ;;  %v9157_v4 = vcombine.high %v2783_v27, %v2797_v59  ;;  %8602 = vperm.xlu1 %9270, %v7169_v24  }
 0x1e0   :  { %v2790_v53 = vrot.slane %v2774_v13, %v9798_v34  ;;  %v4342_v22 = vrot.slane %v4328_v9, %v9798_v34  ;;  %v4343_v10 = vcombine.high %v4335_v62, %v4335_v62  ;;  %v2823_v18 = vrot.slane %v2809_v32, %v9798_v34  ;;  %v1544_v13 = vpop.xlane.xlu1 %1543 }
 0x1e1   :  { %v10321_v0 = vrot.slane %v9220_v51, %v9798_v34  ;;  %v4351_v11 = vrot.slane %v4335_v62, %v9798_v34  ;;  %v5740_v63 = vrot.slane %v5732_v48, %v9798_v34  ;;  %v5747_v41 = vrot.slane %v5733_v49, %v9798_v34 }
 0x1e2   :  { %v5898_v43 = vcombine.low %v2790_v53, %v2804_v2  ;;  %v4344_v23 = vcombine.high %v4342_v22, %v4342_v22  ;;  %v4365_v30 = vrot.slane %v4343_v10, %v9798_v34  ;;  %v2824_v27 = vcombine.high %v2816_v61, %v2816_v61 }
 0x1e3   :  { %v9158_v1 = vcombine.high %v2790_v53, %v2804_v2  ;;  %v10328_v40 = vrot.slane %v5896_v36, %v9798_v34  ;;  %v10331_v52 = vrot.slane %v9157_v4, %v9798_v34  ;;  %v2825_v51 = vcombine.high %v2823_v18, %v2823_v18 }
 0x1e4   :  { %v4358_v59 = vrot.slane %v4342_v22, %v9798_v34  ;;  %v4372_v48 = vrot.slane %v4344_v23, %v9798_v34  ;;  %v7464_v24 = vcombine.low %v4351_v11, %v4365_v30  ;;  %v9221_v49 = vcombine.high %v4351_v11, %v4365_v30 }
 0x1e5   :  { %v2846_v9 = vrot.slane %v2824_v27, %v9798_v34  ;;  %v10337_v62 = vrot.slane %v2825_v51, %v9798_v34  ;;  %v5748_v32 = vcombine.low %v5740_v63, %v5747_v41  ;;  %v5683_v2 = vcombine.low %v10048_v54, %v10051_v38  ;;  %v1637_v54 = vpop.xlane.xlu0 %1636 }
 0x1e6   :  { %v7466_v36 = vcombine.low %v4358_v59, %v4372_v48  ;;  %v9222_v53 = vcombine.high %v4358_v59, %v4372_v48  ;;  %v2832_v4 = vrot.slane %v2816_v61, %v9798_v34  ;;  %v10343_v10 = vrot.slane %v2823_v18, %v9798_v34  ;;  %v11970_v48 = vld [vmem:[#allocation29_spill] sm:$0xff] }
 0x1e7   :  { %v10346_v22 = vrot.slane %v5898_v43, %v9798_v34  ;;  %v10349_v11 = vrot.slane %v9158_v1, %v9798_v34  ;;  %v10352_v23 = vrot.slane %v7464_v24, %v9798_v34  ;;  %v10355_v63 = vrot.slane %v9221_v49, %v9798_v34  ;;  %8515 = vperm.xlu0 %9269, %v5748_v32   ;;  %v1640_v43 = vpop.xlane.xlu1 %1639  ;;  %v11971_v49 = vld [vmem:[#allocation7_spill] sm:$0xff] }
 0x1e8   :  { %v5945_v38 = vcombine.low %v2832_v4, %v2846_v9  ;;  %v9159_v41 = vcombine.high %v2832_v4, %v2846_v9  ;;  %v5947_v61 = vcombine.low %v10343_v10, %v10337_v62  ;;  %v5684_v18 = vcombine.low %v10072_v14, %v10076_v26 }
 0x1e9   :  { %v10362_v30 = vrot.slane %v7466_v36, %v9798_v34  ;;  %v10365_v27 = vrot.slane %v9222_v53, %v9798_v34  ;;  %v9160_v1 = vcombine.high %v10343_v10, %v10337_v62  ;;  %v5691_v51 = vrot.slane %v5683_v2, %v9798_v34  ;;  %v11972_v36 = vld [vmem:[#allocation30_spill] sm:$0xff] }
 0x1ea   :  { %v5698_v59 = vrot.slane %v5684_v18, %v9798_v34  ;;  %v2073_v24 = vadd.f32 %v11970_v48, %v1637_v54  ;;  %v2042_v9 = vadd.f32 %v11971_v49, %v1544_v13  ;;  %v7300_v14 = vcombine.low %v10126_v8, %v10145_v21 }
 0x1eb   :  { %v7301_v26 = vcombine.low %v10148_v57, %v10151_v45  ;;  %v7251_v32 = vcombine.low %v10097_v56, %v10100_v6  ;;  %v7252_v62 = vcombine.low %v10104_v58, %v10113_v15  ;;  %v2074_v2 = vadd.f32 %v11972_v36, %v1640_v43 }
 0x1ec   :  { %v5699_v53 = vcombine.low %v5691_v51, %v5698_v59  ;;  %v2137_v4 = vmax.f32 %v2073_v24, 0.0  ;;  %v2106_v10 = vmax.f32 %v2042_v9, 0.0  ;;  %v7308_v54 = vrot.slane %v7300_v14, %v9798_v34 }
 0x1ed   :  { %v7315_v13 = vrot.slane %v7301_v26, %v9798_v34  ;;  %v7259_v8 = vrot.slane %v7251_v32, %v9798_v34  ;;  %v7266_v21 = vrot.slane %v7252_v62, %v9798_v34  ;;  %v2138_v57 = vmax.f32 %v2074_v2, 0.0 }
 0x1ee   :  { %8512 = vperm.xlu1 %9270, %v5699_v53   ;;  %v4377_v45 = vcombine.high %v2137_v4, %v2137_v4  ;;  %v4384_v56 = vrot.slane %v2137_v4, %v9798_v34  ;;  %v2858_v6 = vcombine.high %v2106_v10, %v2106_v10  ;;  %v2865_v58 = vrot.slane %v2106_v10, %v9798_v34 }
 0x1ef   :  { %v10389_v15 = vrot.slane %v5945_v38, %v9798_v34  ;;  %v7316_v18 = vcombine.low %v7308_v54, %v7315_v13  ;;  %v4426_v43 = vcombine.high %v2138_v57, %v2138_v57  ;;  %v4433_v51 = vrot.slane %v2138_v57, %v9798_v34 }
 0x1f0   :  { %v4391_v59 = vrot.slane %v4377_v45, %v9798_v34  ;;  %v4392_v48 = vcombine.high %v4384_v56, %v4384_v56  ;;  %v2872_v24 = vrot.slane %v2858_v6, %v9798_v34  ;;  %v7267_v49 = vcombine.low %v7259_v8, %v7266_v21 }
 0x1f1   :  { %v10395_v9 = vrot.slane %v9159_v41, %v9798_v34  ;;  %v2873_v14 = vcombine.high %v2865_v58, %v2865_v58  ;;  %8611 = vperm.xlu0 %9269, %v7316_v18   ;;  %v4440_v26 = vrot.slane %v4426_v43, %v9798_v34  ;;  %v4441_v32 = vcombine.high %v4433_v51, %v4433_v51  ;;  %v1547_v18 = vpop.xlane.xlu0 %1546 }
 0x1f2   :  { %v4393_v38 = vcombine.high %v4391_v59, %v4391_v59  ;;  %v4400_v62 = vrot.slane %v4384_v56, %v9798_v34  ;;  %v4414_v36 = vrot.slane %v4392_v48, %v9798_v34  ;;  %v2874_v2 = vcombine.high %v2872_v24, %v2872_v24  ;;  %8608 = vperm.xlu1 %9270, %v7267_v49  }
 0x1f3   :  { %v4407_v53 = vrot.slane %v4391_v59, %v9798_v34  ;;  %v2881_v4 = vrot.slane %v2865_v58, %v9798_v34  ;;  %v2895_v10 = vrot.slane %v2873_v14, %v9798_v34  ;;  %v4442_v41 = vcombine.high %v4440_v26, %v4440_v26 }
 0x1f4   :  { %v4421_v54 = vrot.slane %v4393_v38, %v9798_v34  ;;  %v7513_v13 = vcombine.low %v4400_v62, %v4414_v36  ;;  %v9223_v8 = vcombine.high %v4400_v62, %v4414_v36  ;;  %v2902_v21 = vrot.slane %v2874_v2, %v9798_v34 }
 0x1f5   :  { %v2888_v57 = vrot.slane %v2872_v24, %v9798_v34  ;;  %v5994_v45 = vcombine.low %v2881_v4, %v2895_v10  ;;  %v9161_v56 = vcombine.high %v2881_v4, %v2895_v10  ;;  %v4463_v6 = vrot.slane %v4441_v32, %v9798_v34 }
 0x1f6   :  { %v10408_v43 = vrot.slane %v5947_v61, %v9798_v34  ;;  %v7515_v58 = vcombine.low %v4407_v53, %v4421_v54  ;;  %v9224_v59 = vcombine.high %v4407_v53, %v4421_v54  ;;  %v4449_v48 = vrot.slane %v4433_v51, %v9798_v34  ;;  %v11973_v53 = vld [vmem:[#allocation8_spill] sm:$0xff] }
 0x1f7   :  { %v10412_v49 = vrot.slane %v9160_v1, %v9798_v34  ;;  %v5996_v14 = vcombine.low %v2888_v57, %v2902_v21  ;;  %v9162_v38 = vcombine.high %v2888_v57, %v2902_v21  ;;  %v4456_v62 = vrot.slane %v4440_v26, %v9798_v34 }
 0x1f8   :  { %v10416_v24 = vrot.slane %v7513_v13, %v9798_v34  ;;  %v10419_v32 = vrot.slane %v9223_v8, %v9798_v34  ;;  %v4470_v61 = vrot.slane %v4442_v41, %v9798_v34  ;;  %v7562_v36 = vcombine.low %v4449_v48, %v4463_v6 }
 0x1f9   :  { %v10423_v2 = vrot.slane %v7515_v58, %v9798_v34  ;;  %v10426_v51 = vrot.slane %v5994_v45, %v9798_v34  ;;  %v10429_v1 = vrot.slane %v9161_v56, %v9798_v34  ;;  %v2043_v26 = vadd.f32 %v11973_v53, %v1547_v18  ;;  %v1643_v45 = vpop.xlane.xlu0 %1642  ;;  %v1550_v56 = vpop.xlane.xlu1 %1549 }
 0x1fa   :  { %v10433_v4 = vrot.slane %v9224_v59, %v9798_v34  ;;  %v10436_v10 = vrot.slane %v5996_v14, %v9798_v34  ;;  %v10439_v41 = vrot.slane %v9162_v38, %v9798_v34  ;;  %v5830_v54 = vcombine.low %v10226_v47, %v10244_v50 }
 0x1fb   :  { %v9225_v13 = vcombine.high %v4449_v48, %v4463_v6  ;;  %v2107_v8 = vmax.f32 %v2043_v26, 0.0  ;;  %v5831_v21 = vcombine.low %v10247_v3, %v10252_v25  ;;  %v5781_v57 = vcombine.low %v10156_v60, %v10162_v17  ;;  %v11974_v17 = vld [vmem:[#allocation31_spill] sm:$0xff]  ;;  %v11975_v48 = vld [vmem:[#allocation9_spill] sm:$0xff] }
 0x1fc   :  { %v7564_v18 = vcombine.low %v4456_v62, %v4470_v61  ;;  %v9226_v58 = vcombine.high %v4456_v62, %v4470_v61  ;;  %v10448_v59 = vrot.slane %v7562_v36, %v9798_v34  ;;  %v5782_v14 = vcombine.low %v10185_v46, %v10191_v35 }
 0x1fd   :  { %v2907_v38 = vcombine.high %v2107_v8, %v2107_v8  ;;  %v2914_v47 = vrot.slane %v2107_v8, %v9798_v34  ;;  %v5838_v50 = vrot.slane %v5830_v54, %v9798_v34  ;;  %v5845_v3 = vrot.slane %v5831_v21, %v9798_v34 }
 0x1fe   :  { %v5789_v25 = vrot.slane %v5781_v57, %v9798_v34  ;;  %v5796_v60 = vrot.slane %v5782_v14, %v9798_v34  ;;  %v2075_v6 = vadd.f32 %v11974_v17, %v1643_v45  ;;  %v2044_v62 = vadd.f32 %v11975_v48, %v1550_v56 }
 0x1ff   :  { %v10460_v61 = vrot.slane %v9225_v13, %v9798_v34  ;;  %v2921_v46 = vrot.slane %v2907_v38, %v9798_v34  ;;  %v2922_v35 = vcombine.high %v2914_v47, %v2914_v47  ;;  %v5846_v36 = vcombine.low %v5838_v50, %v5845_v3 }
 0x200   :  { %v5797_v53 = vcombine.low %v5789_v25, %v5796_v60  ;;  %v2139_v26 = vmax.f32 %v2075_v6, 0.0  ;;  %v2108_v54 = vmax.f32 %v2044_v62, 0.0  ;;  %v7398_v8 = vcombine.low %v10255_v39, %v10258_v37 }
 0x201   :  { %v10466_v21 = vrot.slane %v7564_v18, %v9798_v34  ;;  %v2923_v57 = vcombine.high %v2921_v46, %v2921_v46  ;;  %v2944_v45 = vrot.slane %v2922_v35, %v9798_v34  ;;  %8521 = vperm.xlu0 %9269, %v5846_v36   ;;  %v7399_v13 = vcombine.low %v10261_v28, %v10268_v7 }
 0x202   :  { %8518 = vperm.xlu1 %9270, %v5797_v53   ;;  %v4475_v56 = vcombine.high %v2139_v26, %v2139_v26  ;;  %v4482_v14 = vrot.slane %v2139_v26, %v9798_v34  ;;  %v2956_v38 = vcombine.high %v2108_v54, %v2108_v54  ;;  %v2963_v50 = vrot.slane %v2108_v54, %v9798_v34 }
 0x203   :  { %v10474_v3 = vrot.slane %v9226_v58, %v9798_v34  ;;  %v2930_v39 = vrot.slane %v2914_v47, %v9798_v34  ;;  %v2937_v37 = vrot.slane %v2921_v46, %v9798_v34  ;;  %v2951_v18 = vrot.slane %v2923_v57, %v9798_v34  ;;  %v1553_v57 = vpop.xlane.xlu0 %1552 }
 0x204   :  { %v4489_v25 = vrot.slane %v4475_v56, %v9798_v34  ;;  %v4490_v60 = vcombine.high %v4482_v14, %v4482_v14  ;;  %v2970_v28 = vrot.slane %v2956_v38, %v9798_v34  ;;  %v7406_v7 = vrot.slane %v7398_v8, %v9798_v34 }
 0x205   :  { %v6043_v17 = vcombine.low %v2930_v39, %v2944_v45  ;;  %v9163_v6 = vcombine.high %v2930_v39, %v2944_v45  ;;  %v4498_v48 = vrot.slane %v4482_v14, %v9798_v34  ;;  %v7413_v58 = vrot.slane %v7399_v13, %v9798_v34 }
 0x206   :  { %v6045_v62 = vcombine.low %v2937_v37, %v2951_v18  ;;  %v4491_v35 = vcombine.high %v4489_v25, %v4489_v25  ;;  %v4512_v47 = vrot.slane %v4490_v60, %v9798_v34  ;;  %v2971_v46 = vcombine.high %v2963_v50, %v2963_v50 }
 0x207   :  { %v9164_v36 = vcombine.high %v2937_v37, %v2951_v18  ;;  %v4505_v53 = vrot.slane %v4489_v25, %v9798_v34  ;;  %v2972_v26 = vcombine.high %v2970_v28, %v2970_v28  ;;  %v10487_v54 = vrot.slane %v2963_v50, %v9798_v34 }
 0x208   :  { %v4519_v8 = vrot.slane %v4491_v35, %v9798_v34  ;;  %v7611_v45 = vcombine.low %v4498_v48, %v4512_v47  ;;  %v9227_v56 = vcombine.high %v4498_v48, %v4512_v47  ;;  %v10491_v14 = vrot.slane %v2970_v28, %v9798_v34 }
 0x209   :  { %v10494_v13 = vrot.slane %v2971_v46, %v9798_v34  ;;  %v10497_v38 = vrot.slane %v2972_v26, %v9798_v34  ;;  %v7414_v39 = vcombine.low %v7406_v7, %v7413_v58  ;;  %v7349_v37 = vcombine.low %v10199_v5, %v10202_v55  ;;  %v1646_v5 = vpop.xlane.xlu1 %1645 }
 0x20a   :  { %v7613_v50 = vcombine.low %v4505_v53, %v4519_v8  ;;  %v9228_v18 = vcombine.high %v4505_v53, %v4519_v8  ;;  %v10502_v25 = vrot.slane %v7611_v45, %v9798_v34  ;;  %v10505_v60 = vrot.slane %v9227_v56, %v9798_v34  ;;  %v1649_v53 = vpop.xlane.xlu0 %1648  ;;  %v11977_v45 = vld [vmem:[#allocation32_spill] sm:$0xff] }
 0x20b   :  { %v10508_v28 = vrot.slane %v6043_v17, %v9798_v34  ;;  %v10511_v48 = vrot.slane %v9163_v6, %v9798_v34  ;;  %v10514_v35 = vrot.slane %v6045_v62, %v9798_v34  ;;  %v10517_v7 = vrot.slane %v9164_v36, %v9798_v34  ;;  %8617 = vperm.xlu0 %9269, %v7414_v39  }
 0x20c   :  { %11976 = vst [vmem:[#allocation26_spill] sm:$0xff] %v10505_v60  ;;  %v6092_v55 = vcombine.low %v10487_v54, %v10494_v13  ;;  %v7350_v6 = vcombine.low %v10209_v16, %v10212_v19  ;;  %v10528_v62 = vrot.slane %v7613_v50, %v9798_v34  ;;  %v10531_v47 = vrot.slane %v9228_v18, %v9798_v34  ;;  %v11978_v16 = vld [vmem:[#allocation10_spill] sm:$0xff] }
 0x20d   :  { %v9166_v36 = vcombine.high %v10491_v14, %v10497_v38  ;;  %v7357_v26 = vrot.slane %v7349_v37, %v9798_v34  ;;  %v2076_v56 = vadd.f32 %v11977_v45, %v1646_v5  ;;  %v2045_v19 = vadd.f32 %v11978_v16, %v1553_v57 }
 0x20e   :  { %v7364_v8 = vrot.slane %v7350_v6, %v9798_v34  ;;  %v5928_v39 = vcombine.low %v10328_v40, %v10331_v52  ;;  %v5929_v50 = vcombine.low %v10346_v22, %v10349_v11  ;;  %v5879_v18 = vcombine.low %v10271_v12, %v10278_v31  ;;  %v11979_v6 = vld [vmem:[#allocation33_spill] sm:$0xff]  ;;  %v1556_v22 = vpop.xlane.xlu1 %1555 }
 0x20f   :  { %v5880_v46 = vcombine.low %v10286_v29, %v10289_v33  ;;  %v2140_v37 = vmax.f32 %v2076_v56, 0.0  ;;  %v2109_v58 = vmax.f32 %v2045_v19, 0.0  ;;  %v2077_v60 = vadd.f32 %v11979_v6, %v1649_v53 }
 0x210   :  { %v7365_v17 = vcombine.low %v7357_v26, %v7364_v8  ;;  %v5936_v5 = vrot.slane %v5928_v39, %v9798_v34  ;;  %v5943_v57 = vrot.slane %v5929_v50, %v9798_v34  ;;  %v5887_v40 = vrot.slane %v5879_v18, %v9798_v34 }
 0x211   :  { %v5894_v52 = vrot.slane %v5880_v46, %v9798_v34  ;;  %v4524_v11 = vcombine.high %v2140_v37, %v2140_v37  ;;  %v4531_v12 = vrot.slane %v2140_v37, %v9798_v34  ;;  %v3005_v31 = vcombine.high %v2109_v58, %v2109_v58  ;;  %v11980_v46 = vld [vmem:[#allocation11_spill] sm:$0xff] }
 0x212   :  { %8614 = vperm.xlu1 %9270, %v7365_v17   ;;  %v3012_v29 = vrot.slane %v2109_v58, %v9798_v34  ;;  %v10557_v33 = vrot.slane %v6092_v55, %v9798_v34  ;;  %v5944_v53 = vcombine.low %v5936_v5, %v5943_v57  ;;  %v2141_v8 = vmax.f32 %v2077_v60, 0.0 }
 0x213   :  { %v5895_v26 = vcombine.low %v5887_v40, %v5894_v52  ;;  %v4538_v45 = vrot.slane %v4524_v11, %v9798_v34  ;;  %v4539_v56 = vcombine.high %v4531_v12, %v4531_v12  ;;  %v3019_v16 = vrot.slane %v3005_v31, %v9798_v34 }
 0x214   :  { %v2046_v19 = vadd.f32 %v11980_v46, %v1556_v22  ;;  %v4547_v17 = vrot.slane %v4531_v12, %v9798_v34  ;;  %v3020_v39 = vcombine.high %v3012_v29, %v3012_v29  ;;  %8527 = vperm.xlu0 %9269, %v5944_v53   ;;  %v4573_v50 = vcombine.high %v2141_v8, %v2141_v8 }
 0x215   :  { %v4580_v58 = vrot.slane %v2141_v8, %v9798_v34  ;;  %v4540_v18 = vcombine.high %v4538_v45, %v4538_v45  ;;  %v4561_v55 = vrot.slane %v4539_v56, %v9798_v34  ;;  %v3021_v37 = vcombine.high %v3019_v16, %v3019_v16 }
 0x216   :  { %v3028_v60 = vrot.slane %v3012_v29, %v9798_v34  ;;  %8524 = vperm.xlu1 %9270, %v5895_v26   ;;  %v4554_v6 = vrot.slane %v4538_v45, %v9798_v34  ;;  %v3035_v5 = vrot.slane %v3019_v16, %v9798_v34  ;;  %v3042_v57 = vrot.slane %v3020_v39, %v9798_v34 }
 0x217   :  { %v4587_v40 = vrot.slane %v4573_v50, %v9798_v34  ;;  %v4568_v52 = vrot.slane %v4540_v18, %v9798_v34  ;;  %v7660_v22 = vcombine.low %v4547_v17, %v4561_v55  ;;  %v9229_v11 = vcombine.high %v4547_v17, %v4561_v55 }
 0x218   :  { %v3049_v12 = vrot.slane %v3021_v37, %v9798_v34  ;;  %v6141_v31 = vcombine.low %v3028_v60, %v3042_v57  ;;  %v9167_v53 = vcombine.high %v3028_v60, %v3042_v57  ;;  %v4588_v8 = vcombine.high %v4580_v58, %v4580_v58 }
 0x219   :  { %v4589_v56 = vcombine.high %v4587_v40, %v4587_v40  ;;  %v7662_v29 = vcombine.low %v4554_v6, %v4568_v52  ;;  %v9230_v26 = vcombine.high %v4554_v6, %v4568_v52  ;;  %v10573_v45 = vrot.slane %v7660_v22, %v9798_v34 }
 0x21a   :  { %v10576_v16 = vrot.slane %v9229_v11, %v9798_v34  ;;  %v11983_v46 = vcombine.high %v10487_v54, %v10494_v13  ;;  %v11984_v17 = vcombine.low %v10491_v14, %v10497_v38  ;;  %v10591_v18 = vrot.slane %v9166_v36, %v9798_v34  ;;  %v1652_v13 = vpop.xlane.xlu1 %1651 }
 0x21b   :  { %11981 = vst [vmem:[#allocation4_spill] sm:$0xff] %v10573_v45  ;;  %v4596_v55 = vrot.slane %v4580_v58, %v9798_v34  ;;  %v6143_v37 = vcombine.low %v3035_v5, %v3049_v12  ;;  %v9168_v60 = vcombine.high %v3035_v5, %v3049_v12  ;;  %v10595_v6 = vrot.slane %v6141_v31, %v9798_v34  ;;  %v1559_v58 = vpop.xlane.xlu0 %1558 }
 0x21c   :  { %11982 = vst [vmem:[#allocation27_spill] sm:$0xff] %v10576_v16  ;;  %v10582_v39 = vrot.slane %v11983_v46, %v9798_v34  ;;  %v10588_v50 = vrot.slane %v11984_v17, %v9798_v34  ;;  %v10598_v54 = vrot.slane %v9167_v53, %v9798_v34  ;;  %v10601_v57 = vrot.slane %v7662_v29, %v9798_v34  ;;  %v11987_v29 = vld [vmem:[#allocation34_spill] sm:$0xff] }
 0x21d   :  { %v10604_v14 = vrot.slane %v9230_v26, %v9798_v34  ;;  %v4610_v36 = vrot.slane %v4588_v8, %v9798_v34  ;;  %v4617_v5 = vrot.slane %v4589_v56, %v9798_v34  ;;  %v2110_v52 = vmax.f32 %v2046_v19, 0.0  ;;  %v11988_v56 = vld [vmem:[#allocation12_spill] sm:$0xff] }
 0x21e   :  { %11985 = vst [vmem:[#allocation5_spill] sm:$0xff] %v10601_v57  ;;  %v7447_v22 = vcombine.low %v10295_v44, %v10298_v42  ;;  %v7448_v11 = vcombine.low %v10314_v20, %v10321_v0  ;;  %v4603_v12 = vrot.slane %v4587_v40, %v9798_v34  ;;  %v2078_v26 = vadd.f32 %v11987_v29, %v1652_v13 }
 0x21f   :  { %11986 = vst [vmem:[#allocation50_spill] sm:$0xff] %v10604_v14  ;;  %v7709_v31 = vcombine.low %v4596_v55, %v4610_v36  ;;  %v9231_v53 = vcombine.high %v4596_v55, %v4610_v36  ;;  %v10617_v46 = vrot.slane %v6143_v37, %v9798_v34  ;;  %v3054_v8 = vcombine.high %v2110_v52, %v2110_v52 }
 0x220   :  { %v3061_v17 = vrot.slane %v2110_v52, %v9798_v34  ;;  %v2047_v19 = vadd.f32 %v11988_v56, %v1559_v58  ;;  %v10622_v38 = vrot.slane %v9168_v60, %v9798_v34  ;;  %v7711_v44 = vcombine.low %v4603_v12, %v4617_v5 }
 0x221   :  { %v7455_v42 = vrot.slane %v7447_v22, %v9798_v34  ;;  %v7462_v20 = vrot.slane %v7448_v11, %v9798_v34  ;;  %v9232_v40 = vcombine.high %v4603_v12, %v4617_v5  ;;  %v3068_v55 = vrot.slane %v3054_v8, %v9798_v34 }
 0x222   :  { %v3069_v37 = vcombine.high %v3061_v17, %v3061_v17  ;;  %v10630_v13 = vrot.slane %v7709_v31, %v9798_v34  ;;  %v10633_v36 = vrot.slane %v9231_v53, %v9798_v34  ;;  %v2142_v58 = vmax.f32 %v2078_v26, 0.0 }
 0x223   :  { %v7463_v60 = vcombine.low %v7455_v42, %v7462_v20  ;;  %v3070_v52 = vcombine.high %v3068_v55, %v3068_v55  ;;  %v3077_v22 = vrot.slane %v3061_v17, %v9798_v34  ;;  %v2111_v29 = vmax.f32 %v2047_v19, 0.0 }
 0x224   :  { %11989 = vst [vmem:[#allocation49_spill] sm:$0xff] %v10633_v36  ;;  %v3091_v11 = vrot.slane %v3069_v37, %v9798_v34  ;;  %v10638_v56 = vrot.slane %v7711_v44, %v9798_v34  ;;  %v3084_v5 = vrot.slane %v3068_v55, %v9798_v34  ;;  %v4622_v12 = vcombine.high %v2142_v58, %v2142_v58 }
 0x225   :  { %8620 = vperm.xlu1 %9270, %v7463_v60   ;;  %v4629_v31 = vrot.slane %v2142_v58, %v9798_v34  ;;  %v3098_v53 = vrot.slane %v3070_v52, %v9798_v34  ;;  %v3103_v26 = vcombine.high %v2111_v29, %v2111_v29  ;;  %v10644_v20 = vrot.slane %v9232_v40, %v9798_v34 }
 0x226   :  { %v6190_v8 = vcombine.low %v3077_v22, %v3091_v11  ;;  %v9169_v42 = vcombine.high %v3077_v22, %v3091_v11  ;;  %v4636_v17 = vrot.slane %v4622_v12, %v9798_v34  ;;  %v3110_v44 = vrot.slane %v2111_v29, %v9798_v34 }
 0x227   :  { %v4637_v19 = vcombine.high %v4629_v31, %v4629_v31  ;;  %v6192_v37 = vcombine.low %v3084_v5, %v3098_v53  ;;  %v4645_v55 = vrot.slane %v4629_v31, %v9798_v34  ;;  %v6026_v60 = vcombine.low %v10426_v51, %v10429_v1 }
 0x228   :  { %v6027_v58 = vcombine.low %v10436_v10, %v10439_v41  ;;  %v9170_v52 = vcombine.high %v3084_v5, %v3098_v53  ;;  %v4638_v22 = vcombine.high %v4636_v17, %v4636_v17  ;;  %v3117_v40 = vrot.slane %v3103_v26, %v9798_v34  ;;  %v1655_v41 = vpop.xlane.xlu0 %1654  ;;  %v1562_v5 = vpop.xlane.xlu1 %1561 }
 0x229   :  { %v4659_v11 = vrot.slane %v4637_v19, %v9798_v34  ;;  %v10656_v12 = vrot.slane %v6190_v8, %v9798_v34  ;;  %v10659_v29 = vrot.slane %v9169_v42, %v9798_v34  ;;  %v4652_v31 = vrot.slane %v4636_v17, %v9798_v34 }
 0x22a   :  { %v3118_v0 = vcombine.high %v3110_v44, %v3110_v44  ;;  %v4666_v51 = vrot.slane %v4638_v22, %v9798_v34  ;;  %v3119_v10 = vcombine.high %v3117_v40, %v3117_v40  ;;  %v10666_v26 = vrot.slane %v6192_v37, %v9798_v34 }
 0x22b   :  { %v7758_v1 = vcombine.low %v4645_v55, %v4659_v11  ;;  %v9233_v16 = vcombine.high %v4645_v55, %v4659_v11  ;;  %v3126_v8 = vrot.slane %v3110_v44, %v9798_v34  ;;  %v10677_v22 = vrot.slane %v9170_v52, %v9798_v34 }
 0x22c   :  { %v3140_v42 = vrot.slane %v3118_v0, %v9798_v34  ;;  %v7760_v19 = vcombine.low %v4652_v31, %v4666_v51  ;;  %v9234_v17 = vcombine.high %v4652_v31, %v4666_v51  ;;  %v10680_v11 = vrot.slane %v3119_v10, %v9798_v34  ;;  %v11990_v0 = vld [vmem:[#allocation35_spill] sm:$0xff] }
 0x22d   :  { %v10671_v45 = vrot.slane %v7758_v1, %v9798_v34  ;;  %v10674_v55 = vrot.slane %v9233_v16, %v9798_v34  ;;  %v6041_v53 = vrot.slane %v6027_v58, %v9798_v34  ;;  %v10686_v44 = vrot.slane %v3117_v40, %v9798_v34 }
 0x22e   :  { %v6239_v37 = vcombine.low %v3126_v8, %v3140_v42  ;;  %v6034_v31 = vrot.slane %v6026_v60, %v9798_v34  ;;  %v7496_v16 = vcombine.low %v10352_v23, %v10355_v63  ;;  %v10692_v52 = vrot.slane %v7760_v19, %v9798_v34  ;;  %v1658_v23 = vpop.xlane.xlu1 %1657  ;;  %v1565_v63 = vpop.xlane.xlu0 %1564 }
 0x22f   :  { %v10695_v51 = vrot.slane %v9234_v17, %v9798_v34  ;;  %v9171_v1 = vcombine.high %v3126_v8, %v3140_v42  ;;  %v6241_v10 = vcombine.low %v10686_v44, %v10680_v11  ;;  %v7497_v60 = vcombine.low %v10362_v30, %v10365_v27  ;;  %v11991_v8 = vld [vmem:[#allocation13_spill] sm:$0xff] }
 0x230   :  { %v6042_v40 = vcombine.low %v6034_v31, %v6041_v53  ;;  %v2079_v57 = vadd.f32 %v11990_v0, %v1655_v41  ;;  %v9172_v19 = vcombine.high %v10686_v44, %v10680_v11  ;;  %v10707_v17 = vrot.slane %v6239_v37, %v9798_v34  ;;  %v11992_v37 = vld [vmem:[#allocation36_spill] sm:$0xff]  ;;  %v11993_v44 = vld [vmem:[#allocation14_spill] sm:$0xff] }
 0x231   :  { %v7504_v58 = vrot.slane %v7496_v16, %v9798_v34  ;;  %v2048_v42 = vadd.f32 %v11991_v8, %v1562_v5  ;;  %v7511_v53 = vrot.slane %v7497_v60, %v9798_v34  ;;  %v5977_v30 = vcombine.low %v10389_v15, %v10395_v9 }
 0x232   :  { %8533 = vperm.xlu0 %9269, %v6042_v40   ;;  %v2143_v31 = vmax.f32 %v2079_v57, 0.0  ;;  %v5978_v27 = vcombine.low %v10408_v43, %v10412_v49  ;;  %v10717_v41 = vrot.slane %v9171_v1, %v9798_v34  ;;  %v2080_v0 = vadd.f32 %v11992_v37, %v1658_v23 }
 0x233   :  { %v2112_v11 = vmax.f32 %v2048_v42, 0.0  ;;  %v2049_v16 = vadd.f32 %v11993_v44, %v1565_v63  ;;  %v7512_v14 = vcombine.low %v7504_v58, %v7511_v53  ;;  %v5985_v57 = vrot.slane %v5977_v30, %v9798_v34 }
 0x234   :  { %v4671_v5 = vcombine.high %v2143_v31, %v2143_v31  ;;  %v4678_v40 = vrot.slane %v2143_v31, %v9798_v34  ;;  %v5992_v9 = vrot.slane %v5978_v27, %v9798_v34  ;;  %v2144_v43 = vmax.f32 %v2080_v0, 0.0 }
 0x235   :  { %v3152_v60 = vcombine.high %v2112_v11, %v2112_v11  ;;  %v3159_v15 = vrot.slane %v2112_v11, %v9798_v34  ;;  %8623 = vperm.xlu1 %9270, %v7512_v14   ;;  %v2113_v8 = vmax.f32 %v2049_v16, 0.0 }
 0x236   :  { %v4685_v49 = vrot.slane %v4671_v5, %v9798_v34  ;;  %v4686_v1 = vcombine.high %v4678_v40, %v4678_v40  ;;  %v4694_v23 = vrot.slane %v4678_v40, %v9798_v34  ;;  %v5993_v53 = vcombine.low %v5985_v57, %v5992_v9 }
 0x237   :  { %v3166_v58 = vrot.slane %v3152_v60, %v9798_v34  ;;  %v3167_v63 = vcombine.high %v3159_v15, %v3159_v15  ;;  %v3175_v42 = vrot.slane %v3159_v15, %v9798_v34  ;;  %v4720_v27 = vcombine.high %v2144_v43, %v2144_v43 }
 0x238   :  { %v4687_v31 = vcombine.high %v4685_v49, %v4685_v49  ;;  %v4701_v30 = vrot.slane %v4685_v49, %v9798_v34  ;;  %v4708_v11 = vrot.slane %v4686_v1, %v9798_v34  ;;  %v4727_v44 = vrot.slane %v2144_v43, %v9798_v34 }
 0x239   :  { %v3168_v37 = vcombine.high %v3166_v58, %v3166_v58  ;;  %v3182_v14 = vrot.slane %v3166_v58, %v9798_v34  ;;  %v3189_v0 = vrot.slane %v3167_v63, %v9798_v34  ;;  %8530 = vperm.xlu1 %9270, %v5993_v53   ;;  %v4734_v57 = vrot.slane %v4720_v27, %v9798_v34 }
 0x23a   :  { %v4715_v16 = vrot.slane %v4687_v31, %v9798_v34  ;;  %v7807_v5 = vcombine.low %v4694_v23, %v4708_v11  ;;  %v9235_v40 = vcombine.high %v4694_v23, %v4708_v11  ;;  %v4735_v49 = vcombine.high %v4727_v44, %v4727_v44 }
 0x23b   :  { %v3196_v60 = vrot.slane %v3168_v37, %v9798_v34  ;;  %v6288_v15 = vcombine.low %v3175_v42, %v3189_v0  ;;  %v9173_v9 = vcombine.high %v3175_v42, %v3189_v0  ;;  %v10744_v43 = vrot.slane %v6241_v10, %v9798_v34 }
 0x23c   :  { %v7809_v1 = vcombine.low %v4701_v30, %v4715_v16  ;;  %v9236_v36 = vcombine.high %v4701_v30, %v4715_v16  ;;  %v10738_v58 = vrot.slane %v7807_v5, %v9798_v34  ;;  %v10741_v63 = vrot.slane %v9235_v40, %v9798_v34 }
 0x23d   :  { %v10747_v23 = vrot.slane %v9172_v19, %v9798_v34  ;;  %v6290_v53 = vcombine.low %v3182_v14, %v3196_v60  ;;  %v9174_v31 = vcombine.high %v3182_v14, %v3196_v60  ;;  %v10752_v11 = vrot.slane %v6288_v15, %v9798_v34  ;;  %v1661_v19 = vpop.xlane.xlu0 %1660 }
 0x23e   :  { %11994 = vst [vmem:[#allocation28_spill] sm:$0xff] %v10738_v58  ;;  %11995 = vst [vmem:[#allocation6_spill] sm:$0xff] %v10741_v63  ;;  %v10755_v30 = vrot.slane %v9173_v9, %v9798_v34  ;;  %v4736_v27 = vcombine.high %v4734_v57, %v4734_v57  ;;  %v10758_v37 = vrot.slane %v7809_v1, %v9798_v34 }
 0x23f   :  { %v10761_v10 = vrot.slane %v9236_v36, %v9798_v34  ;;  %v6124_v14 = vcombine.low %v10557_v33, %v10582_v39  ;;  %v4743_v0 = vrot.slane %v4727_v44, %v9798_v34  ;;  %v4757_v16 = vrot.slane %v4735_v49, %v9798_v34  ;;  %v11999_v33 = vld [vmem:[#allocation15_spill] sm:$0xff] }
 0x240   :  { %11996 = vst [vmem:[#allocation29_spill] sm:$0xff] %v10758_v37  ;;  %v4764_v5 = vrot.slane %v4736_v27, %v9798_v34  ;;  %v3201_v40 = vcombine.high %v2113_v8, %v2113_v8  ;;  %v10771_v60 = vrot.slane %v6290_v53, %v9798_v34  ;;  %v10774_v15 = vrot.slane %v9174_v31, %v9798_v34 }
 0x241   :  { %11997 = vst [vmem:[#allocation7_spill] sm:$0xff] %v10761_v10  ;;  %v3208_v36 = vrot.slane %v2113_v8, %v9798_v34  ;;  %v6125_v9 = vcombine.low %v10588_v50, %v10591_v18  ;;  %v4750_v39 = vrot.slane %v4734_v57, %v9798_v34  ;;  %v7856_v44 = vcombine.low %v4743_v0, %v4757_v16  ;;  %v1568_v18 = vpop.xlane.xlu1 %1567 }
 0x242   :  { %v9237_v49 = vcombine.high %v4743_v0, %v4757_v16  ;;  %v3215_v1 = vrot.slane %v3201_v40, %v9798_v34  ;;  %v6132_v53 = vrot.slane %v6124_v14, %v9798_v34  ;;  %v7545_v50 = vcombine.low %v10416_v24, %v10419_v32 }
 0x243   :  { %v3216_v27 = vcombine.high %v3208_v36, %v3208_v36  ;;  %v6139_v31 = vrot.slane %v6125_v9, %v9798_v34  ;;  %v7858_v42 = vcombine.low %v4750_v39, %v4764_v5  ;;  %v9238_v8 = vcombine.high %v4750_v39, %v4764_v5 }
 0x244   :  { %v3224_v63 = vrot.slane %v3208_v36, %v9798_v34  ;;  %v10789_v57 = vrot.slane %v7856_v44, %v9798_v34  ;;  %v3217_v0 = vcombine.high %v3215_v1, %v3215_v1  ;;  %v10793_v14 = vrot.slane %v9237_v49, %v9798_v34  ;;  %v11998_v36 = vld [vmem:[#allocation37_spill] sm:$0xff] }
 0x245   :  { %v3238_v16 = vrot.slane %v3216_v27, %v9798_v34  ;;  %v6140_v40 = vcombine.low %v6132_v53, %v6139_v31  ;;  %v10796_v9 = vrot.slane %v3215_v1, %v9798_v34  ;;  %v7546_v5 = vcombine.low %v10423_v2, %v10433_v4 }
 0x246   :  { %v2081_v39 = vadd.f32 %v11998_v36, %v1661_v19  ;;  %v3245_v24 = vrot.slane %v3217_v0, %v9798_v34  ;;  %v2050_v58 = vadd.f32 %v11999_v33, %v1568_v18  ;;  %v7553_v27 = vrot.slane %v7545_v50, %v9798_v34  ;;  %v1664_v0 = vpop.xlane.xlu1 %1663 }
 0x247   :  { %v6337_v32 = vcombine.low %v3224_v63, %v3238_v16  ;;  %v9175_v44 = vcombine.high %v3224_v63, %v3238_v16  ;;  %8539 = vperm.xlu0 %9269, %v6140_v40   ;;  %v7560_v49 = vrot.slane %v7546_v5, %v9798_v34  ;;  %v7594_v1 = vcombine.low %v10448_v59, %v10460_v61  ;;  %v1571_v16 = vpop.xlane.xlu0 %1570 }
 0x248   :  { %v2145_v53 = vmax.f32 %v2081_v39, 0.0  ;;  %v10808_v31 = vrot.slane %v7858_v42, %v9798_v34  ;;  %v10811_v2 = vrot.slane %v9238_v8, %v9798_v34  ;;  %v6339_v4 = vcombine.low %v10796_v9, %v3245_v24 }
 0x249   :  { %v7595_v63 = vcombine.low %v10466_v21, %v10474_v3  ;;  %v7561_v19 = vcombine.low %v7553_v27, %v7560_v49  ;;  %v2114_v18 = vmax.f32 %v2050_v58, 0.0  ;;  %v9176_v59 = vcombine.high %v10796_v9, %v3245_v24  ;;  %v12000_v9 = vld [vmem:[#allocation38_spill] sm:$0xff]  ;;  %v12001_v24 = vld [vmem:[#allocation16_spill] sm:$0xff] }
 0x24a   :  { %v4769_v33 = vcombine.high %v2145_v53, %v2145_v53  ;;  %v4776_v50 = vrot.slane %v2145_v53, %v9798_v34  ;;  %v10819_v61 = vrot.slane %v6337_v32, %v9798_v34  ;;  %v10822_v42 = vrot.slane %v9175_v44, %v9798_v34 }
 0x24b   :  { %v7602_v8 = vrot.slane %v7594_v1, %v9798_v34  ;;  %8626 = vperm.xlu1 %9270, %v7561_v19   ;;  %v3250_v5 = vcombine.high %v2114_v18, %v2114_v18  ;;  %v3257_v58 = vrot.slane %v2114_v18, %v9798_v34  ;;  %v7609_v36 = vrot.slane %v7595_v63, %v9798_v34 }
 0x24c   :  { %v4783_v21 = vrot.slane %v4769_v33, %v9798_v34  ;;  %v4784_v3 = vcombine.high %v4776_v50, %v4776_v50  ;;  %v4792_v40 = vrot.slane %v4776_v50, %v9798_v34  ;;  %v2082_v39 = vadd.f32 %v12000_v9, %v1664_v0 }
 0x24d   :  { %v2051_v32 = vadd.f32 %v12001_v24, %v1571_v16  ;;  %v3264_v53 = vrot.slane %v3250_v5, %v9798_v34  ;;  %v3265_v1 = vcombine.high %v3257_v58, %v3257_v58  ;;  %v3273_v19 = vrot.slane %v3257_v58, %v9798_v34 }
 0x24e   :  { %v4785_v27 = vcombine.high %v4783_v21, %v4783_v21  ;;  %v4799_v44 = vrot.slane %v4783_v21, %v9798_v34  ;;  %v4806_v49 = vrot.slane %v4784_v3, %v9798_v34  ;;  %v7610_v33 = vcombine.low %v7602_v8, %v7609_v36 }
 0x24f   :  { %v2146_v50 = vmax.f32 %v2082_v39, 0.0  ;;  %v3266_v10 = vcombine.high %v3264_v53, %v3264_v53  ;;  %v3280_v0 = vrot.slane %v3264_v53, %v9798_v34  ;;  %v3287_v16 = vrot.slane %v3265_v1, %v9798_v34 }
 0x250   :  { %v4813_v18 = vrot.slane %v4785_v27, %v9798_v34  ;;  %v7905_v37 = vcombine.low %v4792_v40, %v4806_v49  ;;  %v9239_v63 = vcombine.high %v4792_v40, %v4806_v49  ;;  %8629 = vperm.xlu1 %9270, %v7610_v33   ;;  %v10850_v49 = vrot.slane %v6339_v4, %v9798_v34 }
 0x251   :  { %v4818_v21 = vcombine.high %v2146_v50, %v2146_v50  ;;  %v4825_v3 = vrot.slane %v2146_v50, %v9798_v34  ;;  %v3294_v58 = vrot.slane %v3266_v10, %v9798_v34  ;;  %v6386_v40 = vcombine.low %v3273_v19, %v3287_v16 }
 0x252   :  { %v7907_v9 = vcombine.low %v4799_v44, %v4813_v18  ;;  %v9240_v5 = vcombine.high %v4799_v44, %v4813_v18  ;;  %v10840_v24 = vrot.slane %v7905_v37, %v9798_v34  ;;  %v10843_v8 = vrot.slane %v9239_v63, %v9798_v34 }
 0x253   :  { %v9177_v36 = vcombine.high %v3273_v19, %v3287_v16  ;;  %v4832_v39 = vrot.slane %v4818_v21, %v9798_v34  ;;  %v10853_v44 = vrot.slane %v9176_v59, %v9798_v34  ;;  %v4833_v37 = vcombine.high %v4825_v3, %v4825_v3 }
 0x254   :  { %12002 = vst [vmem:[#allocation30_spill] sm:$0xff] %v10840_v24  ;;  %12003 = vst [vmem:[#allocation8_spill] sm:$0xff] %v10843_v8  ;;  %v6388_v1 = vcombine.low %v3280_v0, %v3294_v58  ;;  %v9178_v33 = vcombine.high %v3280_v0, %v3294_v58  ;;  %v10858_v10 = vrot.slane %v6386_v40, %v9798_v34  ;;  %v2115_v16 = vmax.f32 %v2051_v32, 0.0 }
 0x255   :  { %v10861_v19 = vrot.slane %v9177_v36, %v9798_v34  ;;  %v4834_v50 = vcombine.high %v4832_v39, %v4832_v39  ;;  %v4841_v18 = vrot.slane %v4825_v3, %v9798_v34  ;;  %v4855_v4 = vrot.slane %v4833_v37, %v9798_v34 }
 0x256   :  { %v10866_v59 = vrot.slane %v7907_v9, %v9798_v34  ;;  %v10869_v63 = vrot.slane %v9240_v5, %v9798_v34  ;;  %v6223_v36 = vcombine.low %v10666_v26, %v10677_v22  ;;  %v10877_v3 = vrot.slane %v6388_v1, %v9798_v34 }
 0x257   :  { %v4862_v21 = vrot.slane %v4834_v50, %v9798_v34  ;;  %v7954_v58 = vcombine.low %v4841_v18, %v4855_v4  ;;  %v9241_v40 = vcombine.high %v4841_v18, %v4855_v4  ;;  %v4848_v9 = vrot.slane %v4832_v39, %v9798_v34 }
 0x258   :  { %12004 = vst [vmem:[#allocation31_spill] sm:$0xff] %v10866_v59  ;;  %v3299_v37 = vcombine.high %v2115_v16, %v2115_v16  ;;  %v3306_v5 = vrot.slane %v2115_v16, %v9798_v34  ;;  %v10882_v53 = vrot.slane %v9178_v33, %v9798_v34  ;;  %v12005_v50 = vcombine.low %v10656_v12, %v10659_v29  ;;  %v1667_v16 = vpop.xlane.xlu0 %1666  ;;  %v1574_v33 = vpop.xlane.xlu1 %1573 }
 0x259   :  { %v6075_v26 = vcombine.low %v10508_v28, %v10511_v48  ;;  %v7956_v22 = vcombine.low %v4848_v9, %v4862_v21  ;;  %v6237_v4 = vrot.slane %v6223_v36, %v9798_v34  ;;  %v9242_v0 = vcombine.high %v4848_v9, %v4862_v21  ;;  %v12006_v21 = vld [vmem:[#allocation39_spill] sm:$0xff] }
 0x25a   :  { %v6230_v18 = vrot.slane %v12005_v50, %v9798_v34  ;;  %v3313_v39 = vrot.slane %v3299_v37, %v9798_v34  ;;  %v3314_v1 = vcombine.high %v3306_v5, %v3306_v5  ;;  %v10895_v27 = vrot.slane %v7954_v58, %v9798_v34  ;;  %v12007_v58 = vld [vmem:[#allocation17_spill] sm:$0xff] }
 0x25b   :  { %v10898_v32 = vrot.slane %v9241_v40, %v9798_v34  ;;  %v6076_v12 = vcombine.low %v10514_v35, %v10517_v7  ;;  %v3322_v28 = vrot.slane %v3306_v5, %v9798_v34  ;;  %v6083_v36 = vrot.slane %v6075_v26, %v9798_v34 }
 0x25c   :  { %v3315_v29 = vcombine.high %v3313_v39, %v3313_v39  ;;  %v3336_v48 = vrot.slane %v3314_v1, %v9798_v34  ;;  %v6238_v37 = vcombine.low %v6230_v18, %v6237_v4  ;;  %v2083_v9 = vadd.f32 %v12006_v21, %v1667_v16  ;;  %v12011_v16 = vld [vmem:[#allocation40_spill] sm:$0xff] }
 0x25d   :  { %v6090_v50 = vrot.slane %v6076_v12, %v9798_v34  ;;  %v2052_v8 = vadd.f32 %v12007_v58, %v1574_v33  ;;  %v10909_v40 = vrot.slane %v7956_v22, %v9798_v34  ;;  %v7791_v7 = vcombine.low %v10692_v52, %v10695_v51  ;;  %v1670_v58 = vpop.xlane.xlu1 %1669 }
 0x25e   :  { %v3343_v24 = vrot.slane %v3315_v29, %v9798_v34  ;;  %v6435_v35 = vcombine.low %v3322_v28, %v3336_v48  ;;  %8545 = vperm.xlu0 %9269, %v6238_v37   ;;  %v9179_v5 = vcombine.high %v3322_v28, %v3336_v48  ;;  %v2147_v1 = vmax.f32 %v2083_v9, 0.0 }
 0x25f   :  { %v6091_v18 = vcombine.low %v6083_v36, %v6090_v50  ;;  %v2116_v26 = vmax.f32 %v2052_v8, 0.0  ;;  %v10915_v4 = vrot.slane %v9242_v0, %v9798_v34  ;;  %v3329_v22 = vrot.slane %v3313_v39, %v9798_v34 }
 0x260   :  { %v12008_v33 = vcombine.low %v10671_v45, %v10674_v55  ;;  %v4867_v29 = vcombine.high %v2147_v1, %v2147_v1  ;;  %v4874_v52 = vrot.slane %v2147_v1, %v9798_v34  ;;  %v10927_v48 = vrot.slane %v6435_v35, %v9798_v34  ;;  %v1577_v1 = vpop.xlane.xlu0 %1576 }
 0x261   :  { %8536 = vperm.xlu1 %9270, %v6091_v18   ;;  %v3348_v51 = vcombine.high %v2116_v26, %v2116_v26  ;;  %v3355_v8 = vrot.slane %v2116_v26, %v9798_v34  ;;  %v6437_v28 = vcombine.low %v3329_v22, %v3343_v24  ;;  %v9180_v0 = vcombine.high %v3329_v22, %v3343_v24 }
 0x262   :  { %v7798_v12 = vrot.slane %v12008_v33, %v9798_v34  ;;  %v7805_v37 = vrot.slane %v7791_v7, %v9798_v34  ;;  %v10931_v39 = vrot.slane %v9179_v5, %v9798_v34  ;;  %v4881_v45 = vrot.slane %v4867_v29, %v9798_v34  ;;  %v12009_v33 = vld [vmem:[#allocation26_spill] sm:$0xff] }
 0x263   :  { %v4882_v55 = vcombine.high %v4874_v52, %v4874_v52  ;;  %v3362_v36 = vrot.slane %v3348_v51, %v9798_v34  ;;  %v4890_v50 = vrot.slane %v4874_v52, %v9798_v34  ;;  %v3363_v21 = vcombine.high %v3355_v8, %v3355_v8 }
 0x264   :  { %v7806_v9 = vcombine.low %v7798_v12, %v7805_v37  ;;  %v7644_v24 = vcombine.low %v10528_v62, %v10531_v47  ;;  %v4883_v35 = vcombine.high %v4881_v45, %v4881_v45  ;;  %v3371_v5 = vrot.slane %v3355_v8, %v9798_v34 }
 0x265   :  { %v4904_v18 = vrot.slane %v4882_v55, %v9798_v34  ;;  %v3364_v7 = vcombine.high %v3362_v36, %v3362_v36  ;;  %v4897_v26 = vrot.slane %v4881_v45, %v9798_v34  ;;  %v3385_v22 = vrot.slane %v3363_v21, %v9798_v34 }
 0x266   :  { %8641 = vperm.xlu0 %9269, %v7806_v9   ;;  %v12010_v12 = vcombine.low %v10502_v25, %v12009_v33  ;;  %v7658_v62 = vrot.slane %v7644_v24, %v9798_v34  ;;  %v4911_v47 = vrot.slane %v4883_v35, %v9798_v34  ;;  %v2084_v21 = vadd.f32 %v12011_v16, %v1670_v58  ;;  %v10969_v16 = vpop.xlane.xlu1 %1579 }
 0x267   :  { %v8003_v52 = vcombine.low %v4890_v50, %v4904_v18  ;;  %v9243_v51 = vcombine.high %v4890_v50, %v4904_v18  ;;  %v10949_v37 = vrot.slane %v3364_v7, %v9798_v34  ;;  %v6484_v8 = vcombine.low %v3371_v5, %v3385_v22  ;;  %v1673_v7 = vpop.xlane.xlu0 %1672 }
 0x268   :  { %v7651_v29 = vrot.slane %v12010_v12, %v9798_v34  ;;  %v9181_v55 = vcombine.high %v3371_v5, %v3385_v22  ;;  %v10953_v9 = vrot.slane %v6437_v28, %v9798_v34  ;;  %v8005_v59 = vcombine.low %v4897_v26, %v4911_v47  ;;  %v12012_v12 = vld [vmem:[#allocation18_spill] sm:$0xff] }
 0x269   :  { %v9244_v25 = vcombine.high %v4897_v26, %v4911_v47  ;;  %v10956_v33 = vrot.slane %v3362_v36, %v9798_v34  ;;  %v10959_v24 = vrot.slane %v9180_v0, %v9798_v34  ;;  %v10964_v35 = vrot.slane %v8003_v52, %v9798_v34 }
 0x26a   :  { %v7659_v45 = vcombine.low %v7651_v29, %v7658_v62  ;;  %v10967_v18 = vrot.slane %v9243_v51, %v9798_v34  ;;  %v10976_v0 = vrot.slane %v6484_v8, %v9798_v34  ;;  %v2148_v58 = vmax.f32 %v2084_v21, 0.0 }
 0x26b   :  { %v6486_v28 = vcombine.low %v10956_v33, %v10949_v37  ;;  %v9182_v36 = vcombine.high %v10956_v33, %v10949_v37  ;;  %v10979_v5 = vrot.slane %v8005_v59, %v9798_v34  ;;  %v10982_v26 = vrot.slane %v9244_v25, %v9798_v34 }
 0x26c   :  { %8632 = vperm.xlu1 %9270, %v7659_v45   ;;  %v10985_v22 = vrot.slane %v9181_v55, %v9798_v34  ;;  %v2053_v29 = vadd.f32 %v12012_v12, %v1577_v1  ;;  %v4916_v62 = vcombine.high %v2148_v58, %v2148_v58  ;;  %v4923_v47 = vrot.slane %v2148_v58, %v9798_v34  ;;  %v12015_v45 = vld [vmem:[#allocation41_spill] sm:$0xff] }
 0x26d   :  { %v6321_v52 = vcombine.low %v10771_v60, %v10774_v15  ;;  %v12013_v51 = vcombine.low %v10752_v11, %v10755_v30  ;;  %v6174_v8 = vcombine.low %v10617_v46, %v10622_v38  ;;  %v12014_v55 = vcombine.low %v10595_v6, %v10598_v54  ;;  %v11007_v46 = vpop.xlane.xlu1 %1675 }
 0x26e   :  { %v2117_v37 = vmax.f32 %v2053_v29, 0.0  ;;  %v2085_v21 = vadd.f32 %v12015_v45, %v1673_v7  ;;  %v4930_v25 = vrot.slane %v4916_v62, %v9798_v34  ;;  %v4931_v33 = vcombine.high %v4923_v47, %v4923_v47 }
 0x26f   :  { %v6328_v59 = vrot.slane %v12013_v51, %v9798_v34  ;;  %v6181_v1 = vrot.slane %v12014_v55, %v9798_v34  ;;  %v4939_v60 = vrot.slane %v4923_v47, %v9798_v34  ;;  %v6335_v15 = vrot.slane %v6321_v52, %v9798_v34 }
 0x270   :  { %v3397_v11 = vcombine.high %v2117_v37, %v2117_v37  ;;  %v3404_v30 = vrot.slane %v2117_v37, %v9798_v34  ;;  %v6188_v58 = vrot.slane %v6174_v8, %v9798_v34  ;;  %v2149_v38 = vmax.f32 %v2085_v21, 0.0 }
 0x271   :  { %v4932_v12 = vcombine.high %v4930_v25, %v4930_v25  ;;  %v4946_v6 = vrot.slane %v4930_v25, %v9798_v34  ;;  %v4953_v54 = vrot.slane %v4931_v33, %v9798_v34  ;;  %v6336_v7 = vcombine.low %v6328_v59, %v6335_v15 }
 0x272   :  { %v3411_v29 = vrot.slane %v3397_v11, %v9798_v34  ;;  %v3412_v62 = vcombine.high %v3404_v30, %v3404_v30  ;;  %v3420_v47 = vrot.slane %v3404_v30, %v9798_v34  ;;  %v6189_v52 = vcombine.low %v6181_v1, %v6188_v58 }
 0x273   :  { %v4960_v51 = vrot.slane %v4932_v12, %v9798_v34  ;;  %v8052_v37 = vcombine.low %v4939_v60, %v4953_v54  ;;  %v9245_v55 = vcombine.high %v4939_v60, %v4953_v54  ;;  %8551 = vperm.xlu0 %9269, %v6336_v7   ;;  %v4965_v8 = vcombine.high %v2149_v38, %v2149_v38  ;;  %v11025_v54 = vpop.xlane.xlu1 %1585 }
 0x274   :  { %v3413_v45 = vcombine.high %v3411_v29, %v3411_v29  ;;  %v3427_v21 = vrot.slane %v3411_v29, %v9798_v34  ;;  %v3434_v25 = vrot.slane %v3412_v62, %v9798_v34  ;;  %8542 = vperm.xlu1 %9270, %v6189_v52   ;;  %v4972_v59 = vrot.slane %v2149_v38, %v9798_v34 }
 0x275   :  { %v8054_v33 = vcombine.low %v4946_v6, %v4960_v51  ;;  %v9246_v15 = vcombine.high %v4946_v6, %v4960_v51  ;;  %v11018_v11 = vrot.slane %v8052_v37, %v9798_v34  ;;  %v11021_v1 = vrot.slane %v9245_v55, %v9798_v34 }
 0x276   :  { %v3441_v60 = vrot.slane %v3413_v45, %v9798_v34  ;;  %v6533_v30 = vcombine.low %v3420_v47, %v3434_v25  ;;  %v9183_v58 = vcombine.high %v3420_v47, %v3434_v25  ;;  %v4979_v12 = vrot.slane %v4965_v8, %v9798_v34  ;;  %v12018_v25 = vld [vmem:[#allocation19_spill] sm:$0xff] }
 0x277   :  { %v11030_v38 = vrot.slane %v6486_v28, %v9798_v34  ;;  %v11033_v6 = vrot.slane %v9182_v36, %v9798_v34  ;;  %v4980_v29 = vcombine.high %v4972_v59, %v4972_v59  ;;  %v4988_v8 = vrot.slane %v4972_v59, %v9798_v34 }
 0x278   :  { %v6535_v52 = vcombine.low %v3427_v21, %v3441_v60  ;;  %v9184_v51 = vcombine.high %v3427_v21, %v3441_v60  ;;  %v11038_v47 = vrot.slane %v6533_v30, %v9798_v34  ;;  %v11041_v37 = vrot.slane %v9183_v58, %v9798_v34  ;;  %v11064_v21 = vpop.xlane.xlu1 %1681 }
 0x279   :  { %v4981_v55 = vcombine.high %v4979_v12, %v4979_v12  ;;  %v5002_v28 = vrot.slane %v4980_v29, %v9798_v34  ;;  %v11046_v36 = vrot.slane %v8054_v33, %v9798_v34  ;;  %v11049_v45 = vrot.slane %v9246_v15, %v9798_v34 }
 0x27a   :  { %12016 = vst [vmem:[#allocation9_spill] sm:$0xff] %v11038_v47  ;;  %12017 = vst [vmem:[#allocation32_spill] sm:$0xff] %v11041_v37  ;;  %v2054_v60 = vadd.f32 %v12018_v25, %v10969_v16  ;;  %v4995_v30 = vrot.slane %v4979_v12, %v9798_v34  ;;  %v7889_v59 = vcombine.low %v10808_v31, %v10811_v2 }
 0x27b   :  { %v5009_v58 = vrot.slane %v4981_v55, %v9798_v34  ;;  %v8101_v7 = vcombine.low %v4988_v8, %v5002_v28  ;;  %v11060_v33 = vrot.slane %v6535_v52, %v9798_v34  ;;  %v9247_v29 = vcombine.high %v4988_v8, %v5002_v28 }
 0x27c   :  { %v2118_v15 = vmax.f32 %v2054_v60, 0.0  ;;  %v7742_v50 = vcombine.low %v10638_v56, %v10644_v20  ;;  %v11067_v16 = vrot.slane %v9184_v51, %v9798_v34  ;;  %v12019_v31 = vcombine.low %v10789_v57, %v10793_v14  ;;  %v1583_v20 = vpop.xlane.xlu0 %1582  ;;  %v12021_v60 = vld [vmem:[#allocation49_spill] sm:$0xff]  ;;  %v12023_v57 = vld [vmem:[#allocation42_spill] sm:$0xff] }
 0x27d   :  { %v8103_v55 = vcombine.low %v4995_v30, %v5009_v58  ;;  %v7903_v28 = vrot.slane %v7889_v59, %v9798_v34  ;;  %v9248_v25 = vcombine.high %v4995_v30, %v5009_v58  ;;  %v11079_v51 = vrot.slane %v8101_v7, %v9798_v34  ;;  %v12025_v58 = vld [vmem:[#allocation20_spill] sm:$0xff] }
 0x27e   :  { %v7896_v2 = vrot.slane %v12019_v31, %v9798_v34  ;;  %v3446_v52 = vcombine.high %v2118_v15, %v2118_v15  ;;  %v3453_v8 = vrot.slane %v2118_v15, %v9798_v34  ;;  %v7756_v56 = vrot.slane %v7742_v50, %v9798_v34 }
 0x27f   :  { %12020 = vst [vmem:[#allocation10_spill] sm:$0xff] %v11079_v51  ;;  %v12022_v12 = vcombine.low %v10630_v13, %v12021_v60  ;;  %v2086_v14 = vadd.f32 %v12023_v57, %v11007_v46  ;;  %v11088_v31 = vrot.slane %v9247_v29, %v9798_v34  ;;  %v2055_v7 = vadd.f32 %v12025_v58, %v1583_v20  ;;  %v11099_v60 = vpop.xlane.xlu1 %1591 }
 0x280   :  { %v3460_v59 = vrot.slane %v3446_v52, %v9798_v34  ;;  %v3461_v15 = vcombine.high %v3453_v8, %v3453_v8  ;;  %v7904_v50 = vcombine.low %v7896_v2, %v7903_v28  ;;  %v6419_v47 = vcombine.low %v10877_v3, %v10882_v53 }
 0x281   :  { %v7749_v62 = vrot.slane %v12022_v12, %v9798_v34  ;;  %12024 = vst [vmem:[#allocation33_spill] sm:$0xff] %v11088_v31  ;;  %v2150_v30 = vmax.f32 %v2086_v14, 0.0  ;;  %v11095_v13 = vrot.slane %v8103_v55, %v9798_v34  ;;  %v3469_v46 = vrot.slane %v3453_v8, %v9798_v34  ;;  %v1679_v31 = vpop.xlane.xlu0 %1678 }
 0x282   :  { %v3462_v12 = vcombine.high %v3460_v59, %v3460_v59  ;;  %v3483_v29 = vrot.slane %v3461_v15, %v9798_v34  ;;  %8647 = vperm.xlu0 %9269, %v7904_v50   ;;  %v11102_v2 = vrot.slane %v9248_v25, %v9798_v34  ;;  %v2119_v28 = vmax.f32 %v2055_v7, 0.0 }
 0x283   :  { %v7757_v37 = vcombine.low %v7749_v62, %v7756_v56  ;;  %12026 = vst [vmem:[#allocation11_spill] sm:$0xff] %v11095_v13  ;;  %v5014_v62 = vcombine.high %v2150_v30, %v2150_v30  ;;  %v5021_v52 = vrot.slane %v2150_v30, %v9798_v34  ;;  %v3476_v53 = vrot.slane %v3460_v59, %v9798_v34 }
 0x284   :  { %12027 = vst [vmem:[#allocation34_spill] sm:$0xff] %v11102_v2  ;;  %v3490_v3 = vrot.slane %v3462_v12, %v9798_v34  ;;  %v6582_v55 = vcombine.low %v3469_v46, %v3483_v29  ;;  %v9185_v56 = vcombine.high %v3469_v46, %v3483_v29  ;;  %v3495_v57 = vcombine.high %v2119_v28, %v2119_v28 }
 0x285   :  { %8638 = vperm.xlu1 %9270, %v7757_v37   ;;  %v5028_v8 = vrot.slane %v5014_v62, %v9798_v34  ;;  %v5029_v20 = vcombine.high %v5021_v52, %v5021_v52  ;;  %v6433_v14 = vrot.slane %v6419_v47, %v9798_v34  ;;  %v5037_v50 = vrot.slane %v5021_v52, %v9798_v34  ;;  %v11127_v52 = vpop.xlane.xlu1 %1687 }
 0x286   :  { %v6584_v15 = vcombine.low %v3476_v53, %v3490_v3  ;;  %v9186_v25 = vcombine.high %v3476_v53, %v3490_v3  ;;  %v11110_v37 = vrot.slane %v6582_v55, %v9798_v34  ;;  %v11114_v30 = vrot.slane %v9185_v56, %v9798_v34 }
 0x287   :  { %v5030_v59 = vcombine.high %v5028_v8, %v5028_v8  ;;  %v5051_v58 = vrot.slane %v5029_v20, %v9798_v34  ;;  %v3502_v7 = vrot.slane %v2119_v28, %v9798_v34  ;;  %v3509_v47 = vrot.slane %v3495_v57, %v9798_v34 }
 0x288   :  { %v12028_v46 = vcombine.low %v10858_v10, %v10861_v19  ;;  %v6272_v62 = vcombine.low %v10744_v43, %v10747_v23  ;;  %v5044_v53 = vrot.slane %v5028_v8, %v9798_v34  ;;  %v11132_v56 = vrot.slane %v6584_v15, %v9798_v34 }
 0x289   :  { %v5058_v3 = vrot.slane %v5030_v59, %v9798_v34  ;;  %v8150_v28 = vcombine.low %v5037_v50, %v5051_v58  ;;  %v3510_v55 = vcombine.high %v3502_v7, %v3502_v7  ;;  %v9249_v20 = vcombine.high %v5037_v50, %v5051_v58 }
 0x28a   :  { %v6426_v29 = vrot.slane %v12028_v46, %v9798_v34  ;;  %v3511_v57 = vcombine.high %v3509_v47, %v3509_v47  ;;  %v11135_v10 = vrot.slane %v9186_v25, %v9798_v34  ;;  %v3518_v19 = vrot.slane %v3502_v7, %v9798_v34  ;;  %v12030_v7 = vld [vmem:[#allocation43_spill] sm:$0xff] }
 0x28b   :  { %v8152_v23 = vcombine.low %v5044_v53, %v5058_v3  ;;  %v9250_v8 = vcombine.high %v5044_v53, %v5058_v3  ;;  %v3532_v59 = vrot.slane %v3510_v55, %v9798_v34  ;;  %v6286_v15 = vrot.slane %v6272_v62, %v9798_v34 }
 0x28c   :  { %v6434_v12 = vcombine.low %v6426_v29, %v6433_v14  ;;  %v11142_v46 = vrot.slane %v3511_v57, %v9798_v34  ;;  %v11146_v14 = vrot.slane %v8150_v28, %v9798_v34  ;;  %v11149_v25 = vrot.slane %v3509_v47, %v9798_v34  ;;  %v11162_v28 = vpop.xlane.xlu1 %1597  ;;  %v12031_v57 = vld [vmem:[#allocation21_spill] sm:$0xff] }
 0x28d   :  { %v12029_v50 = vcombine.low %v10707_v17, %v10717_v41  ;;  %v2087_v29 = vadd.f32 %v12030_v7, %v1679_v31  ;;  %v11157_v53 = vrot.slane %v9249_v20, %v9798_v34  ;;  %v6631_v62 = vcombine.low %v3518_v19, %v3532_v59  ;;  %v12038_v7 = vld [vmem:[#allocation6_spill] sm:$0xff] }
 0x28e   :  { %8557 = vperm.xlu0 %9269, %v6434_v12   ;;  %v11160_v12 = vrot.slane %v8152_v23, %v9798_v34  ;;  %v9187_v3 = vcombine.high %v3518_v19, %v3532_v59  ;;  %v2056_v43 = vadd.f32 %v12031_v57, %v11025_v54  ;;  %v7987_v17 = vcombine.low %v10909_v40, %v10915_v4 }
 0x28f   :  { %v6279_v58 = vrot.slane %v12029_v50, %v9798_v34  ;;  %v2151_v47 = vmax.f32 %v2087_v29, 0.0  ;;  %v11169_v41 = vrot.slane %v9250_v8, %v9798_v34  ;;  %v6633_v31 = vcombine.low %v11149_v25, %v11142_v46  ;;  %v12035_v50 = vld [vmem:[#allocation7_spill] sm:$0xff] }
 0x290   :  { %v9188_v20 = vcombine.high %v11149_v25, %v11142_v46  ;;  %v11176_v23 = vrot.slane %v6631_v62, %v9798_v34  ;;  %v11179_v19 = vrot.slane %v9187_v3, %v9798_v34  ;;  %v2120_v40 = vmax.f32 %v2056_v43, 0.0  ;;  %v12036_v46 = vld [vmem:[#allocation29_spill] sm:$0xff] }
 0x291   :  { %v6287_v55 = vcombine.low %v6279_v58, %v6286_v15  ;;  %v5063_v54 = vcombine.high %v2151_v47, %v2151_v47  ;;  %v5070_v59 = vrot.slane %v2151_v47, %v9798_v34  ;;  %v12034_v4 = vcombine.low %v10895_v27, %v10898_v32  ;;  %v12037_v58 = vld [vmem:[#allocation28_spill] sm:$0xff] }
 0x292   :  { %12032 = vst [vmem:[#allocation12_spill] sm:$0xff] %v11176_v23  ;;  %12033 = vst [vmem:[#allocation35_spill] sm:$0xff] %v11179_v19  ;;  %v8001_v15 = vrot.slane %v7987_v17, %v9798_v34  ;;  %v7840_v25 = vcombine.low %v12036_v46, %v12035_v50  ;;  %v12039_v29 = vcombine.low %v12037_v58, %v12038_v7  ;;  %v12040_v17 = vld [vmem:[#allocation44_spill] sm:$0xff]  ;;  %v11199_v50 = vpop.xlane.xlu1 %1693 }
 0x293   :  { %8548 = vperm.xlu1 %9270, %v6287_v55   ;;  %v7994_v8 = vrot.slane %v12034_v4, %v9798_v34  ;;  %v5077_v3 = vrot.slane %v5063_v54, %v9798_v34  ;;  %v5078_v55 = vcombine.high %v5070_v59, %v5070_v59  ;;  %v5086_v43 = vrot.slane %v5070_v59, %v9798_v34 }
 0x294   :  { %v7847_v62 = vrot.slane %v12039_v29, %v9798_v34  ;;  %v3544_v47 = vcombine.high %v2120_v40, %v2120_v40  ;;  %v3551_v57 = vrot.slane %v2120_v40, %v9798_v34  ;;  %v7854_v32 = vrot.slane %v7840_v25, %v9798_v34 }
 0x295   :  { %v8002_v27 = vcombine.low %v7994_v8, %v8001_v15  ;;  %v2088_v4 = vadd.f32 %v12040_v17, %v11064_v21  ;;  %v5079_v46 = vcombine.high %v5077_v3, %v5077_v3  ;;  %v5093_v58 = vrot.slane %v5077_v3, %v9798_v34 }
 0x296   :  { %v5100_v7 = vrot.slane %v5078_v55, %v9798_v34  ;;  %v3558_v54 = vrot.slane %v3544_v47, %v9798_v34  ;;  %v3559_v29 = vcombine.high %v3551_v57, %v3551_v57  ;;  %v3567_v59 = vrot.slane %v3551_v57, %v9798_v34  ;;  %v11209_v47 = vpop.permute.xlu1 %8590 }
 0x297   :  { %8653 = vperm.xlu0 %9269, %v8002_v27   ;;  %v7855_v40 = vcombine.low %v7847_v62, %v7854_v32  ;;  %v2152_v8 = vmax.f32 %v2088_v4, 0.0  ;;  %v5107_v15 = vrot.slane %v5079_v46, %v9798_v34  ;;  %12041 = vst [vmem:[#allocation13_spill] sm:$0xff] %v11209_v47 }
 0x298   :  { %v8199_v25 = vcombine.low %v5086_v43, %v5100_v7  ;;  %v9251_v51 = vcombine.high %v5086_v43, %v5100_v7  ;;  %v3560_v21 = vcombine.high %v3558_v54, %v3558_v54  ;;  %v3574_v17 = vrot.slane %v3558_v54, %v9798_v34  ;;  %v1589_v7 = vpop.xlane.xlu0 %1588 }
 0x299   :  { %v3581_v13 = vrot.slane %v3559_v29, %v9798_v34  ;;  %8644 = vperm.xlu1 %9270, %v7855_v40   ;;  %v5112_v3 = vcombine.high %v2152_v8, %v2152_v8  ;;  %v5119_v55 = vrot.slane %v2152_v8, %v9798_v34  ;;  %v8201_v2 = vcombine.low %v5093_v58, %v5107_v15 }
 0x29a   :  { %v9252_v57 = vcombine.high %v5093_v58, %v5107_v15  ;;  %v11212_v62 = vrot.slane %v8199_v25, %v9798_v34  ;;  %v11215_v27 = vrot.slane %v9251_v51, %v9798_v34  ;;  %v3588_v43 = vrot.slane %v3560_v21, %v9798_v34  ;;  %v11246_v51 = vpop.permute.xlu1 %8497 }
 0x29b   :  { %v6680_v32 = vcombine.low %v3567_v59, %v3581_v13  ;;  %v9189_v4 = vcombine.high %v3567_v59, %v3581_v13  ;;  %v5126_v46 = vrot.slane %v5112_v3, %v9798_v34  ;;  %v11222_v29 = vrot.slane %v6633_v31, %v9798_v34  ;;  %12043 = vst [vmem:[#allocation36_spill] sm:$0xff] %v11246_v51 }
 0x29c   :  { %v11225_v58 = vrot.slane %v9188_v20, %v9798_v34  ;;  %v5127_v40 = vcombine.high %v5119_v55, %v5119_v55  ;;  %v6682_v8 = vcombine.low %v3574_v17, %v3588_v43  ;;  %v9190_v15 = vcombine.high %v3574_v17, %v3588_v43  ;;  %v12042_v43 = vld [vmem:[#allocation22_spill] sm:$0xff]  ;;  %v1685_v19 = vpop.xlane.xlu0 %1684 }
 0x29d   :  { %v11230_v13 = vrot.slane %v6680_v32, %v9798_v34  ;;  %v11233_v59 = vrot.slane %v9189_v4, %v9798_v34  ;;  %v5128_v25 = vcombine.high %v5126_v46, %v5126_v46  ;;  %v5135_v21 = vrot.slane %v5119_v55, %v9798_v34 }
 0x29e   :  { %v5149_v31 = vrot.slane %v5127_v40, %v9798_v34  ;;  %v11238_v20 = vrot.slane %v8201_v2, %v9798_v34  ;;  %v11241_v3 = vrot.slane %v9252_v57, %v9798_v34  ;;  %v2057_v32 = vadd.f32 %v12042_v43, %v1589_v7 }
 0x29f   :  { %v5142_v4 = vrot.slane %v5126_v46, %v9798_v34  ;;  %v5156_v54 = vrot.slane %v5128_v25, %v9798_v34  ;;  %v6517_v40 = vcombine.low %v11030_v38, %v11033_v6  ;;  %v11253_v2 = vrot.slane %v6682_v8, %v9798_v34  ;;  %v12046_v46 = vld [vmem:[#allocation45_spill] sm:$0xff] }
 0x2a0   :  { %v8248_v55 = vcombine.low %v5135_v21, %v5149_v31  ;;  %v9253_v57 = vcombine.high %v5135_v21, %v5149_v31  ;;  %v2121_v47 = vmax.f32 %v2057_v32, 0.0  ;;  %v6370_v17 = vcombine.low %v10850_v49, %v10853_v44 }
 0x2a1   :  { %v11258_v7 = vrot.slane %v9190_v15, %v9798_v34  ;;  %v8250_v25 = vcombine.low %v5142_v4, %v5156_v54  ;;  %v12044_v38 = vcombine.low %v10976_v0, %v10985_v22  ;;  %v6531_v31 = vrot.slane %v6517_v40, %v9798_v34 }
 0x2a2   :  { %v3593_v8 = vcombine.high %v2121_v47, %v2121_v47  ;;  %v3600_v21 = vrot.slane %v2121_v47, %v9798_v34  ;;  %v6384_v49 = vrot.slane %v6370_v17, %v9798_v34  ;;  %v9254_v44 = vcombine.high %v5142_v4, %v5156_v54  ;;  %v12048_v4 = vld [vmem:[#allocation23_spill] sm:$0xff] }
 0x2a3   :  { %v6524_v6 = vrot.slane %v12044_v38, %v9798_v34  ;;  %v11270_v15 = vrot.slane %v8248_v55, %v9798_v34  ;;  %v12045_v43 = vcombine.low %v10819_v61, %v10822_v42  ;;  %v2089_v51 = vadd.f32 %v12046_v46, %v1685_v19  ;;  %v11281_v38 = vpop.permute.xlu1 %8500 }
 0x2a4   :  { %v11278_v0 = vrot.slane %v9253_v57, %v9798_v34  ;;  %v3607_v22 = vrot.slane %v3593_v8, %v9798_v34  ;;  %v3608_v47 = vcombine.high %v3600_v21, %v3600_v21  ;;  %12047 = vst [vmem:[#allocation14_spill] sm:$0xff] %v11281_v38  ;;  %v2058_v55 = vadd.f32 %v12048_v4, %v11099_v60 }
 0x2a5   :  { %v6377_v32 = vrot.slane %v12045_v43, %v9798_v34  ;;  %v6532_v40 = vcombine.low %v6524_v6, %v6531_v31  ;;  %v2153_v17 = vmax.f32 %v2089_v51, 0.0  ;;  %v8085_v61 = vcombine.low %v11046_v36, %v11049_v45 }
 0x2a6   :  { %v11288_v42 = vrot.slane %v8250_v25, %v9798_v34  ;;  %v3609_v19 = vcombine.high %v3607_v22, %v3607_v22  ;;  %v3616_v57 = vrot.slane %v3600_v21, %v9798_v34  ;;  %v3630_v46 = vrot.slane %v3608_v47, %v9798_v34 }
 0x2a7   :  { %v6385_v54 = vcombine.low %v6377_v32, %v6384_v49  ;;  %8563 = vperm.xlu0 %9269, %v6532_v40   ;;  %v11293_v6 = vrot.slane %v9254_v44, %v9798_v34  ;;  %v5161_v51 = vcombine.high %v2153_v17, %v2153_v17  ;;  %v5168_v8 = vrot.slane %v2153_v17, %v9798_v34  ;;  %v11304_v17 = vpop.permute.xlu1 %8596 }
 0x2a8   :  { %v2122_v60 = vmax.f32 %v2058_v55, 0.0  ;;  %v3623_v31 = vrot.slane %v3607_v22, %v9798_v34  ;;  %v3637_v36 = vrot.slane %v3609_v19, %v9798_v34  ;;  %v6729_v45 = vcombine.low %v3616_v57, %v3630_v46  ;;  %12049 = vst [vmem:[#allocation37_spill] sm:$0xff] %v11304_v17 }
 0x2a9   :  { %8554 = vperm.xlu1 %9270, %v6385_v54   ;;  %v9191_v25 = vcombine.high %v3616_v57, %v3630_v46  ;;  %v5175_v49 = vrot.slane %v5161_v51, %v9798_v34  ;;  %v5176_v21 = vcombine.high %v5168_v8, %v5168_v8  ;;  %v8099_v32 = vrot.slane %v8085_v61, %v9798_v34 }
 0x2aa   :  { %v3642_v43 = vcombine.high %v2122_v60, %v2122_v60  ;;  %v6731_v47 = vcombine.low %v3623_v31, %v3637_v36  ;;  %v9192_v44 = vcombine.high %v3623_v31, %v3637_v36  ;;  %v11301_v40 = vrot.slane %v6729_v45, %v9798_v34 }
 0x2ab   :  { %v5184_v54 = vrot.slane %v5168_v8, %v9798_v34  ;;  %v11307_v22 = vrot.slane %v9191_v25, %v9798_v34  ;;  %v5177_v4 = vcombine.high %v5175_v49, %v5175_v49  ;;  %v5198_v55 = vrot.slane %v5176_v21, %v9798_v34  ;;  %v12052_v8 = vld [vmem:[#allocation31_spill] sm:$0xff] }
 0x2ac   :  { %v3649_v19 = vrot.slane %v2122_v60, %v9798_v34  ;;  %v3656_v57 = vrot.slane %v3642_v43, %v9798_v34  ;;  %v12051_v46 = vcombine.low %v11018_v11, %v11021_v1  ;;  %v7938_v31 = vcombine.low %v12052_v8, %v10869_v63  ;;  %v1595_v60 = vpop.xlane.xlu0 %1594 }
 0x2ad   :  { %12050 = vst [vmem:[#allocation15_spill] sm:$0xff] %v11307_v22  ;;  %v5191_v36 = vrot.slane %v5175_v49, %v9798_v34  ;;  %v5205_v45 = vrot.slane %v5177_v4, %v9798_v34  ;;  %v8297_v25 = vcombine.low %v5184_v54, %v5198_v55  ;;  %v11323_v17 = vrot.slane %v6731_v47, %v9798_v34 }
 0x2ae   :  { %v8092_v51 = vrot.slane %v12051_v46, %v9798_v34  ;;  %v3657_v21 = vcombine.high %v3649_v19, %v3649_v19  ;;  %v9255_v61 = vcombine.high %v5184_v54, %v5198_v55  ;;  %v3658_v43 = vcombine.high %v3656_v57, %v3656_v57  ;;  %v11336_v54 = vpop.permute.xlu1 %8506  ;;  %v12054_v55 = vld [vmem:[#allocation30_spill] sm:$0xff] }
 0x2af   :  { %v11326_v23 = vrot.slane %v9192_v44, %v9798_v34  ;;  %v8299_v63 = vcombine.low %v5191_v36, %v5205_v45  ;;  %v3665_v1 = vrot.slane %v3649_v19, %v9798_v34  ;;  %v9256_v49 = vcombine.high %v5191_v36, %v5205_v45  ;;  %12053 = vst [vmem:[#allocation38_spill] sm:$0xff] %v11336_v54  ;;  %v12055_v19 = vld [vmem:[#allocation8_spill] sm:$0xff]  ;;  %v12057_v36 = vld [vmem:[#allocation46_spill] sm:$0xff] }
 0x2b0   :  { %v8100_v38 = vcombine.low %v8092_v51, %v8099_v32  ;;  %v3679_v4 = vrot.slane %v3657_v21, %v9798_v34  ;;  %v11333_v46 = vrot.slane %v3658_v43, %v9798_v34  ;;  %v7952_v47 = vrot.slane %v7938_v31, %v9798_v34 }
 0x2b1   :  { %v11339_v32 = vrot.slane %v8297_v25, %v9798_v34  ;;  %v11342_v44 = vrot.slane %v3656_v57, %v9798_v34  ;;  %v12056_v51 = vcombine.low %v12054_v55, %v12055_v19  ;;  %v2090_v45 = vadd.f32 %v12057_v36, %v11127_v52  ;;  %v12058_v57 = vld [vmem:[#allocation24_spill] sm:$0xff]  ;;  %v1691_v55 = vpop.xlane.xlu0 %1690 }
 0x2b2   :  { %8659 = vperm.xlu0 %9269, %v8100_v38   ;;  %v11351_v38 = vrot.slane %v9255_v61, %v9798_v34  ;;  %v11354_v31 = vrot.slane %v8299_v63, %v9798_v34  ;;  %v6778_v21 = vcombine.low %v3665_v1, %v3679_v4  ;;  %v9193_v25 = vcombine.high %v3665_v1, %v3679_v4 }
 0x2b3   :  { %v7945_v8 = vrot.slane %v12056_v51, %v9798_v34  ;;  %v2154_v11 = vmax.f32 %v2090_v45, 0.0  ;;  %v2059_v54 = vadd.f32 %v12058_v57, %v1595_v60  ;;  %v6615_v22 = vcombine.low %v11132_v56, %v11135_v10 }
 0x2b4   :  { %v11360_v19 = vrot.slane %v9256_v49, %v9798_v34  ;;  %v6780_v52 = vcombine.low %v11342_v44, %v11333_v46  ;;  %v9194_v61 = vcombine.high %v11342_v44, %v11333_v46  ;;  %v11367_v63 = vrot.slane %v6778_v21, %v9798_v34 }
 0x2b5   :  { %v7953_v43 = vcombine.low %v7945_v8, %v7952_v47  ;;  %v11370_v1 = vrot.slane %v9193_v25, %v9798_v34  ;;  %v5210_v60 = vcombine.high %v2154_v11, %v2154_v11  ;;  %v5217_v56 = vrot.slane %v2154_v11, %v9798_v34  ;;  %v11384_v8 = vpop.permute.xlu1 %8602 }
 0x2b6   :  { %v2123_v10 = vmax.f32 %v2059_v54, 0.0  ;;  %v12059_v49 = vcombine.low %v11110_v37, %v11114_v30  ;;  %v6629_v47 = vrot.slane %v6615_v22, %v9798_v34  ;;  %v6468_v46 = vcombine.low %v10953_v9, %v10959_v24  ;;  %12061 = vst [vmem:[#allocation16_spill] sm:$0xff] %v11384_v8  ;;  %v11388_v37 = vpop.permute.xlu0 %8494  ;;  %v12062_v24 = vld [vmem:[#allocation47_spill] sm:$0xff] }
 0x2b7   :  { %8650 = vperm.xlu1 %9270, %v7953_v43   ;;  %v12060_v44 = vcombine.low %v10927_v48, %v10931_v39  ;;  %v5224_v11 = vrot.slane %v5210_v60, %v9798_v34  ;;  %v5225_v54 = vcombine.high %v5217_v56, %v5217_v56  ;;  %v5233_v36 = vrot.slane %v5217_v56, %v9798_v34 }
 0x2b8   :  { %v6622_v4 = vrot.slane %v12059_v49, %v9798_v34  ;;  %v3691_v45 = vcombine.high %v2123_v10, %v2123_v10  ;;  %v3698_v30 = vrot.slane %v2123_v10, %v9798_v34  ;;  %v6482_v9 = vrot.slane %v6468_v46, %v9798_v34 }
 0x2b9   :  { %v6475_v51 = vrot.slane %v12060_v44, %v9798_v34  ;;  %v2091_v21 = vadd.f32 %v12062_v24, %v1691_v55  ;;  %v5226_v25 = vcombine.high %v5224_v11, %v5224_v11  ;;  %v5240_v48 = vrot.slane %v5224_v11, %v9798_v34 }
 0x2ba   :  { %v6630_v22 = vcombine.low %v6622_v4, %v6629_v47  ;;  %v5247_v39 = vrot.slane %v5225_v54, %v9798_v34  ;;  %v3705_v43 = vrot.slane %v3691_v45, %v9798_v34  ;;  %v3706_v57 = vcombine.high %v3698_v30, %v3698_v30  ;;  %v11401_v45 = vpop.permute.xlu1 %8512 }
 0x2bb   :  { %v3714_v60 = vrot.slane %v3698_v30, %v9798_v34  ;;  %v6483_v56 = vcombine.low %v6475_v51, %v6482_v9  ;;  %v2155_v49 = vmax.f32 %v2091_v21, 0.0  ;;  %v5254_v10 = vrot.slane %v5226_v25, %v9798_v34  ;;  %12063 = vst [vmem:[#allocation39_spill] sm:$0xff] %v11401_v45 }
 0x2bc   :  { %8569 = vperm.xlu0 %9269, %v6630_v22   ;;  %v8346_v4 = vcombine.low %v5233_v36, %v5247_v39  ;;  %v9257_v47 = vcombine.high %v5233_v36, %v5247_v39  ;;  %v3707_v46 = vcombine.high %v3705_v43, %v3705_v43  ;;  %v3721_v55 = vrot.slane %v3705_v43, %v9798_v34  ;;  %v11409_v36 = vpop.permute.xlu0 %8593 }
 0x2bd   :  { %v3728_v44 = vrot.slane %v3706_v57, %v9798_v34  ;;  %8560 = vperm.xlu1 %9270, %v6483_v56   ;;  %v5259_v11 = vcombine.high %v2155_v49, %v2155_v49  ;;  %v5266_v54 = vrot.slane %v2155_v49, %v9798_v34  ;;  %v8348_v24 = vcombine.low %v5240_v48, %v5254_v10 }
 0x2be   :  { %v9258_v30 = vcombine.high %v5240_v48, %v5254_v10  ;;  %v11404_v51 = vrot.slane %v8346_v4, %v9798_v34  ;;  %v11407_v22 = vrot.slane %v9257_v47, %v9798_v34  ;;  %v3735_v9 = vrot.slane %v3707_v46, %v9798_v34 }
 0x2bf   :  { %v6827_v21 = vcombine.low %v3714_v60, %v3728_v44  ;;  %v9195_v25 = vcombine.high %v3714_v60, %v3728_v44  ;;  %v5273_v39 = vrot.slane %v5259_v11, %v9798_v34  ;;  %v11416_v57 = vrot.slane %v6780_v52, %v9798_v34 }
 0x2c0   :  { %v11419_v48 = vrot.slane %v9194_v61, %v9798_v34  ;;  %v5274_v56 = vcombine.high %v5266_v54, %v5266_v54  ;;  %v6829_v10 = vcombine.low %v3721_v55, %v3735_v9  ;;  %v9196_v4 = vcombine.high %v3721_v55, %v3735_v9  ;;  %v11431_v11 = vpop.permute.xlu0 %8503  ;;  %v12064_v9 = vld [vmem:[#allocation25_spill] sm:$0xff] }
 0x2c1   :  { %v11424_v47 = vrot.slane %v6827_v21, %v9798_v34  ;;  %v11427_v60 = vrot.slane %v9195_v25, %v9798_v34  ;;  %v5275_v46 = vcombine.high %v5273_v39, %v5273_v39  ;;  %v5282_v44 = vrot.slane %v5266_v54, %v9798_v34  ;;  %v11443_v25 = vpop.permute.xlu1 %8608 }
 0x2c2   :  { %v5296_v52 = vrot.slane %v5274_v56, %v9798_v34  ;;  %v11434_v61 = vrot.slane %v8348_v24, %v9798_v34  ;;  %v11437_v49 = vrot.slane %v9258_v30, %v9798_v34  ;;  %v2060_v21 = vadd.f32 %v12064_v9, %v11162_v28 }
 0x2c3   :  { %v5289_v54 = vrot.slane %v5273_v39, %v9798_v34  ;;  %v5303_v56 = vrot.slane %v5275_v46, %v9798_v34  ;;  %v8183_v24 = vcombine.low %v11160_v12, %v11169_v41  ;;  %v11450_v45 = vrot.slane %v6829_v10, %v9798_v34 }
 0x2c4   :  { %v8395_v43 = vcombine.low %v5282_v44, %v5296_v52  ;;  %v9259_v30 = vcombine.high %v5282_v44, %v5296_v52  ;;  %v2124_v8 = vmax.f32 %v2060_v21, 0.0  ;;  %v8036_v55 = vcombine.low %v10979_v5, %v10982_v26 }
 0x2c5   :  { %v11455_v28 = vrot.slane %v9196_v4, %v9798_v34  ;;  %v12065_v46 = vcombine.low %v11146_v14, %v11157_v53  ;;  %v12066_v12 = vcombine.low %v10964_v35, %v10967_v18  ;;  %v8197_v5 = vrot.slane %v8183_v24, %v9798_v34  ;;  %v12067_v14 = vld [vmem:[#allocation48_spill] sm:$0xff]  ;;  %v11481_v24 = vpop.permute.xlu1 %8518 }
 0x2c6   :  { %v3740_v10 = vcombine.high %v2124_v8, %v2124_v8  ;;  %v3747_v44 = vrot.slane %v2124_v8, %v9798_v34  ;;  %v8050_v26 = vrot.slane %v8036_v55, %v9798_v34  ;;  %v8397_v4 = vcombine.low %v5289_v54, %v5303_v56 }
 0x2c7   :  { %v8190_v9 = vrot.slane %v12065_v46, %v9798_v34  ;;  %v8043_v41 = vrot.slane %v12066_v12, %v9798_v34  ;;  %v9260_v52 = vcombine.high %v5289_v54, %v5303_v56  ;;  %v11471_v21 = vrot.slane %v8395_v43, %v9798_v34  ;;  %v11475_v46 = vpop.permute.xlu0 %8599 }
 0x2c8   :  { %v2092_v53 = vadd.f32 %v12067_v14, %v11199_v50  ;;  %v11478_v35 = vrot.slane %v9259_v30, %v9798_v34  ;;  %v3754_v18 = vrot.slane %v3740_v10, %v9798_v34  ;;  %v3755_v8 = vcombine.high %v3747_v44, %v3747_v44 }
 0x2c9   :  { %v8198_v12 = vcombine.low %v8190_v9, %v8197_v5  ;;  %v3763_v55 = vrot.slane %v3747_v44, %v9798_v34  ;;  %v8051_v54 = vcombine.low %v8043_v41, %v8050_v26  ;;  %v8232_v43 = vcombine.low %v11238_v20, %v11241_v3 }
 0x2ca   :  { %v2156_v56 = vmax.f32 %v2092_v53, 0.0  ;;  %v3756_v39 = vcombine.high %v3754_v18, %v3754_v18  ;;  %v3777_v50 = vrot.slane %v3755_v8, %v9798_v34  ;;  %v12068_v30 = vcombine.low %v11212_v62, %v11215_v27 }
 0x2cb   :  { %8665 = vperm.xlu0 %9269, %v8198_v12   ;;  %v6566_v9 = vcombine.low %v11060_v33, %v11067_v16  ;;  %v3770_v5 = vrot.slane %v3754_v18, %v9798_v34  ;;  %8656 = vperm.xlu1 %9270, %v8051_v54   ;;  %v8246_v20 = vrot.slane %v8232_v43, %v9798_v34  ;;  %v12069_v33 = vld [vmem:[#allocation9_spill] sm:$0xff]  ;;  %v12070_v16 = vld [vmem:[#allocation32_spill] sm:$0xff]  ;;  %v11503_v54 = vpop.permute.xlu0 %8509 }
 0x2cc   :  { %v8239_v10 = vrot.slane %v12068_v30, %v9798_v34  ;;  %v5308_v41 = vcombine.high %v2156_v56, %v2156_v56  ;;  %v5315_v44 = vrot.slane %v2156_v56, %v9798_v34  ;;  %v3784_v3 = vrot.slane %v3756_v39, %v9798_v34 }
 0x2cd   :  { %v6876_v26 = vcombine.low %v3763_v55, %v3777_v50  ;;  %v9197_v14 = vcombine.high %v3763_v55, %v3777_v50  ;;  %v6580_v53 = vrot.slane %v6566_v9, %v9798_v34  ;;  %v12071_v18 = vcombine.low %v12069_v33, %v12070_v16  ;;  %v11512_v50 = vpop.permute.xlu1 %8614  ;;  %v12073_v16 = vld [vmem:[#allocation34_spill] sm:$0xff] }
 0x2ce   :  { %v5322_v62 = vrot.slane %v5308_v41, %v9798_v34  ;;  %v5323_v27 = vcombine.high %v5315_v44, %v5315_v44  ;;  %v8247_v8 = vcombine.low %v8239_v10, %v8246_v20  ;;  %v11506_v56 = vrot.slane %v8397_v4, %v9798_v34 }
 0x2cf   :  { %v6573_v12 = vrot.slane %v12071_v18, %v9798_v34  ;;  %v11509_v39 = vrot.slane %v9260_v52, %v9798_v34  ;;  %v6878_v55 = vcombine.low %v3770_v5, %v3784_v3  ;;  %v5331_v43 = vrot.slane %v5315_v44, %v9798_v34 }
 0x2d0   :  { %v9198_v30 = vcombine.high %v3770_v5, %v3784_v3  ;;  %v5324_v10 = vcombine.high %v5322_v62, %v5322_v62  ;;  %v5345_v9 = vrot.slane %v5323_v27, %v9798_v34  ;;  %8668 = vperm.xlu0 %9269, %v8247_v8   ;;  %v8427_v20 = vcombine.low %v11471_v21, %v11478_v35 }
 0x2d1   :  { %v6581_v41 = vcombine.low %v6573_v12, %v6580_v53  ;;  %v11518_v4 = vrot.slane %v6876_v26, %v9798_v34  ;;  %v11521_v52 = vrot.slane %v9197_v14, %v9798_v34  ;;  %v6713_v44 = vcombine.low %v11253_v2, %v11258_v7  ;;  %v12074_v14 = vld [vmem:[#allocation11_spill] sm:$0xff] }
 0x2d2   :  { %v5338_v33 = vrot.slane %v5322_v62, %v9798_v34  ;;  %v5352_v5 = vrot.slane %v5324_v10, %v9798_v34  ;;  %v8444_v3 = vcombine.low %v5331_v43, %v5345_v9  ;;  %v9261_v27 = vcombine.high %v5331_v43, %v5345_v9  ;;  %v11542_v10 = vpop.permute.xlu0 %8605  ;;  %v12076_v9 = vld [vmem:[#allocation33_spill] sm:$0xff] }
 0x2d3   :  { %8566 = vperm.xlu1 %9270, %v6581_v41   ;;  %v12072_v53 = vcombine.low %v11230_v13, %v11233_v59  ;;  %v6727_v26 = vrot.slane %v6713_v44, %v9798_v34  ;;  %v8134_v18 = vcombine.low %v12074_v14, %v12073_v16  ;;  %v8281_v2 = vcombine.low %v11288_v42, %v11293_v6  ;;  %v12075_v59 = vld [vmem:[#allocation10_spill] sm:$0xff]  ;;  %v11550_v6 = vpop.permute.xlu1 %8524 }
 0x2d4   :  { %v11537_v7 = vrot.slane %v6878_v55, %v9798_v34  ;;  %v11540_v62 = vrot.slane %v9198_v30, %v9798_v34  ;;  %v8446_v12 = vcombine.low %v5338_v33, %v5352_v5  ;;  %v9262_v43 = vcombine.high %v5338_v33, %v5352_v5 }
 0x2d5   :  { %v6720_v8 = vrot.slane %v12072_v53, %v9798_v34  ;;  %v12077_v41 = vcombine.low %v12075_v59, %v12076_v9  ;;  %v8148_v53 = vrot.slane %v8134_v18, %v9798_v34  ;;  %v8295_v42 = vrot.slane %v8281_v2, %v9798_v34 }
 0x2d6   :  { %v11553_v55 = vrot.slane %v8444_v3, %v9798_v34  ;;  %v11556_v30 = vrot.slane %v9261_v27, %v9798_v34  ;;  %v12078_v33 = vcombine.low %v11270_v15, %v11278_v0  ;;  %v11567_v16 = vrot.slane %v8446_v12, %v9798_v34  ;;  %v12080_v0 = vld [vmem:[#allocation35_spill] sm:$0xff] }
 0x2d7   :  { %v6728_v13 = vcombine.low %v6720_v8, %v6727_v26  ;;  %v8141_v44 = vrot.slane %v12077_v41, %v9798_v34  ;;  %v6664_v8 = vcombine.low %v11222_v29, %v11225_v58  ;;  %v6908_v26 = vcombine.low %v11518_v4, %v11521_v52  ;;  %v12079_v58 = vld [vmem:[#allocation12_spill] sm:$0xff] }
 0x2d8   :  { %v8288_v5 = vrot.slane %v12078_v33, %v9798_v34  ;;  %v8330_v27 = vcombine.low %v11354_v31, %v11360_v19  ;;  %v11572_v14 = vrot.slane %v9262_v43, %v9798_v34  ;;  %v6762_v29 = vcombine.low %v11323_v17, %v11326_v23  ;;  %v12086_v33 = vld [vmem:[#allocation3_spill] sm:$0xff] }
 0x2d9   :  { %8575 = vperm.xlu0 %9269, %v6728_v13   ;;  %v8149_v3 = vcombine.low %v8141_v44, %v8148_v53  ;;  %v6678_v15 = vrot.slane %v6664_v8, %v9798_v34  ;;  %v12081_v2 = vcombine.low %v12079_v58, %v12080_v0  ;;  %v12082_v59 = vlaneseq  ;;  %v11596_v44 = vpop.permute.xlu0 %8515  ;;  %v12089_v0 = vld [vmem:[#allocation50_spill] sm:$0xff] }
 0x2da   :  { %v8296_v18 = vcombine.low %v8288_v5, %v8295_v42  ;;  %v8344_v13 = vrot.slane %v8330_v27, %v9798_v34  ;;  %v6811_v31 = vcombine.low %v11416_v57, %v11419_v48  ;;  %v8476_v19 = vcombine.low %v11553_v55, %v11556_v30  ;;  %v12084_v57 = vld [vmem:[#allocation15_spill] sm:$0xff] }
 0x2db   :  { %8662 = vperm.xlu1 %9270, %v8149_v3   ;;  %v6671_v12 = vrot.slane %v12081_v2, %v9798_v34  ;;  %v11583_v9 = vand.u32 127, %v12082_v59  ;;  %v12083_v23 = vcombine.low %v11339_v32, %v11351_v38  ;;  %v6776_v43 = vrot.slane %v6762_v29, %v9798_v34  ;;  %v11607_v38 = vpop.permute.xlu1 %8620 }
 0x2dc   :  { %v6860_v41 = vcombine.low %v11450_v45, %v11455_v28  ;;  %v12085_v48 = vcombine.low %v11301_v40, %v12084_v57  ;;  %v12087_v45 = vcombine.low %v11367_v63, %v11370_v1  ;;  %v6825_v8 = vrot.slane %v6811_v31, %v9798_v34  ;;  %v12094_v57 = vld [vmem:[#allocation4_spill] sm:$0xff] }
 0x2dd   :  { %v8337_v17 = vrot.slane %v12083_v23, %v9798_v34  ;;  %8671 = vperm.xlu0 %9269, %v8296_v18   ;;  %v6679_v53 = vcombine.low %v6671_v12, %v6678_v15  ;;  %v11604_v5 = vsub.s32 %v11583_v9, %v12086_v33  ;;  %v8691_v32 = vadd.s32 4294967288, %v11583_v9  ;;  %v12092_v12 = vld [vmem:[#allocation36_spill] sm:$0xff] }
 0x2de   :  { %v6769_v42 = vrot.slane %v12085_v48, %v9798_v34  ;;  %v6818_v28 = vrot.slane %v12087_v45, %v9798_v34  ;;  %v12088_v40 = vcombine.low %v11424_v47, %v11427_v60  ;;  %v8379_v27 = vcombine.low %v11434_v61, %v11437_v49  ;;  %v12090_v47 = vld [vmem:[#allocation5_spill] sm:$0xff]  ;;  %v12095_v48 = vld [vmem:[#allocation27_spill] sm:$0xff] }
 0x2df   :  { %8572 = vperm.xlu1 %9270, %v6679_v53   ;;  %v8345_v18 = vcombine.low %v8337_v17, %v8344_v13  ;;  %v6874_v29 = vrot.slane %v6860_v41, %v9798_v34  ;;  %v11622_v58 = vsub.s32 %v8691_v32, %v12086_v33  ;;  %v8690_v63 = vrot.slane %v11388_v37, %v11604_v5  ;;  %v12091_v61 = vld [vmem:[#allocation13_spill] sm:$0xff]  ;;  %v11651_v45 = vpop.permute.xlu1 %8623 }
 0x2e0   :  { %v6867_v3 = vrot.slane %v12088_v40, %v9798_v34  ;;  %v6777_v15 = vcombine.low %v6769_v42, %v6776_v43  ;;  %v8393_v1 = vrot.slane %v8379_v27, %v9798_v34  ;;  %v7693_v60 = vcombine.low %v12090_v47, %v12089_v0 }
 0x2e1   :  { %8674 = vperm.xlu0 %9269, %v8345_v18   ;;  %v8882_v49 = vrot.slane %v11409_v36, %v11622_v58  ;;  %v8878_v2 = vrot.slane %v12091_v61, %v11604_v5  ;;  %v8695_v13 = vrot.slane %v12092_v12, %v11622_v58  ;;  %v8428_v31 = vcombine.low %v11506_v56, %v11509_v39  ;;  %v11643_v36 = vpop.permute.xlu0 %8611  ;;  %v12099_v12 = vld [vmem:[#allocation38_spill] sm:$0xff] }
 0x2e2   :  { %v6826_v37 = vcombine.low %v6818_v28, %v6825_v8  ;;  %v12093_v23 = vcombine.low %v11404_v51, %v11407_v22  ;;  %v7707_v43 = vrot.slane %v7693_v60, %v9798_v34  ;;  %v8705_v41 = vadd.s32 4294967272, %v11583_v9 }
 0x2e3   :  { %8578 = vperm.xlu1 %9270, %v6777_v15   ;;  %v6875_v53 = vcombine.low %v6867_v3, %v6874_v29  ;;  %v12096_v42 = vcombine.low %v12094_v57, %v12095_v48  ;;  %v8442_v56 = vrot.slane %v8428_v31, %v9798_v34  ;;  %v8698_v39 = vadd.s32 4294967280, %v11583_v9  ;;  %v12098_v29 = vld [vmem:[#allocation37_spill] sm:$0xff]  ;;  %v11695_v52 = vpop.permute.xlu1 %8530 }
 0x2e4   :  { %v8386_v17 = vrot.slane %v12093_v23, %v9798_v34  ;;  %v8435_v22 = vrot.slane %v8427_v20, %v9798_v34  ;;  %v11658_v28 = vsub.s32 %v8705_v41, %v12086_v33  ;;  %v6909_v8 = vcombine.low %v11537_v7, %v11540_v62  ;;  %v12097_v20 = vld [vmem:[#allocation14_spill] sm:$0xff] }
 0x2e5   :  { %v7700_v32 = vrot.slane %v12096_v42, %v9798_v34  ;;  %8581 = vperm.xlu0 %9269, %v6826_v37   ;;  %v8883_v40 = vsel %vm8696_vm1, %v8882_v49, %v8878_v2  ;;  %v8697_v27 = vsel %vm8696_vm1, %v8695_v13, %v8690_v63  ;;  %v11665_v18 = vsub.s32 %v8698_v39, %v12086_v33  ;;  %v12100_v37 = vld [vmem:[#allocation16_spill] sm:$0xff] }
 0x2e6   :  { %v8394_v51 = vcombine.low %v8386_v17, %v8393_v1  ;;  %v8443_v15 = vcombine.low %v8435_v22, %v8442_v56  ;;  %v8709_v21 = vrot.slane %v11431_v11, %v11658_v28  ;;  %v8477_v35 = vcombine.low %v11567_v16, %v11572_v14  ;;  %v11684_v14 = vpop.permute.xlu0 %8521 }
 0x2e7   :  { %v7708_v3 = vcombine.low %v7700_v32, %v7707_v43  ;;  %8584 = vperm.xlu1 %9270, %v6875_v53   ;;  %v8702_v7 = vrot.slane %v12097_v20, %v11665_v18  ;;  %v8892_v62 = vrot.slane %v11475_v46, %v11658_v28  ;;  %v8887_v63 = vrot.slane %v12098_v29, %v11665_v18  ;;  %v12101_v32 = vld [vmem:[#allocation39_spill] sm:$0xff] }
 0x2e8   :  { %v8719_v1 = vadd.s32 4294967256, %v11583_v9  ;;  %v6916_v11 = vrot.slane %v6908_v26, %v9798_v34  ;;  %v6923_v0 = vrot.slane %v6909_v8, %v9798_v34  ;;  %v8712_v16 = vadd.s32 4294967264, %v11583_v9 }
 0x2e9   :  { %8677 = vperm.xlu0 %9269, %v8394_v51   ;;  %v8704_v46 = vsel %vm8703_vm2, %v8702_v7, %v8697_v27  ;;  %v8888_v47 = vsel %vm8703_vm2, %v8887_v63, %v8883_v40  ;;  %v8484_v60 = vrot.slane %v8476_v19, %v9798_v34  ;;  %v8491_v26 = vrot.slane %v8477_v35, %v9798_v34  ;;  %v8627_v51 = vpop.permute.xlu1 %8626 }
 0x2ea   :  { %v11693_v4 = vsub.s32 %v8719_v1, %v12086_v33  ;;  %v11699_v49 = vsub.s32 %v8712_v16, %v12086_v33  ;;  %v8733_v61 = vadd.s32 4294967240, %v11583_v9  ;;  %v8711_v55 = vsel %vm8710_vm3, %v8709_v21, %v8704_v46  ;;  %v8618_v48 = vpop.permute.xlu0 %8617 }
 0x2eb   :  { %8635 = vperm.xlu1 %9270, %v7708_v3   ;;  %v8893_v30 = vsel %vm8710_vm3, %v8892_v62, %v8888_v47  ;;  %v8726_v19 = vadd.s32 4294967248, %v11583_v9  ;;  %v8747_v43 = vadd.s32 4294967224, %v11583_v9  ;;  %v8740_v41 = vadd.s32 4294967232, %v11583_v9 }
 0x2ec   :  { %v8723_v2 = vrot.slane %v11503_v54, %v11693_v4  ;;  %v8716_v13 = vrot.slane %v12099_v12, %v11699_v49  ;;  %v8902_v31 = vrot.slane %v11542_v10, %v11693_v4  ;;  %v8897_v23 = vrot.slane %v12100_v37, %v11699_v49 }
 0x2ed   :  { %v11714_v17 = vsub.s32 %v8733_v61, %v12086_v33  ;;  %8680 = vperm.xlu0 %9269, %v8443_v15   ;;  %v11717_v54 = vsub.s32 %v8726_v19, %v12086_v33  ;;  %v6924_v53 = vcombine.low %v6916_v11, %v6923_v0  ;;  %v11731_v8 = vsub.s32 %v8747_v43, %v12086_v33  ;;  %v11762_v46 = vpop.permute.xlu1 %8629 }
 0x2ee   :  { %v8718_v57 = vsel %vm8717_vm4, %v8716_v13, %v8711_v55  ;;  %v8898_v10 = vsel %vm8717_vm4, %v8897_v23, %v8893_v30  ;;  %v11734_v40 = vsub.s32 %v8740_v41, %v12086_v33  ;;  %v8761_v3 = vadd.s32 4294967208, %v11583_v9  ;;  %v8528_v1 = vpop.permute.xlu0 %8527 }
 0x2ef   :  { %v8737_v42 = vrot.slane %v11596_v44, %v11714_v17  ;;  %v8730_v56 = vrot.slane %v12101_v32, %v11717_v54  ;;  %v8907_v39 = vrot.slane %v11443_v25, %v11717_v54  ;;  %v8725_v22 = vsel %vm8724_vm5, %v8723_v2, %v8718_v57 }
 0x2f0   :  { %v8912_v27 = vrot.slane %v11643_v36, %v11714_v17  ;;  %v8903_v25 = vsel %vm8724_vm5, %v8902_v31, %v8898_v10  ;;  %v8754_v15 = vadd.s32 4294967216, %v11583_v9  ;;  %v8744_v35 = vrot.slane %v11481_v24, %v11734_v40 }
 0x2f1   :  { %8587 = vperm.xlu0 %9269, %v6924_v53   ;;  %v8732_v44 = vsel %vm8731_vm6, %v8730_v56, %v8725_v22  ;;  %v8908_v21 = vsel %vm8731_vm6, %v8907_v39, %v8903_v25  ;;  %v8492_v20 = vcombine.low %v8484_v60, %v8491_v26  ;;  %v8917_v7 = vrot.slane %v11512_v50, %v11734_v40  ;;  %v8537_v43 = vpop.permute.xlu1 %8536 }
 0x2f2   :  { %v11748_v62 = vsub.s32 %v8754_v15, %v12086_v33  ;;  %v8751_v36 = vrot.slane %v11684_v14, %v11731_v8  ;;  %v8739_v29 = vsel %vm8738_vm7, %v8737_v42, %v8732_v44  ;;  %v11754_v63 = vsub.s32 %v8761_v3, %v12086_v33 }
 0x2f3   :  { %v8775_v11 = vadd.s32 4294967192, %v11583_v9  ;;  %v8746_v24 = vsel %vm8745_vm8, %v8744_v35, %v8739_v29  ;;  %v8922_v50 = vrot.slane %v8618_v48, %v11731_v8  ;;  %v8913_v0 = vsel %vm8738_vm7, %v8912_v27, %v8908_v21 }
 0x2f4   :  { %v8758_v16 = vrot.slane %v11550_v6, %v11748_v62  ;;  %v8918_v14 = vsel %vm8745_vm8, %v8917_v7, %v8913_v0  ;;  %v8927_v47 = vrot.slane %v11607_v38, %v11748_v62  ;;  %v8768_v60 = vadd.s32 4294967200, %v11583_v9  ;;  %v8534_v6 = vpop.permute.xlu0 %8533 }
 0x2f5   :  { %8683 = vperm.xlu0 %9269, %v8492_v20   ;;  %v8789_v26 = vadd.s32 4294967176, %v11583_v9  ;;  %v8765_v61 = vrot.slane %v8528_v1, %v11754_v63  ;;  %v8753_v2 = vsel %vm8752_vm9, %v8751_v36, %v8746_v24  ;;  %v11772_v55 = vsub.s32 %v8775_v11, %v12086_v33  ;;  %v11806_v3 = vpop.permute.xlu1 %8632 }
 0x2f6   :  { %v8932_v30 = vrot.slane %v11651_v45, %v11754_v63  ;;  %v8760_v19 = vsel %vm8759_vm10, %v8758_v16, %v8753_v2  ;;  %v8923_v12 = vsel %vm8752_vm9, %v8922_v50, %v8918_v14  ;;  %v11779_v38 = vsub.s32 %v8768_v60, %v12086_v33 }
 0x2f7   :  { %v8928_v13 = vsel %vm8759_vm10, %v8927_v47, %v8923_v12  ;;  %v8782_v31 = vadd.s32 4294967184, %v11583_v9  ;;  %v11786_v23 = vsub.s32 %v8789_v26, %v12086_v33  ;;  %v8779_v41 = vrot.slane %v8534_v6, %v11772_v55 }
 0x2f8   :  { %v8772_v37 = vrot.slane %v11695_v52, %v11779_v38  ;;  %v8937_v45 = vrot.slane %v8627_v51, %v11779_v38  ;;  %v8933_v53 = vsel %vm8766_vm11, %v8932_v30, %v8928_v13  ;;  %v8767_v57 = vsel %vm8766_vm11, %v8765_v61, %v8760_v19  ;;  %v8540_v10 = vpop.permute.xlu0 %8539 }
 0x2f9   :  { %v11793_v48 = vsub.s32 %v8782_v31, %v12086_v33  ;;  %v8793_v56 = vrot.slane %v8540_v10, %v11786_v23  ;;  %v8543_v27 = vpop.permute.xlu1 %8542  ;;  %vm9060_vm0 = vcmp.lt.s32.totalorder %v12082_v59, 512 }
 0x2fa   :  { %v8774_v9 = vsel %vm8773_vm12, %v8772_v37, %v8767_v57  ;;  %v11797_v52 = vsel %vm8773_vm12, %v8937_v45, %v8933_v53  ;;  %v8799_v60 = vrot.slane %v8543_v27, %v11604_v5 }
 0x2fb   :  { %v8781_v42 = vsel %vm8780_vm13, %v8779_v41, %v8774_v9  ;;  %v8786_v32 = vrot.slane %v8537_v43, %v11793_v48 }
 0x2fc   :  { %v8546_v33 = vpop.permute.xlu0 %8545 }
 0x2fd   :  { %v8788_v39 = vsel %vm8787_vm14, %v8786_v32, %v8781_v42  ;;  %v8803_v61 = vrot.slane %v8546_v33, %v11622_v58 }
 0x2fe   :  { %v11804_v51 = vsel %vm8794_vm15, %v8793_v56, %v8788_v39 }
 0x2ff   :  { %v8804_v6 = vsel %vm8696_vm1, %v8803_v61, %v8799_v60 }
 0x300   :  { %v8642_v22 = vpop.permute.xlu0 %8641  ;;  %v8639_v15 = vpop.permute.xlu1 %8638 }
 0x301   :  { %v8957_v30 = vrot.slane %v8639_v15, %v11604_v5  ;;  %v8961_v37 = vrot.slane %v8642_v22, %v11622_v58 }
 0x303   :  { %v8962_v41 = vsel %vm8696_vm1, %v8961_v37, %v8957_v30 }
 0x304   :  { %v8552_v44 = vpop.permute.xlu0 %8551 }
 0x305   :  { %v8813_v45 = vrot.slane %v8552_v44, %v11658_v28 }
 0x308   :  { %v8648_v25 = vpop.permute.xlu0 %8647 }
 0x309   :  { %v8971_v42 = vrot.slane %v8648_v25, %v11658_v28 }
 0x30c   :  { %v8558_v21 = vpop.permute.xlu0 %8557 }
 0x30d   :  { %v8823_v58 = vrot.slane %v8558_v21, %v11693_v4 }
 0x30e   :  { %v8549_v35 = vpop.permute.xlu1 %8548 }
 0x30f   :  { %v8808_v26 = vrot.slane %v8549_v35, %v11665_v18 }
 0x311   :  { %v8809_v19 = vsel %vm8703_vm2, %v8808_v26, %v8804_v6 }
 0x312   :  { %v8654_v20 = vpop.permute.xlu0 %8653  ;;  %v8814_v53 = vsel %vm8710_vm3, %v8813_v45, %v8809_v19 }
 0x313   :  { %v8981_v27 = vrot.slane %v8654_v20, %v11693_v4 }
 0x314   :  { %v8645_v7 = vpop.permute.xlu1 %8644 }
 0x315   :  { %v8966_v12 = vrot.slane %v8645_v7, %v11665_v18 }
 0x317   :  { %v8967_v57 = vsel %vm8703_vm2, %v8966_v12, %v8962_v41  ;;  %v8942_v41 = vrot.slane %v11762_v46, %v11772_v55 }
 0x318   :  { %v8972_v56 = vsel %vm8710_vm3, %v8971_v42, %v8967_v57 }
 0x322   :  { %v8564_v36 = vpop.permute.xlu0 %8563 }
 0x323   :  { %v8833_v15 = vrot.slane %v8564_v36, %v11714_v17 }
 0x324   :  { %v8555_v29 = vpop.permute.xlu1 %8554 }
 0x325   :  { %v8818_v13 = vrot.slane %v8555_v29, %v11699_v49 }
 0x327   :  { %v8819_v5 = vsel %vm8717_vm4, %v8818_v13, %v8814_v53 }
 0x328   :  { %v8824_v39 = vsel %vm8724_vm5, %v8823_v58, %v8819_v5 }
 0x32d   :  { %v8660_v1 = vpop.permute.xlu0 %8659 }
 0x332   :  { %v8651_v11 = vpop.permute.xlu1 %8650 }
 0x333   :  { %v8976_v10 = vrot.slane %v8651_v11, %v11699_v49 }
 0x335   :  { %v8977_v33 = vsel %vm8717_vm4, %v8976_v10, %v8972_v56 }
 0x336   :  { %v8982_v21 = vsel %vm8724_vm5, %v8981_v27, %v8977_v33 }
 0x337   :  { %v8570_v24 = vpop.permute.xlu0 %8569 }
 0x338   :  { %v8561_v50 = vpop.permute.xlu1 %8560  ;;  %v8843_v4 = vrot.slane %v8570_v24, %v11731_v8 }
 0x339   :  { %v8828_v18 = vrot.slane %v8561_v50, %v11717_v54  ;;  %v8991_v50 = vrot.slane %v8660_v1, %v11714_v17 }
 0x33b   :  { %v8829_v22 = vsel %vm8731_vm6, %v8828_v18, %v8824_v39 }
 0x33c   :  { %v8834_v35 = vsel %vm8738_vm7, %v8833_v15, %v8829_v22 }
 0x346   :  { %v8666_v0 = vpop.permute.xlu0 %8665  ;;  %v8657_v16 = vpop.permute.xlu1 %8656 }
 0x347   :  { %v8986_v44 = vrot.slane %v8657_v16, %v11717_v54 }
 0x349   :  { %v8987_v7 = vsel %vm8731_vm6, %v8986_v44, %v8982_v21 }
 0x34a   :  { %v8992_v36 = vsel %vm8738_vm7, %v8991_v50, %v8987_v7 }
 0x34b   :  { %v11808_v14 = vpop.permute.xlu0 %8668 }
 0x34c   :  { %v9006_v19 = vrot.slane %v11808_v14, %v11748_v62  ;;  %v8947_v14 = vrot.slane %v11806_v3, %v11793_v48 }
 0x34e   :  { %v8567_v47 = vpop.permute.xlu1 %8566 }
 0x34f   :  { %v8838_v49 = vrot.slane %v8567_v47, %v11734_v40 }
 0x351   :  { %v8839_v29 = vsel %vm8745_vm8, %v8838_v49, %v8834_v35 }
 0x352   :  { %v8844_v16 = vsel %vm8752_vm9, %v8843_v4, %v8839_v29 }
 0x354   :  { %v8576_v2 = vpop.permute.xlu0 %8575 }
 0x355   :  { %v8853_v6 = vrot.slane %v8576_v2, %v11754_v63 }
 0x356   :  { %v8663_v31 = vpop.permute.xlu1 %8662 }
 0x357   :  { %v8996_v11 = vrot.slane %v8663_v31, %v11734_v40  ;;  %v9001_v40 = vrot.slane %v8666_v0, %v11731_v8 }
 0x358   :  { %v8672_v43 = vpop.permute.xlu0 %8671 }
 0x359   :  { %v8997_v47 = vsel %vm8745_vm8, %v8996_v11, %v8992_v36  ;;  %v9011_v31 = vrot.slane %v8672_v43, %v11754_v63 }
 0x35a   :  { %v8573_v9 = vpop.permute.xlu1 %8572  ;;  %v9002_v24 = vsel %vm8752_vm9, %v9001_v40, %v8997_v47 }
 0x35b   :  { %v8848_v54 = vrot.slane %v8573_v9, %v11748_v62  ;;  %v9007_v0 = vsel %vm8759_vm10, %v9006_v19, %v9002_v24 }
 0x35c   :  { %v8675_v32 = vpop.permute.xlu0 %8674  ;;  %v9012_v57 = vsel %vm8766_vm11, %v9011_v31, %v9007_v0 }
 0x35d   :  { %v8849_v60 = vsel %vm8759_vm10, %v8848_v54, %v8844_v16  ;;  %v9016_v2 = vrot.slane %v8675_v32, %v11779_v38 }
 0x35e   :  { %v8579_v28 = vpop.permute.xlu1 %8578  ;;  %v8854_v30 = vsel %vm8766_vm11, %v8853_v6, %v8849_v60 }
 0x35f   :  { %v8858_v26 = vrot.slane %v8579_v28, %v11779_v38  ;;  %v9017_v10 = vsel %vm8773_vm12, %v9016_v2, %v9012_v57 }
 0x360   :  { %v8582_v25 = vpop.permute.xlu0 %8581 }
 0x361   :  { %v8863_v17 = vrot.slane %v8582_v25, %v11772_v55  ;;  %v8859_v12 = vsel %vm8773_vm12, %v8858_v26, %v8854_v30 }
 0x362   :  { %v8585_v61 = vpop.permute.xlu1 %8584 }
 0x363   :  { %v8868_v13 = vrot.slane %v8585_v61, %v11793_v48  ;;  %v8864_v8 = vsel %vm8780_vm13, %v8863_v17, %v8859_v12 }
 0x364   :  { %v8678_v20 = vpop.permute.xlu0 %8677 }
 0x365   :  { %v9021_v53 = vrot.slane %v8678_v20, %v11772_v55  ;;  %v8869_v63 = vsel %vm8787_vm14, %v8868_v13, %v8864_v8  ;;  %v8943_v55 = vsel %vm8780_vm13, %v8942_v41, %v11797_v52 }
 0x366   :  { %v8636_v37 = vpop.permute.xlu1 %8635  ;;  %v8948_v9 = vsel %vm8787_vm14, %v8947_v14, %v8943_v55 }
 0x367   :  { %v8952_v38 = vrot.slane %v8636_v37, %v11786_v23  ;;  %v9022_v18 = vsel %vm8780_vm13, %v9021_v53, %v9017_v10 }
 0x368   :  { %v8681_v1 = vpop.permute.xlu0 %8680 }
 0x369   :  { %v9026_v43 = vrot.slane %v8681_v1, %v11793_v48  ;;  %v8953_v58 = vsel %vm8794_vm15, %v8952_v38, %v8948_v9 }
 0x36b   :  { %v9027_v48 = vsel %vm8787_vm14, %v9026_v43, %v9022_v18 }
 0x36c   :  { %v8588_v45 = vpop.permute.xlu0 %8587 }
 0x36d   :  { %v8873_v62 = vrot.slane %v8588_v45, %v11786_v23 }
 0x36f   :  { %v8874_v5 = vsel %vm8794_vm15, %v8873_v62, %v8869_v63 }
 0x370   :  { %v8684_v46 = vpop.permute.xlu0 %8683  ;;  %v9033_v42 = vcombine.low %v11804_v51, %v8874_v5 }
 0x371   :  { %v9031_v3 = vrot.slane %v8684_v46, %v11786_v23 }
 0x372   :  { %v9041_v39 = vrot.slane %v9033_v42, %v9798_v34 }
 0x373   :  { %v9032_v32 = vsel %vm8794_vm15, %v9031_v3, %v9027_v48 }
 0x374   :  { %v9034_v56 = vcombine.low %v8953_v58, %v9032_v32 }
 0x376   :  { %v9048_v33 = vrot.slane %v9034_v56, %v9798_v34 }
 0x378   :  { %v9049_v52 = vcombine.low %v9041_v39, %v9048_v33 }
 0x37a   :  { %v9056_v23 = vrot.slane %v9049_v52, %v9798_v34 }
 0x37c   :  { %9062 = vst.msk [vmem:[%s11894_s4] sm:$0xf] %vm9060_vm0, %v9056_v23 }

</bundles_post_ra>
